<compile_context>
chip_gen: v7x
topology: tpu7x:2x2x1
jax: 0.10.0
libtpu: 0.0.40
codegen_flags: <defaults>
</compile_context>

<pallas_src>
import functools

import jax
import jax.numpy as jnp
from jax.experimental import pallas as pl
from jax.experimental.pallas import tpu as pltpu


def _round_up(n, m):
    return (n + m - 1) // m * m


def _fused_mlp_kernel(x_ref, w1_ref, b1_ref, w2_ref, b2_ref, w3_ref, b3_ref,
                      o_ref, acc_ref):
    """Fused 3-layer MLP.

    Grid: (M tiles, K tiles).  Axis 1 tiles the K (=256*6*6) reduction of
    layer 1; layers 2/3 run on the final K step for the current M tile.
    """
    k = pl.program_id(1)

    @pl.when(k == 0)
    def _():
        # Fold the layer-1 bias into the accumulator init (f32).
        acc_ref[...] = jnp.broadcast_to(b1_ref[...], acc_ref.shape)

    # Layer-1 partial product: bf16 x bf16 on the MXU, accumulated in f32.
    acc_ref[...] += jnp.dot(x_ref[...], w1_ref[...],
                            preferred_element_type=jnp.float32)

    @pl.when(k == pl.num_programs(1) - 1)
    def _():
        # Dropout layers are identity in eval/predict mode.
        h1 = jnp.maximum(acc_ref[...], 0.0).astype(w2_ref.dtype)        # ReLU
        h2 = jnp.dot(h1, w2_ref[...],
                     preferred_element_type=jnp.float32) + b2_ref[...]
        h2 = jnp.maximum(h2, 0.0).astype(w3_ref.dtype)                  # ReLU
        y = jnp.dot(h2, w3_ref[...],
                    preferred_element_type=jnp.float32) + b3_ref[...]
        o_ref[...] = y.astype(o_ref.dtype)


def pack_finetune_params(params, *, tk=2304, weight_dtype=jnp.bfloat16):
    """One-time weight packing (do at model-load time, NOT per forward).

    params: (w1, b1, w2, b2, w3, b3) in torch nn.Linear layout, i.e. w is
            (out_features, in_features) and y = x @ w.T + b.
    Returns (packed_arrays, static_meta).
    """
    w1, b1, w2, b2, w3, b3 = params
    H, D0 = w1.shape
    C = w3.shape[0]
    f32 = jnp.float32

    Dp = _round_up(D0, tk)
    Hp = _round_up(H, 128)
    Cp = _round_up(C, 128)

    # Zero padding is benign: padded rows/cols contribute 0 and padded output
    # columns / batch rows are sliced off.
    w1p = jnp.zeros((Dp, Hp), weight_dtype).at[:D0, :H].set(
        w1.T.astype(weight_dtype))
    b1p = jnp.zeros((1, Hp), f32).at[:, :H].set(b1.astype(f32).reshape(1, H))
    w2p = jnp.zeros((Hp, Hp), weight_dtype).at[:H, :H].set(
        w2.T.astype(weight_dtype))
    b2p = jnp.zeros((1, Hp), f32).at[:, :H].set(b2.astype(f32).reshape(1, H))
    w3p = jnp.zeros((Hp, Cp), weight_dtype).at[:H, :C].set(
        w3.T.astype(weight_dtype))
    b3p = jnp.zeros((1, Cp), f32).at[:, :C].set(b3.astype(f32).reshape(1, C))

    arrays = (w1p, b1p, w2p, b2p, w3p, b3p)
    statics = (int(D0), int(C), int(tk))
    return arrays, statics


@functools.partial(jax.jit, static_argnames=("d0", "num_classes", "tk"))
def _forward_impl(x_feat, w1p, b1p, w2p, b2p, w3p, b3p, *, d0, num_classes, tk):
    B = x_feat.shape[0]
    f = x_feat.reshape(B, -1)                       # f.view(B, 256*6*6)
    assert f.shape[1] == d0, (f.shape, d0)

    Dp, Hp = w1p.shape
    Cp = w3p.shape[1]
    nk = Dp // tk

    # Batch (M) tiling: small batches -> one padded tile; large batches ->
    # 128-row tiles on a parallel grid axis (megacore / MXU friendly).
    Bp = _round_up(max(B, 8), 8)
    if Bp > 128:
        tm = 128
        Bp = _round_up(Bp, tm)
    else:
        tm = Bp
    nm = Bp // tm

    fp = jnp.zeros((Bp, Dp), w1p.dtype).at[:B, :d0].set(f.astype(w1p.dtype))

    out = pl.pallas_call(
        _fused_mlp_kernel,
        out_shape=jax.ShapeDtypeStruct((Bp, Cp), jnp.float32),
        grid_spec=pltpu.PrefetchScalarGridSpec(
            num_scalar_prefetch=0,
            grid=(nm, nk),
            in_specs=[
                pl.BlockSpec((tm, tk), lambda m, k: (m, k)),   # x       (M,K tiled)
                pl.BlockSpec((tk, Hp), lambda m, k: (k, 0)),   # W1^T    (K tiled)
                pl.BlockSpec((1, Hp), lambda m, k: (0, 0)),    # b1 (f32)
                pl.BlockSpec((Hp, Hp), lambda m, k: (0, 0)),   # W2^T (resident)
                pl.BlockSpec((1, Hp), lambda m, k: (0, 0)),    # b2 (f32)
                pl.BlockSpec((Hp, Cp), lambda m, k: (0, 0)),   # W3^T (col-padded)
                pl.BlockSpec((1, Cp), lambda m, k: (0, 0)),    # b3 (f32)
            ],
            out_specs=pl.BlockSpec((tm, Cp), lambda m, k: (m, 0)),
            scratch_shapes=[pltpu.VMEM((tm, Hp), jnp.float32)],  # layer-1 acc
        ),
        compiler_params=pltpu.CompilerParams(
            dimension_semantics=("parallel", "arbitrary"),
            vmem_limit_bytes=48 * 1024 * 1024,
        ),
    )(fp, w1p, b1p, w2p, b2p, w3p, b3p)

    return out[:B, :num_classes]


def finetune_forward(x_feat, packed):
    """FineTuneModel.forward (alexnet branch, inference).

    x_feat: [B, 256, 6, 6] float32 feature map (output of frozen `features`).
    packed: output of pack_finetune_params(params).
    """
    arrays, (d0, num_classes, tk) = packed
    return _forward_impl(x_feat, *arrays, d0=d0, num_classes=num_classes, tk=tk)


def _init_linear(key, out_f, in_f):
    """torch.nn.Linear default init: U(-1/sqrt(fan_in), 1/sqrt(fan_in))."""
    kw, kb = jax.random.split(key)
    bound = 1.0 / float(in_f) ** 0.5
    w = jax.random.uniform(kw, (out_f, in_f), jnp.float32, -bound, bound)
    b = jax.random.uniform(kb, (out_f,), jnp.float32, -bound, bound)
    return w, b


def _reference_forward(x_feat, params):
    w1, b1, w2, b2, w3, b3 = params
    f = x_feat.reshape(x_feat.shape[0], -1)
    h1 = jnp.maximum(f @ w1.T + b1, 0.0)
    h2 = jnp.maximum(h1 @ w2.T + b2, 0.0)
    return h2 @ w3.T + b3


if __name__ == "__main__":
    # Small, deterministic configuration consistent with the alexnet branch:
    # feature map [B, 256, 6, 6]; num_hidden scaled down from 4096 -> 512 to
    # keep the synthetic run small; num_classes = 102 as in the script.
    B = 2
    FEAT_SHAPE = (B, 256, 6, 6)          # NCHW (frozen-backbone output)
    D0 = 256 * 6 * 6
    num_hidden = 512
    num_classes = 102

    root = jax.random.PRNGKey(0)
    kx, k1, k2, k3 = jax.random.split(root, 4)

    x_feat = jax.random.normal(kx, FEAT_SHAPE, jnp.float32)
    w1, b1 = _init_linear(k1, num_hidden, D0)
    w2, b2 = _init_linear(k2, num_hidden, num_hidden)
    w3, b3 = _init_linear(k3, num_classes, num_hidden)
    params = (w1, b1, w2, b2, w3, b3)

    packed = pack_finetune_params(params)     # one-time, off the hot path
    y = finetune_forward(x_feat, packed)
    y = jax.block_until_ready(y)

    assert y.shape == (B, num_classes), y.shape

    y_ref = jax.block_until_ready(_reference_forward(x_feat, params))
    max_err = float(jnp.max(jnp.abs(y - y_ref)))
    assert jnp.allclose(y, y_ref, rtol=2e-2, atol=2e-2), max_err

    print("KERNEL_OK")
</pallas_src>

<mosaic_0001>
module attributes {stable_mosaic.version = 11 : i64} {
  func.func @_fused_mlp_kernel(%arg0: i32, %arg1: i32, %arg2: memref<8x2304xbf16, #tpu.memory_space<vmem>>, %arg3: memref<2304x512xbf16, #tpu.memory_space<vmem>>, %arg4: memref<1x512xf32, #tpu.memory_space<vmem>>, %arg5: memref<512x512xbf16, #tpu.memory_space<vmem>>, %arg6: memref<1x512xf32, #tpu.memory_space<vmem>>, %arg7: memref<512x128xbf16, #tpu.memory_space<vmem>>, %arg8: memref<1x128xf32, #tpu.memory_space<vmem>>, %arg9: memref<8x128xf32, #tpu.memory_space<vmem>>, %arg10: memref<8x512xf32, #tpu.memory_space<vmem>>) attributes {dimension_semantics = [#tpu.dimension_semantics<parallel>, #tpu.dimension_semantics<arbitrary>], iteration_bounds = array<i64: 1, 4>, scalar_prefetch = 0 : i64, scratch_operands = 1 : i64, tpu.core_type = #tpu.core_type<tc>, window_params = [{transform_indices = @transform_0, window_bounds = array<i64: 8, 2304>}, {transform_indices = @transform_1, window_bounds = array<i64: 2304, 512>}, {pipeline_mode = #tpu.pipeline_mode<synchronous>, transform_indices = @transform_2, window_bounds = array<i64: 1, 512>}, {pipeline_mode = #tpu.pipeline_mode<synchronous>, transform_indices = @transform_3, window_bounds = array<i64: 512, 512>}, {pipeline_mode = #tpu.pipeline_mode<synchronous>, transform_indices = @transform_4, window_bounds = array<i64: 1, 512>}, {pipeline_mode = #tpu.pipeline_mode<synchronous>, transform_indices = @transform_5, window_bounds = array<i64: 512, 128>}, {pipeline_mode = #tpu.pipeline_mode<synchronous>, transform_indices = @transform_6, window_bounds = array<i64: 1, 128>}, {transform_indices = @transform_7, window_bounds = array<i64: 8, 128>}]} {
    %c0_i32 = arith.constant 0 : i32
    %0 = arith.cmpi eq, %arg1, %c0_i32 : i32
    %1 = arith.extui %0 : i1 to i32
    %c0_i32_0 = arith.constant 0 : i32
    %2 = arith.cmpi ne, %1, %c0_i32_0 : i32
    scf.if %2 {
      %c0_9 = arith.constant 0 : index
      %c0_10 = arith.constant 0 : index
      %12 = vector.load %arg4[%c0_9, %c0_10] : memref<1x512xf32, #tpu.memory_space<vmem>>, vector<1x512xf32>
      %13 = vector.shape_cast %12 : vector<1x512xf32> to vector<1x512xf32>
      %14 = vector.broadcast %13 : vector<1x512xf32> to vector<8x512xf32>
      %c0_11 = arith.constant 0 : index
      %c0_12 = arith.constant 0 : index
      %15 = vector.load %arg10[%c0_11, %c0_12] : memref<8x512xf32, #tpu.memory_space<vmem>>, vector<8x512xf32>
      tpu.vector_store %arg10[%c0_11, %c0_12], %14 {strides = array<i32>} : memref<8x512xf32, #tpu.memory_space<vmem>>, vector<8x512xf32>,
    } else {
    }
    %c0 = arith.constant 0 : index
    %c0_1 = arith.constant 0 : index
    %3 = vector.load %arg10[%c0, %c0_1] : memref<8x512xf32, #tpu.memory_space<vmem>>, vector<8x512xf32>
    %c0_2 = arith.constant 0 : index
    %c0_3 = arith.constant 0 : index
    %4 = vector.load %arg2[%c0_2, %c0_3] : memref<8x2304xbf16, #tpu.memory_space<vmem>>, vector<8x2304xbf16>
    %c0_4 = arith.constant 0 : index
    %c0_5 = arith.constant 0 : index
    %5 = vector.load %arg3[%c0_4, %c0_5] : memref<2304x512xbf16, #tpu.memory_space<vmem>>, vector<2304x512xbf16>
    %cst = arith.constant dense<0.000000e+00> : vector<8x512xf32>
    %6 = tpu.matmul %4, %5, %cst {dimension_numbers = #tpu.dot_dimension_numbers<[1], [0], [0], [1], [0, 0, 1, 1], [], []>} : vector<8x2304xbf16>, vector<2304x512xbf16>, vector<8x512xf32> -> vector<8x512xf32>
    %7 = arith.addf %3, %6 : vector<8x512xf32>
    %c0_6 = arith.constant 0 : index
    %c0_7 = arith.constant 0 : index
    %8 = vector.load %arg10[%c0_6, %c0_7] : memref<8x512xf32, #tpu.memory_space<vmem>>, vector<8x512xf32>
    tpu.vector_store %arg10[%c0_6, %c0_7], %7 {strides = array<i32>} : memref<8x512xf32, #tpu.memory_space<vmem>>, vector<8x512xf32>,
    %c3_i32 = arith.constant 3 : i32
    %9 = arith.cmpi eq, %arg1, %c3_i32 : i32
    %10 = arith.extui %9 : i1 to i32
    %c0_i32_8 = arith.constant 0 : i32
    %11 = arith.cmpi ne, %10, %c0_i32_8 : i32
    scf.if %11 {
      %c0_9 = arith.constant 0 : index
      %c0_10 = arith.constant 0 : index
      %12 = vector.load %arg10[%c0_9, %c0_10] : memref<8x512xf32, #tpu.memory_space<vmem>>, vector<8x512xf32>
      %cst_11 = arith.constant 0.000000e+00 : f32
      %13 = vector.broadcast %cst_11 : f32 to vector<8x512xf32>
      %14 = arith.maximumf %12, %13 : vector<8x512xf32>
      %15 = arith.truncf %14 : vector<8x512xf32> to vector<8x512xbf16>
      %c0_12 = arith.constant 0 : index
      %c0_13 = arith.constant 0 : index
      %16 = vector.load %arg5[%c0_12, %c0_13] : memref<512x512xbf16, #tpu.memory_space<vmem>>, vector<512x512xbf16>
      %cst_14 = arith.constant dense<0.000000e+00> : vector<8x512xf32>
      %17 = tpu.matmul %15, %16, %cst_14 {dimension_numbers = #tpu.dot_dimension_numbers<[1], [0], [0], [1], [0, 0, 1, 1], [], []>} : vector<8x512xbf16>, vector<512x512xbf16>, vector<8x512xf32> -> vector<8x512xf32>
      %c0_15 = arith.constant 0 : index
      %c0_16 = arith.constant 0 : index
      %18 = vector.load %arg6[%c0_15, %c0_16] : memref<1x512xf32, #tpu.memory_space<vmem>>, vector<1x512xf32>
      %19 = vector.broadcast %18 : vector<1x512xf32> to vector<8x512xf32>
      %20 = arith.addf %17, %19 : vector<8x512xf32>
      %cst_17 = arith.constant 0.000000e+00 : f32
      %21 = vector.broadcast %cst_17 : f32 to vector<8x512xf32>
      %22 = arith.maximumf %20, %21 : vector<8x512xf32>
      %23 = arith.truncf %22 : vector<8x512xf32> to vector<8x512xbf16>
      %c0_18 = arith.constant 0 : index
      %c0_19 = arith.constant 0 : index
      %24 = vector.load %arg7[%c0_18, %c0_19] : memref<512x128xbf16, #tpu.memory_space<vmem>>, vector<512x128xbf16>
      %cst_20 = arith.constant dense<0.000000e+00> : vector<8x128xf32>
      %25 = tpu.matmul %23, %24, %cst_20 {dimension_numbers = #tpu.dot_dimension_numbers<[1], [0], [0], [1], [0, 0, 1, 1], [], []>} : vector<8x512xbf16>, vector<512x128xbf16>, vector<8x128xf32> -> vector<8x128xf32>
      %c0_21 = arith.constant 0 : index
      %c0_22 = arith.constant 0 : index
      %26 = vector.load %arg8[%c0_21, %c0_22] : memref<1x128xf32, #tpu.memory_space<vmem>>, vector<1x128xf32>
      %27 = vector.broadcast %26 : vector<1x128xf32> to vector<8x128xf32>
      %28 = arith.addf %25, %27 : vector<8x128xf32>
      %c0_23 = arith.constant 0 : index
      %c0_24 = arith.constant 0 : index
      %29 = vector.load %arg9[%c0_23, %c0_24] : memref<8x128xf32, #tpu.memory_space<vmem>>, vector<8x128xf32>
      tpu.vector_store %arg9[%c0_23, %c0_24], %28 {strides = array<i32>} : memref<8x128xf32, #tpu.memory_space<vmem>>, vector<8x128xf32>,
    } else {
    }
    return
  }
  func.func @transform_0(%arg0: i32, %arg1: i32) -> (i32, i32) {
    %c0_i32 = arith.constant 0 : i32
    return %arg0, %arg1 : i32, i32
  }
  func.func @transform_1(%arg0: i32, %arg1: i32) -> (i32, i32) {
    %c0_i32 = arith.constant 0 : i32
    %c0_i32_0 = arith.constant 0 : i32
    return %arg1, %c0_i32 : i32, i32
  }
  func.func @transform_2(%arg0: i32, %arg1: i32) -> (i32, i32) {
    %c0_i32 = arith.constant 0 : i32
    %c0_i32_0 = arith.constant 0 : i32
    %c0_i32_1 = arith.constant 0 : i32
    return %c0_i32, %c0_i32_0 : i32, i32
  }
  func.func @transform_3(%arg0: i32, %arg1: i32) -> (i32, i32) {
    %c0_i32 = arith.constant 0 : i32
    %c0_i32_0 = arith.constant 0 : i32
    %c0_i32_1 = arith.constant 0 : i32
    return %c0_i32, %c0_i32_0 : i32, i32
  }
  func.func @transform_4(%arg0: i32, %arg1: i32) -> (i32, i32) {
    %c0_i32 = arith.constant 0 : i32
    %c0_i32_0 = arith.constant 0 : i32
    %c0_i32_1 = arith.constant 0 : i32
    return %c0_i32, %c0_i32_0 : i32, i32
  }
  func.func @transform_5(%arg0: i32, %arg1: i32) -> (i32, i32) {
    %c0_i32 = arith.constant 0 : i32
    %c0_i32_0 = arith.constant 0 : i32
    %c0_i32_1 = arith.constant 0 : i32
    return %c0_i32, %c0_i32_0 : i32, i32
  }
  func.func @transform_6(%arg0: i32, %arg1: i32) -> (i32, i32) {
    %c0_i32 = arith.constant 0 : i32
    %c0_i32_0 = arith.constant 0 : i32
    %c0_i32_1 = arith.constant 0 : i32
    return %c0_i32, %c0_i32_0 : i32, i32
  }
  func.func @transform_7(%arg0: i32, %arg1: i32) -> (i32, i32) {
    %c0_i32 = arith.constant 0 : i32
    %c0_i32_0 = arith.constant 0 : i32
    return %arg0, %c0_i32 : i32, i32
  }
}

</mosaic_0001>

<bundles_post_ra>
// kernel: _forward_impl.1
= control target key start
LH: loop header
LB: loop body
LE: loop exit
PB: predicated region body
PF: predicated region fallthrough
CT: control target
= control target key end

     0   :  { %s9525_s0 = inlined_call_operand.vmem [shape: bf16[8,9216], index: 0, kind: input, shape index: {}]   ;;  %s9526_s1 = inlined_call_operand.hbm [shape: bf16[9216,512], index: 1, kind: input, shape index: {}]   ;;  %s9527_s2 = inlined_call_operand.hbm [shape: f32[1,512], index: 2, kind: input, shape index: {}]   ;;  %s9528_s3 = inlined_call_operand.hbm [shape: bf16[512,512], index: 3, kind: input, shape index: {}]   ;;  %s9529_s4 = inlined_call_operand.hbm [shape: f32[1,512], index: 4, kind: input, shape index: {}]   ;;  %s9530_s5 = inlined_call_operand.hbm [shape: bf16[512,128], index: 5, kind: input, shape index: {}]   ;;  %s9531_s6 = inlined_call_operand.hbm [shape: f32[1,128], index: 6, kind: input, shape index: {}]   ;;  %s9532_s7 = inlined_call_operand.vmem [shape: f32[8,128], index: 7, kind: output, shape index: {}]  }
   0x1   :  { %9538 = sst [smem:[#allocation17_spill]] %s9527_s2 }
   0x2   :  { %12 = vsyncpa [#allocation4], 0 }
   0x3   :  { %14 = vsyncpa [#allocation4 + $0x1], 0 }
   0x4   :  { %15 = vsyncpa [#allocation6], 0 }
   0x5   :  { %16 = vsyncpa [#allocation9], 0 }
   0x6   :  { %17 = vsyncpa [#allocation12], 0  ;;  %s8519_s24 = smov 0   ;;  %s8521_s25 = smov 0  }
   0x7   :  { %s8523_s26 = smov 0   ;;  %s8525_s27 = smov 0  }
   0x8   :  { %s8527_s28 = smov 0   ;;  %s8529_s29 = smov 0  }
   0x9 LB: > { %s6181_s30 = sadd.s32 4294967295, %s8467_s29   ;;  %p6182_p0 = scmp.ge.s32.totalorder %s8467_s29, 1  ;;  %s8467_s29 = sphi %s8529_s29, %s23_s29   ;;  %s8463_s28 = sphi %s8527_s28, %s9555_s28   ;;  %s8459_s27 = sphi %s8525_s27, %s9554_s27   ;;  %s8455_s26 = sphi %s8523_s26, %s9553_s26   ;;  %s8451_s25 = sphi %s8521_s25, %s9552_s25   ;;  %s8447_s24 = sphi %s8519_s24, %s9551_s24  }
   0xa   : > { %p8551_p1 = scmp.eq.s32.totalorder %s6181_s30, 0  ;;  %p225_p2 = scmp.lt.s32.totalorder %s8467_s29, 5 }
   0xb   : > { %s8469_s10 = smov [#allocation5]   ;;  %s8470_s12 = smov [#allocation8]  }
   0xc   : > { %s9539_s8 = scalar_select %p8551_p1, 1, 0 }
   0xd   : > { %p8556_p3 = pnand %p6182_p0, %p225_p2  ;;  %s238_s11 = sshll.u32 %s8469_s10, 4  ;;  %s239_s11 = int_to_ptr.vmem [resolvable:$true] %s238_s11 }
   0xe   : > { %s262_s13 = sshll.u32 %s8470_s12, 4  ;;  %s8471_s15 = smov [#allocation7]   ;;  %s8568_s13 = int_to_ptr.vmem [resolvable:$true] %s262_s13 }
   0xf   : > { %s9540_s9 = scalar_select %p8556_p3, 1, 0 }
  0x10   : > { %p7041_p4 = pneg %p8556_p3  ;;  %s248_s16 = sshll.u32 %s8471_s15, 4  ;;  %s8570_s16 = int_to_ptr.vmem [resolvable:$true] %s248_s16 }
  0x11   : > { %s9542_s2 = sld [smem:[#allocation17_spill]] }
  0x12   : > { %p8564_p5 = pnand %p7041_p4, %p8551_p1 }
  0x14   : > { %p8580_p7 = pneg %p8564_p5 }
  0x17   : > { %s8235_s19 = scalar_lea.hbm %s9542_s2, 64 }
  0x18   : > { %p8236_p6 = scmp.ne.s32.totalorder %s9542_s2, %s8235_s19  ;;  %p8242_p10 = scmp.lt.u32.totalorder %s8235_s19, %s9542_s2 }
  0x1a   : > { %p8238_p8 = pnand %p8580_p7, %p8236_p6 }
  0x1c   : > { %p8239_p9 = pneg %p8238_p8 }
  0x1e   : > { %p8244_p11 = pnand %p8242_p10, %p8239_p9 }
  0x20   : > { %8247 = shalt.err (!%p8244_p11)
}
  0x21   : > { %s8248_s10 = scalar_lea.vmem %s239_s11, 64  ;;  %p8256_p2 = scmp.lt.s32.totalorder %s239_s11, %s239_s11 }
  0x22   : > { %p8249_p12 = scmp.ne.s32.totalorder %s239_s11, %s8248_s10  ;;  %p8257_p4 = scmp.lt.s32.totalorder %s8248_s10, %s8248_s10 }
  0x24   : > { %p8251_p13 = pnand %p8249_p12, %p8580_p7  ;;  %p8258_p3 = por %p8257_p4, %p8256_p2 }
  0x26   : > { %p8252_p0 = pneg %p8251_p13 }
  0x28   : > { %p8259_p1 = pnand %p8258_p3, %p8252_p0 }
  0x2a   : > { %8262 = shalt.err (!%p8259_p1)
}
  0x2b   : > { %7044 = dma.hbm_to_vmem [thread:$0]  (!%p8564_p5), %s9542_s2, 64, %s239_s11, [#allocation6]  }
  0x2c   : > { %s8263_s19 = scalar_lea.hbm %s9529_s4, 64 }
  0x2d   : > { %p8264_p6 = scmp.ne.s32.totalorder %s9529_s4, %s8263_s19  ;;  %p8270_p1 = scmp.lt.u32.totalorder %s8263_s19, %s9529_s4 }
  0x2f   : > { %p8266_p8 = pnand %p8264_p6, %p8580_p7 }
  0x31   : > { %p8267_p9 = pneg %p8266_p8 }
  0x33   : > { %p8272_p3 = pnand %p8270_p1, %p8267_p9 }
  0x35   : > { %8275 = shalt.err (!%p8272_p3)
}
  0x36   : > { %s8276_s11 = scalar_lea.vmem %s8568_s13, 64  ;;  %p8284_p13 = scmp.lt.s32.totalorder %s8568_s13, %s8568_s13 }
  0x37   : > { %p8277_p10 = scmp.ne.s32.totalorder %s8568_s13, %s8276_s11  ;;  %p8285_p0 = scmp.lt.s32.totalorder %s8276_s11, %s8276_s11 }
  0x39   : > { %p8279_p11 = pnand %p8277_p10, %p8580_p7  ;;  %p8286_p2 = por %p8285_p0, %p8284_p13 }
  0x3b   : > { %p8280_p12 = pneg %p8279_p11 }
  0x3d   : > { %p8287_p4 = pnand %p8286_p2, %p8280_p12 }
  0x3f   : > { %8290 = shalt.err (!%p8287_p4)
}
  0x40   : > { %7050 = dma.hbm_to_vmem [thread:$0]  (!%p8564_p5), %s9529_s4, 64, %s8568_s13, [#allocation9]  }
  0x41   : > { %s8291_s18 = scalar_lea.hbm %s9528_s3, 16384 }
  0x42   : > { %p8292_p6 = scmp.ne.s32.totalorder %s9528_s3, %s8291_s18  ;;  %p8298_p1 = scmp.lt.u32.totalorder %s8291_s18, %s9528_s3 }
  0x44   : > { %p8294_p8 = pnand %p8292_p6, %p8580_p7 }
  0x46   : > { %p8295_p9 = pneg %p8294_p8 }
  0x48   : > { %p8300_p3 = pnand %p8298_p1, %p8295_p9 }
  0x4a   : > { %8303 = shalt.err (!%p8300_p3)
}
  0x4b   : > { %s8304_s13 = scalar_lea.vmem %s8570_s16, 16384  ;;  %p8312_p13 = scmp.lt.s32.totalorder %s8570_s16, %s8570_s16 }
  0x4c   : > { %p8305_p10 = scmp.ne.s32.totalorder %s8570_s16, %s8304_s13  ;;  %p8313_p0 = scmp.lt.s32.totalorder %s8304_s13, %s8304_s13 }
  0x4e   : > { %p8307_p11 = pnand %p8305_p10, %p8580_p7  ;;  %p8314_p2 = por %p8313_p0, %p8312_p13 }
  0x50   : > { %p8308_p12 = pneg %p8307_p11 }
  0x52   : > { %p8315_p4 = pnand %p8314_p2, %p8308_p12 }
  0x54   : > { %8318 = shalt.err (!%p8315_p4)
}
  0x55   : > { %s9536_s30 = smov 256   ;;  %s9537_s11 = smov 16  }
  0x56   : > { %7047 = dma.hbm_to_vmem [thread:$0]  (!%p8564_p5), %s9528_s3, 16384, %s8570_s16, [#allocation6], %s9536_s30, %s9536_s30, %s9537_s11  }
  0x57   : > { %s8474_s15 = smov [#allocation10]   ;;  %s8319_s20 = scalar_lea.hbm %s9530_s5, 4096 }
  0x58   : > { %s272_s17 = sshll.u32 %s8474_s15, 4  ;;  %p8320_p6 = scmp.ne.s32.totalorder %s9530_s5, %s8319_s20  ;;  %s273_s17 = int_to_ptr.vmem [resolvable:$true] %s272_s17 }
  0x59   : > { %p8326_p1 = scmp.lt.u32.totalorder %s8319_s20, %s9530_s5 }
  0x5a   : > { %p8322_p8 = pnand %p8320_p6, %p8580_p7 }
  0x5c   : > { %p8323_p9 = pneg %p8322_p8 }
  0x5e   : > { %p8328_p3 = pnand %p8326_p1, %p8323_p9 }
  0x60   : > { %8331 = shalt.err (!%p8328_p3)
}
  0x61   : > { %s8332_s16 = scalar_lea.vmem %s273_s17, 4096  ;;  %p8340_p13 = scmp.lt.s32.totalorder %s273_s17, %s273_s17 }
  0x62   : > { %p8333_p10 = scmp.ne.s32.totalorder %s273_s17, %s8332_s16  ;;  %p8341_p0 = scmp.lt.s32.totalorder %s8332_s16, %s8332_s16 }
  0x64   : > { %p8335_p11 = pnand %p8333_p10, %p8580_p7  ;;  %p8342_p2 = por %p8341_p0, %p8340_p13 }
  0x66   : > { %p8336_p12 = pneg %p8335_p11 }
  0x68   : > { %p8343_p4 = pnand %p8342_p2, %p8336_p12 }
  0x6a   : > { %8346 = shalt.err (!%p8343_p4)
}
  0x6b   : > { %s8475_s10 = smov 64   ;;  %s8476_s12 = smov 4  }
  0x6c   : > { %7053 = dma.hbm_to_vmem [thread:$0]  (!%p8564_p5), %s9530_s5, 4096, %s273_s17, [#allocation9], %s8475_s10, %s8475_s10, %s8476_s12  }
  0x6d   : > { %s8477_s18 = smov [#allocation11]   ;;  %s8347_s23 = scalar_lea.hbm %s9531_s6, 16 }
  0x6e   : > { %s286_s19 = sshll.u32 %s8477_s18, 4  ;;  %p8348_p6 = scmp.ne.s32.totalorder %s9531_s6, %s8347_s23  ;;  %s287_s19 = int_to_ptr.vmem [resolvable:$true] %s286_s19 }
  0x6f   : > { %p8354_p1 = scmp.lt.u32.totalorder %s8347_s23, %s9531_s6 }
  0x70   : > { %p8350_p8 = pnand %p8348_p6, %p8580_p7 }
  0x72   : > { %p8351_p9 = pneg %p8350_p8 }
  0x74   : > { %p8356_p3 = pnand %p8354_p1, %p8351_p9 }
  0x76   : > { %8359 = shalt.err (!%p8356_p3)
}
  0x77   : > { %s8360_s17 = scalar_lea.vmem %s287_s19, 16  ;;  %s8367_s10 = scalar_lea.vmem %s287_s19, 32 }
  0x78   : > { %p8361_p10 = scmp.ne.s32.totalorder %s287_s19, %s8360_s17  ;;  %p8368_p13 = scmp.lt.s32.totalorder %s287_s19, %s287_s19 }
  0x79   : > { %p8369_p0 = scmp.lt.s32.totalorder %s8367_s10, %s8360_s17 }
  0x7a   : > { %p8363_p11 = pnand %p8361_p10, %p8580_p7 }
  0x7b   : > { %p8370_p2 = por %p8369_p0, %p8368_p13 }
  0x7c   : > { %p8364_p12 = pneg %p8363_p11 }
  0x7e   : > { %p8371_p4 = pnand %p8370_p2, %p8364_p12 }
  0x80   : > { %8374 = shalt.err (!%p8371_p4)
}
  0x81   : > { %7056 = dma.hbm_to_vmem [thread:$0]  (!%p8564_p5), %s9531_s6, 16, %s287_s19, [#allocation12]  }
  0x82   : > { %s32_s22 = sadd.s32 1, %s8463_s28  ;;  %s70_s14 = sadd.s32 1, %s8455_s26 }
  0x83   : > { %p33_p7 = scmp.ge.s32.totalorder %s32_s22, 4  ;;  %p77_p6 = scmp.ne.s32.totalorder %s8455_s26, %s8451_s25 }
  0x84   : > { %p78_p8 = scmp.eq.s32.totalorder %s8467_s29, 0  ;;  %p83_p1 = scmp.ne.s32.totalorder %s8451_s25, %s8447_s24 }
  0x85   : > { %s9557_s22 = smov (%p33_p7, %s32_s22), 0  ;;  %p7066_p3 = scmp.lt.s32.totalorder %s8467_s29, 4 }
  0x86   : > { %p79_p9 = por %p78_p8, %p77_p6  ;;  %s67_s30 = ssub.s32 %s8463_s28, %s9557_s22 }
  0x87   : > { %p68_p10 = scmp.eq.s32.totalorder %s67_s30, 0  ;;  %p9544_p11 = scmp.ne.s32.totalorder %s9539_s8, 0 }
  0x88   : > { %s310_s15 = sand.u32 1, %s8455_s26   ;;  %s6960_s18 = smul.u32 73728, %s8463_s28 }
  0x89   : > { %p8695_p12 = por %p9544_p11, %p83_p1  ;;  %s7017_s20 = smul.u32 4608, %s310_s15 }
  0x8a   : > { %s8702_s19 = scalar_select %p68_p10, %s8455_s26, %s70_s14  }
  0x8b   : > { %p8704_p5 = pnand %p7066_p3, %p79_p9  ;;  %s8711_s24 = scalar_lea.hbm %s9526_s1, %s6960_s18 }
  0x8c   : > { %s314_s16 = scalar_lea.vmem [#allocation3], %s7017_s20  ;;  %s8715_s10 = scalar_lea.sflag [#allocation4], %s310_s15 }
  0x8d   : > { %s322_s17 = sshll.u32 %s314_s16, 4  ;;  %s8375_s12 = scalar_lea.hbm %s8711_s24, 73728  ;;  %s8713_s17 = int_to_ptr.vmem [resolvable:$true] %s322_s17 }
  0x8e   : > { %p8376_p13 = scmp.ne.s32.totalorder %s8711_s24, %s8375_s12  ;;  %p8377_p0 = pneg %p8704_p5 }
  0x8f   : > { %s8380_s30 = scalar_lea.hbm %s9526_s1, 294912  ;;  %p8381_p7 = scmp.lt.u32.totalorder %s8711_s24, %s9526_s1 }
  0x90   : > { %p8378_p2 = pnand %p8377_p0, %p8376_p13  ;;  %p8382_p6 = scmp.lt.u32.totalorder %s8380_s30, %s8375_s12 }
  0x91   : > { %p8384_p9 = scmp.lt.u32.totalorder %s8375_s12, %s8711_s24 }
  0x92   : > { %p8379_p4 = pneg %p8378_p2  ;;  %p8383_p8 = por %p8382_p6, %p8381_p7 }
  0x94   : > { %p8385_p1 = por %p8384_p9, %p8383_p8 }
  0x96   : > { %p8386_p3 = pnand %p8385_p1, %p8379_p4 }
  0x98   : > { %8389 = shalt.err (!%p8386_p3)
}
  0x99   : > { %s8390_s15 = scalar_lea.vmem %s8713_s17, 73728  ;;  %s8478_s20 = smov [#allocation3]  }
  0x9a   : > { %p8391_p10 = scmp.ne.s32.totalorder %s8713_s17, %s8390_s15  ;;  %s8395_s13 = sshll.u32 %s8478_s20, 4  ;;  %s8396_s13 = int_to_ptr.vmem [resolvable:$false] %s8395_s13 }
  0x9b   : > { %s8397_s16 = scalar_lea.vmem %s8396_s13, 147456  ;;  %p8398_p2 = scmp.lt.s32.totalorder %s8713_s17, %s8396_s13 }
  0x9c   : > { %p8393_p11 = pnand %p8391_p10, %p8377_p0  ;;  %p8399_p7 = scmp.lt.s32.totalorder %s8397_s16, %s8390_s15 }
  0x9e   : > { %p8394_p13 = pneg %p8393_p11  ;;  %p8400_p6 = por %p8399_p7, %p8398_p2 }
  0xa0   : > { %p8401_p8 = pnand %p8400_p6, %p8394_p13 }
  0xa2   : > { %8404 = shalt.err (!%p8401_p8)
}
  0xa3   : > { %s9547_s12 = smov 16   ;;  %s9548_s2 = smov 256  }
  0xa4   : > { %7060 = dma.hbm_to_vmem [thread:$0]  (!%p8704_p5), %s8711_s24, 73728, %s8713_s17, %s8715_s10, %s9548_s2, %s9548_s2, %s9547_s12  }
  0xa5   : > { %p9549_p0 = scmp.ne.s32.totalorder %s9540_s9, 0 }
  0xa6   : > { %s336_s14 = sand.u32 (!%p9549_p0), 1, %s8451_s25  }
  0xa7   : > { %334 = sbr.rel (%p9549_p0) target bundleno = 1507 (0x5e3), region = 48  ;;  %s337_s18 = scalar_lea.sflag (!%p9549_p0), [#allocation4], %s336_s14 }
  0xa8   : > { %s7018_s30 = smul.u32 (!%p9549_p0), 4608, %s336_s14 }
  0xaa   : > { %s8749_s23 = scalar_lea.vmem (!%p9549_p0), [#allocation3], %s7018_s30 }
  0xae   : > { %8430 = dma.done.wait (%p8695_p12), %s337_s18, 73728  }
  0xaf   : > { %8432 = vsyncadd (%p8695_p12), %s337_s18, 4294893568  ;;  %p9550_p4 = scmp.ne.s32.totalorder %s9539_s8, 0 }
  0xb1   : > { %8434 = dma.done.wait (%p9550_p4), [#allocation6], 16448  }
  0xb2   : > { %8436 = vsyncadd (%p9550_p4), [#allocation6], 4294950848 }
  0xb3   : > { %8438 = dma.done.wait (%p9550_p4), [#allocation9], 4160  }
  0xb4   : > { %8440 = vsyncadd (%p9550_p4), [#allocation9], 4294963136 }
  0xb5   : > { %8442 = dma.done.wait (%p9550_p4), [#allocation12], 16  }
  0xb6   : > { %8444 = vsyncadd (%p9550_p4), [#allocation12], 4294967280  ;;  %s399_s9 = smul.u32 18, %s8459_s27  ;;  %p6198_p5 = scmp.ne.s32.totalorder %s8459_s27, 0 }
  0xb7   : > { %v421_v0 = vlaneseq (!%p6198_p5)  ;;  %v419_v2 = vld [vmem:[#allocation5] sm:$0xf] (!%p6198_p5) }
  0xb8   : > { %p402_p12 = scmp.lt.s32.totalorder %s399_s9, 71  ;;  %418 = sbr.rel (%p6198_p5) target bundleno = 193 (0xc1), region = 76 }
  0xb9   : > { %v422_v1 = vshrl.u32 (!%p6198_p5), %v421_v0, 7 }
  0xba   : > { %s9559_s9 = smov (!%p402_p12, %s399_s9), 71 }
  0xbb   : > { %s6197_s11 = sshll.u32 %s9559_s9, 2  ;;  %v423_v3 = vsub.s32 (!%p6198_p5), 0, %v422_v1  ;;  %v427_v4 = vsub.s32 (!%p6198_p5), 1, %v422_v1  ;;  %v431_v5 = vsub.s32 (!%p6198_p5), 2, %v422_v1  ;;  %v435_v6 = vsub.s32 (!%p6198_p5), 3, %v422_v1 }
  0xbc   : > { %s8771_s17 = scalar_lea.vmem %s9525_s0, %s6197_s11 }
  0xbd   : > { %v424_v7 = vrot.slane (!%p6198_p5), %v419_v2, %v423_v3  ;;  %v428_v8 = vrot.slane (!%p6198_p5), %v419_v2, %v427_v4  ;;  %v432_v9 = vrot.slane (!%p6198_p5), %v419_v2, %v431_v5  ;;  %v436_v10 = vrot.slane (!%p6198_p5), %v419_v2, %v435_v6 }
  0xbf   : > { %441 = vst [vmem:[#allocation2] sm:$0xff] %v424_v7  ;;  %442 = vst [vmem:[#allocation2 + $0x8] sm:$0xff] %v428_v8 }
  0xc0   : > { %443 = vst [vmem:[#allocation2 + $0x10] sm:$0xff] %v432_v9  ;;  %444 = vst [vmem:[#allocation2 + $0x18] sm:$0xff] %v436_v10 }
  0xc1 PF: > { %v7129_v11 = vld [vmem:[%s8749_s23 + $0x4] ss:$16 sps:$4 sm:$0xff]   ;;  %v7133_v13 = vld [vmem:[%s8749_s23] ss:$16 sps:$4 sm:$0xff]   ;;  %v450_v59 = vld [vmem:[%s8771_s17 + $0x8] sm:$0xff]  ;;  %p6793_p9 = scmp.ne.s32.totalorder %s8459_s27, 3 }
  0xc2   : > { %v7131_v12 = vld [vmem:[%s8749_s23 + $0x204] ss:$16 sps:$4 sm:$0xff]   ;;  %3977 = vmatprep.subr.bf16.mxu0 %v7129_v11  ;;  %v7134_v14 = vld [vmem:[%s8749_s23 + $0x200] ss:$16 sps:$4 sm:$0xff]   ;;  %v8826_v62 = vcombine.high %v450_v59, %v450_v59 }
  0xc3   : > { %4018 = vmatprep.subr.bf16.mxu1 %v7131_v12  ;;  %v7135_v15 = vld [vmem:[%s8749_s23 + $0x24] ss:$16 sps:$4 sm:$0xff]   ;;  %3978 = vmatpush1.bf16.msra.mxu0 %v7133_v13  ;;  %v7139_v17 = vld [vmem:[%s8749_s23 + $0x20] ss:$16 sps:$4 sm:$0xff]  }
  0xc4   : > { %4019 = vmatpush1.bf16.msra.mxu1 %v7134_v14  ;;  %v7137_v16 = vld [vmem:[%s8749_s23 + $0x224] ss:$16 sps:$4 sm:$0xff]   ;;  %3979 = vmatprep.subr.bf16.mxu0 %v7135_v15  ;;  %v7140_v18 = vld [vmem:[%s8749_s23 + $0x220] ss:$16 sps:$4 sm:$0xff]  }
  0xc5   : > { %4020 = vmatprep.subr.bf16.mxu1 %v7137_v16  ;;  %v7141_v19 = vld [vmem:[%s8749_s23 + $0x44] ss:$16 sps:$4 sm:$0xff]   ;;  %v7145_v21 = vld [vmem:[%s8749_s23 + $0x40] ss:$16 sps:$4 sm:$0xff]   ;;  %4050 = vmatprep.mubr.bf16.mxu1 %v8826_v62 }
  0xc6   : > { %v7143_v20 = vld [vmem:[%s8749_s23 + $0x244] ss:$16 sps:$4 sm:$0xff]   ;;  %v7146_v22 = vld [vmem:[%s8749_s23 + $0x240] ss:$16 sps:$4 sm:$0xff]  }
  0xc7   : > { %3980 = vmatpush1.bf16.msra.mxu0 %v7139_v17  ;;  %v7147_v23 = vld [vmem:[%s8749_s23 + $0x64] ss:$16 sps:$4 sm:$0xff]   ;;  %v7151_v25 = vld [vmem:[%s8749_s23 + $0x60] ss:$16 sps:$4 sm:$0xff]  }
  0xc8   : > { %4021 = vmatpush1.bf16.msra.mxu1 %v7140_v18  ;;  %3981 = vmatprep.subr.bf16.mxu0 %v7141_v19  ;;  %v7149_v24 = vld [vmem:[%s8749_s23 + $0x264] ss:$16 sps:$4 sm:$0xff]   ;;  %v7152_v26 = vld [vmem:[%s8749_s23 + $0x260] ss:$16 sps:$4 sm:$0xff]   ;;  %v8850_v18 = vcombine.low %v450_v59, %v450_v59 }
  0xc9   : > { %4022 = vmatprep.subr.bf16.mxu1 %v7143_v20  ;;  %v7153_v27 = vld [vmem:[%s8749_s23 + $0x84] ss:$16 sps:$4 sm:$0xff]   ;;  %v7157_v29 = vld [vmem:[%s8749_s23 + $0x80] ss:$16 sps:$4 sm:$0xff]  }
  0xca   : > { %v7155_v28 = vld [vmem:[%s8749_s23 + $0x284] ss:$16 sps:$4 sm:$0xff]   ;;  %v7158_v30 = vld [vmem:[%s8749_s23 + $0x280] ss:$16 sps:$4 sm:$0xff]  }
  0xcb   : > { %3982 = vmatpush1.bf16.msra.mxu0 %v7145_v21  ;;  %v7159_v31 = vld [vmem:[%s8749_s23 + $0xa4] ss:$16 sps:$4 sm:$0xff]   ;;  %v7163_v33 = vld [vmem:[%s8749_s23 + $0xa0] ss:$16 sps:$4 sm:$0xff]  }
  0xcc   : > { %4023 = vmatpush1.bf16.msra.mxu1 %v7146_v22  ;;  %3983 = vmatprep.subr.bf16.mxu0 %v7147_v23  ;;  %v7161_v32 = vld [vmem:[%s8749_s23 + $0x2a4] ss:$16 sps:$4 sm:$0xff]   ;;  %v7164_v34 = vld [vmem:[%s8749_s23 + $0x2a0] ss:$16 sps:$4 sm:$0xff]  }
  0xcd   : > { %4024 = vmatprep.subr.bf16.mxu1 %v7149_v24  ;;  %v7165_v35 = vld [vmem:[%s8749_s23 + $0xc4] ss:$16 sps:$4 sm:$0xff]   ;;  %v7169_v37 = vld [vmem:[%s8749_s23 + $0xc0] ss:$16 sps:$4 sm:$0xff]  }
  0xce   : > { %v7167_v36 = vld [vmem:[%s8749_s23 + $0x2c4] ss:$16 sps:$4 sm:$0xff]   ;;  %v7170_v38 = vld [vmem:[%s8749_s23 + $0x2c0] ss:$16 sps:$4 sm:$0xff]  }
  0xcf   : > { %3984 = vmatpush1.bf16.msra.mxu0 %v7151_v25  ;;  %v7171_v39 = vld [vmem:[%s8749_s23 + $0xe4] ss:$16 sps:$4 sm:$0xff]   ;;  %v7175_v41 = vld [vmem:[%s8749_s23 + $0xe0] ss:$16 sps:$4 sm:$0xff]  }
  0xd0   : > { %4025 = vmatpush1.bf16.msra.mxu1 %v7152_v26  ;;  %3985 = vmatprep.subr.bf16.mxu0 %v7153_v27  ;;  %v7173_v40 = vld [vmem:[%s8749_s23 + $0x2e4] ss:$16 sps:$4 sm:$0xff]   ;;  %v7176_v42 = vld [vmem:[%s8749_s23 + $0x2e0] ss:$16 sps:$4 sm:$0xff]  }
  0xd1   : > { %4026 = vmatprep.subr.bf16.mxu1 %v7155_v28  ;;  %v7177_v43 = vld [vmem:[%s8749_s23 + $0x104] ss:$16 sps:$4 sm:$0xff]   ;;  %v7181_v45 = vld [vmem:[%s8749_s23 + $0x100] ss:$16 sps:$4 sm:$0xff]  }
  0xd2   : > { %v7179_v44 = vld [vmem:[%s8749_s23 + $0x304] ss:$16 sps:$4 sm:$0xff]   ;;  %v7182_v46 = vld [vmem:[%s8749_s23 + $0x300] ss:$16 sps:$4 sm:$0xff]  }
  0xd3   : > { %3986 = vmatpush1.bf16.msra.mxu0 %v7157_v29  ;;  %v7183_v47 = vld [vmem:[%s8749_s23 + $0x124] ss:$16 sps:$4 sm:$0xff]   ;;  %v7187_v49 = vld [vmem:[%s8749_s23 + $0x120] ss:$16 sps:$4 sm:$0xff]  }
  0xd4   : > { %4027 = vmatpush1.bf16.msra.mxu1 %v7158_v30  ;;  %3987 = vmatprep.subr.bf16.mxu0 %v7159_v31  ;;  %v7185_v48 = vld [vmem:[%s8749_s23 + $0x324] ss:$16 sps:$4 sm:$0xff]   ;;  %v7188_v50 = vld [vmem:[%s8749_s23 + $0x320] ss:$16 sps:$4 sm:$0xff]  }
  0xd5   : > { %4028 = vmatprep.subr.bf16.mxu1 %v7161_v32  ;;  %v7189_v51 = vld [vmem:[%s8749_s23 + $0x144] ss:$16 sps:$4 sm:$0xff]   ;;  %v7193_v53 = vld [vmem:[%s8749_s23 + $0x140] ss:$16 sps:$4 sm:$0xff]  }
  0xd6   : > { %v7191_v52 = vld [vmem:[%s8749_s23 + $0x344] ss:$16 sps:$4 sm:$0xff]   ;;  %v7194_v54 = vld [vmem:[%s8749_s23 + $0x340] ss:$16 sps:$4 sm:$0xff]  }
  0xd7   : > { %3988 = vmatpush1.bf16.msra.mxu0 %v7163_v33  ;;  %v7195_v55 = vld [vmem:[%s8749_s23 + $0x164] ss:$16 sps:$4 sm:$0xff]   ;;  %v7199_v60 = vld [vmem:[%s8749_s23 + $0x160] ss:$16 sps:$4 sm:$0xff]  }
  0xd8   : > { %4029 = vmatpush1.bf16.msra.mxu1 %v7164_v34  ;;  %3989 = vmatprep.subr.bf16.mxu0 %v7165_v35  ;;  %v7197_v56 = vld [vmem:[%s8749_s23 + $0x364] ss:$16 sps:$4 sm:$0xff]   ;;  %v7200_v61 = vld [vmem:[%s8749_s23 + $0x360] ss:$16 sps:$4 sm:$0xff]  }
  0xd9   : > { %4030 = vmatprep.subr.bf16.mxu1 %v7167_v36  ;;  %v449_v57 = vld [vmem:[%s8771_s17] sm:$0xff] }
  0xda   : > { %v8821_v58 = vcombine.high %v449_v57, %v449_v57  ;;  %v7201_v63 = vld [vmem:[%s8749_s23 + $0x184] ss:$16 sps:$4 sm:$0xff]   ;;  %v7205_v1 = vld [vmem:[%s8749_s23 + $0x180] ss:$16 sps:$4 sm:$0xff]   ;;  %v8848_v17 = vcombine.low %v449_v57, %v449_v57 }
  0xdb   : > { %3990 = vmatpush1.bf16.msra.mxu0 %v7169_v37  ;;  %v7203_v0 = vld [vmem:[%s8749_s23 + $0x384] ss:$16 sps:$4 sm:$0xff]   ;;  %v7206_v2 = vld [vmem:[%s8749_s23 + $0x380] ss:$16 sps:$4 sm:$0xff]  }
  0xdc   : > { %4031 = vmatpush1.bf16.msra.mxu1 %v7170_v38  ;;  %3991 = vmatprep.subr.bf16.mxu0 %v7171_v39  ;;  %v7207_v3 = vld [vmem:[%s8749_s23 + $0x1a4] ss:$16 sps:$4 sm:$0xff]   ;;  %v7211_v5 = vld [vmem:[%s8749_s23 + $0x1a0] ss:$16 sps:$4 sm:$0xff]  }
  0xdd   : > { %4032 = vmatprep.subr.bf16.mxu1 %v7173_v40  ;;  %4009 = vmatprep.mubr.bf16.mxu0 %v8821_v58  ;;  %v7209_v4 = vld [vmem:[%s8749_s23 + $0x3a4] ss:$16 sps:$4 sm:$0xff]   ;;  %v7212_v6 = vld [vmem:[%s8749_s23 + $0x3a0] ss:$16 sps:$4 sm:$0xff]  }
  0xde   : > { %v7213_v7 = vld [vmem:[%s8749_s23 + $0x1c4] ss:$16 sps:$4 sm:$0xff]   ;;  %v7217_v9 = vld [vmem:[%s8749_s23 + $0x1c0] ss:$16 sps:$4 sm:$0xff]  }
  0xdf   : > { %3992 = vmatpush1.bf16.msra.mxu0 %v7175_v41  ;;  %v7215_v8 = vld [vmem:[%s8749_s23 + $0x3c4] ss:$16 sps:$4 sm:$0xff]   ;;  %v7218_v10 = vld [vmem:[%s8749_s23 + $0x3c0] ss:$16 sps:$4 sm:$0xff]  }
  0xe0   : > { %4033 = vmatpush1.bf16.msra.mxu1 %v7176_v42  ;;  %3993 = vmatprep.subr.bf16.mxu0 %v7177_v43  ;;  %v7219_v11 = vld [vmem:[%s8749_s23 + $0x1e4] ss:$16 sps:$4 sm:$0xff]   ;;  %v7223_v13 = vld [vmem:[%s8749_s23 + $0x1e0] ss:$16 sps:$4 sm:$0xff]  }
  0xe1   : > { %4034 = vmatprep.subr.bf16.mxu1 %v7179_v44  ;;  %v7221_v12 = vld [vmem:[%s8749_s23 + $0x3e4] ss:$16 sps:$4 sm:$0xff]   ;;  %v7224_v14 = vld [vmem:[%s8749_s23 + $0x3e0] ss:$16 sps:$4 sm:$0xff]   ;;  %v8882_v44 = vld [vmem:[%s8771_s17 + $0x18] sm:$0xff] }
  0xe2   : > { %v7231_v15 = vld [vmem:[%s8749_s23 + $0x404] ss:$16 sps:$4 sm:$0xff]   ;;  %v7229_v19 = vld [vmem:[%s8749_s23 + $0x400] ss:$16 sps:$4 sm:$0xff]  }
  0xe3   : > { %3994 = vmatpush1.bf16.msra.mxu0 %v7181_v45  ;;  %v7234_v16 = vld [vmem:[%s8749_s23 + $0x604] ss:$16 sps:$4 sm:$0xff]   ;;  %v7232_v20 = vld [vmem:[%s8749_s23 + $0x600] ss:$16 sps:$4 sm:$0xff]  }
  0xe4   : > { %4035 = vmatpush1.bf16.msra.mxu1 %v7182_v46  ;;  %3995 = vmatprep.subr.bf16.mxu0 %v7183_v47  ;;  %v7237_v21 = vld [vmem:[%s8749_s23 + $0x424] ss:$16 sps:$4 sm:$0xff]   ;;  %v7235_v23 = vld [vmem:[%s8749_s23 + $0x420] ss:$16 sps:$4 sm:$0xff]  }
  0xe5   : > { %4036 = vmatprep.subr.bf16.mxu1 %v7185_v48  ;;  %v7240_v22 = vld [vmem:[%s8749_s23 + $0x624] ss:$16 sps:$4 sm:$0xff]   ;;  %v7238_v24 = vld [vmem:[%s8749_s23 + $0x620] ss:$16 sps:$4 sm:$0xff]   ;;  %v8892_v48 = vcombine.high %v8882_v44, %v8882_v44 }
  0xe6   : > { %v7243_v25 = vld [vmem:[%s8749_s23 + $0x444] ss:$16 sps:$4 sm:$0xff]   ;;  %v7241_v27 = vld [vmem:[%s8749_s23 + $0x440] ss:$16 sps:$4 sm:$0xff]  }
  0xe7   : > { %3996 = vmatpush1.bf16.msra.mxu0 %v7187_v49  ;;  %v7246_v26 = vld [vmem:[%s8749_s23 + $0x644] ss:$16 sps:$4 sm:$0xff]   ;;  %v7244_v28 = vld [vmem:[%s8749_s23 + $0x640] ss:$16 sps:$4 sm:$0xff]  }
  0xe8   : > { %4037 = vmatpush1.bf16.msra.mxu1 %v7188_v50  ;;  %3997 = vmatprep.subr.bf16.mxu0 %v7189_v51  ;;  %v7249_v29 = vld [vmem:[%s8749_s23 + $0x464] ss:$16 sps:$4 sm:$0xff]   ;;  %v7247_v31 = vld [vmem:[%s8749_s23 + $0x460] ss:$16 sps:$4 sm:$0xff]  }
  0xe9   : > { %4038 = vmatprep.subr.bf16.mxu1 %v7191_v52  ;;  %v7252_v30 = vld [vmem:[%s8749_s23 + $0x664] ss:$16 sps:$4 sm:$0xff]   ;;  %v7250_v32 = vld [vmem:[%s8749_s23 + $0x660] ss:$16 sps:$4 sm:$0xff]  }
  0xea   : > { %v7255_v33 = vld [vmem:[%s8749_s23 + $0x484] ss:$16 sps:$4 sm:$0xff]   ;;  %v7253_v35 = vld [vmem:[%s8749_s23 + $0x480] ss:$16 sps:$4 sm:$0xff]  }
  0xeb   : > { %3998 = vmatpush1.bf16.msra.mxu0 %v7193_v53  ;;  %v7258_v34 = vld [vmem:[%s8749_s23 + $0x684] ss:$16 sps:$4 sm:$0xff]   ;;  %v7256_v36 = vld [vmem:[%s8749_s23 + $0x680] ss:$16 sps:$4 sm:$0xff]  }
  0xec   : > { %4039 = vmatpush1.bf16.msra.mxu1 %v7194_v54  ;;  %3999 = vmatprep.subr.bf16.mxu0 %v7195_v55  ;;  %v7261_v37 = vld [vmem:[%s8749_s23 + $0x4a4] ss:$16 sps:$4 sm:$0xff]   ;;  %v7259_v39 = vld [vmem:[%s8749_s23 + $0x4a0] ss:$16 sps:$4 sm:$0xff]  }
  0xed   : > { %4040 = vmatprep.subr.bf16.mxu1 %v7197_v56  ;;  %v7264_v38 = vld [vmem:[%s8749_s23 + $0x6a4] ss:$16 sps:$4 sm:$0xff]   ;;  %v7262_v40 = vld [vmem:[%s8749_s23 + $0x6a0] ss:$16 sps:$4 sm:$0xff]  }
  0xee   : > { %v7267_v41 = vld [vmem:[%s8749_s23 + $0x4c4] ss:$16 sps:$4 sm:$0xff]   ;;  %v7265_v45 = vld [vmem:[%s8749_s23 + $0x4c0] ss:$16 sps:$4 sm:$0xff]  }
  0xef   : > { %4000 = vmatpush1.bf16.msra.mxu0 %v7199_v60  ;;  %v7270_v42 = vld [vmem:[%s8749_s23 + $0x6c4] ss:$16 sps:$4 sm:$0xff]   ;;  %v7268_v46 = vld [vmem:[%s8749_s23 + $0x6c0] ss:$16 sps:$4 sm:$0xff]  }
  0xf0   : > { %4041 = vmatpush1.bf16.msra.mxu1 %v7200_v61  ;;  %4001 = vmatprep.subr.bf16.mxu0 %v7201_v63  ;;  %v8879_v43 = vld [vmem:[%s8771_s17 + $0x10] sm:$0xff] }
  0xf1   : > { %4042 = vmatprep.subr.bf16.mxu1 %v7203_v0  ;;  %v8888_v47 = vcombine.high %v8879_v43, %v8879_v43  ;;  %v7273_v49 = vld [vmem:[%s8749_s23 + $0x4e4] ss:$16 sps:$4 sm:$0xff]   ;;  %v7271_v51 = vld [vmem:[%s8749_s23 + $0x4e0] ss:$16 sps:$4 sm:$0xff]  }
  0xf2   : > { %v7276_v50 = vld [vmem:[%s8749_s23 + $0x6e4] ss:$16 sps:$4 sm:$0xff]   ;;  %v7274_v52 = vld [vmem:[%s8749_s23 + $0x6e0] ss:$16 sps:$4 sm:$0xff]  }
  0xf3   : > { %4002 = vmatpush1.bf16.msra.mxu0 %v7205_v1  ;;  %v7279_v53 = vld [vmem:[%s8749_s23 + $0x504] ss:$16 sps:$4 sm:$0xff]   ;;  %v7277_v55 = vld [vmem:[%s8749_s23 + $0x500] ss:$16 sps:$4 sm:$0xff]  }
  0xf4   : > { %4043 = vmatpush1.bf16.msra.mxu1 %v7206_v2  ;;  %4003 = vmatprep.subr.bf16.mxu0 %v7207_v3  ;;  %v7282_v54 = vld [vmem:[%s8749_s23 + $0x704] ss:$16 sps:$4 sm:$0xff]   ;;  %v7280_v56 = vld [vmem:[%s8749_s23 + $0x700] ss:$16 sps:$4 sm:$0xff]  }
  0xf5   : > { %4044 = vmatprep.subr.bf16.mxu1 %v7209_v4  ;;  %v7285_v57 = vld [vmem:[%s8749_s23 + $0x524] ss:$16 sps:$4 sm:$0xff]   ;;  %v7283_v60 = vld [vmem:[%s8749_s23 + $0x520] ss:$16 sps:$4 sm:$0xff]  }
  0xf6   : > { %v7288_v59 = vld [vmem:[%s8749_s23 + $0x724] ss:$16 sps:$4 sm:$0xff]   ;;  %v7286_v61 = vld [vmem:[%s8749_s23 + $0x720] ss:$16 sps:$4 sm:$0xff]  }
  0xf7   : > { %4004 = vmatpush1.bf16.msra.mxu0 %v7211_v5  ;;  %v7291_v63 = vld [vmem:[%s8749_s23 + $0x544] ss:$16 sps:$4 sm:$0xff]   ;;  %v7289_v1 = vld [vmem:[%s8749_s23 + $0x540] ss:$16 sps:$4 sm:$0xff]  }
  0xf8   : > { %4045 = vmatpush1.bf16.msra.mxu1 %v7212_v6  ;;  %4005 = vmatprep.subr.bf16.mxu0 %v7213_v7  ;;  %v7294_v0 = vld [vmem:[%s8749_s23 + $0x744] ss:$16 sps:$4 sm:$0xff]   ;;  %v7292_v2 = vld [vmem:[%s8749_s23 + $0x740] ss:$16 sps:$4 sm:$0xff]  }
  0xf9   : > { %4046 = vmatprep.subr.bf16.mxu1 %v7215_v8  ;;  %v7297_v3 = vld [vmem:[%s8749_s23 + $0x564] ss:$16 sps:$4 sm:$0xff]   ;;  %v7295_v5 = vld [vmem:[%s8749_s23 + $0x560] ss:$16 sps:$4 sm:$0xff]  }
  0xfa   : > { %v7300_v4 = vld [vmem:[%s8749_s23 + $0x764] ss:$16 sps:$4 sm:$0xff]   ;;  %v7298_v6 = vld [vmem:[%s8749_s23 + $0x760] ss:$16 sps:$4 sm:$0xff]  }
  0xfb   : > { %4006 = vmatpush1.bf16.msra.mxu0 %v7217_v9  ;;  %v7303_v7 = vld [vmem:[%s8749_s23 + $0x584] ss:$16 sps:$4 sm:$0xff]   ;;  %v7301_v9 = vld [vmem:[%s8749_s23 + $0x580] ss:$16 sps:$4 sm:$0xff]  }
  0xfc   : > { %4047 = vmatpush1.bf16.msra.mxu1 %v7218_v10  ;;  %4007 = vmatprep.subr.bf16.mxu0 %v7219_v11  ;;  %v7306_v8 = vld [vmem:[%s8749_s23 + $0x784] ss:$16 sps:$4 sm:$0xff]   ;;  %v7304_v10 = vld [vmem:[%s8749_s23 + $0x780] ss:$16 sps:$4 sm:$0xff]  }
  0xfd   : > { %4048 = vmatprep.subr.bf16.mxu1 %v7221_v12  ;;  %v7309_v11 = vld [vmem:[%s8749_s23 + $0x5a4] ss:$16 sps:$4 sm:$0xff]  }
  0xfe   : > { %v7312_v12 = vld [vmem:[%s8749_s23 + $0x7a4] ss:$16 sps:$4 sm:$0xff]  }
  0xff   : > { %4008 = vmatpush1.bf16.msra.mxu0 %v7223_v13  ;;  %v7307_v13 = vld [vmem:[%s8749_s23 + $0x5a0] ss:$16 sps:$4 sm:$0xff]  }
 0x100   : > { %4049 = vmatpush1.bf16.msra.mxu1 %v7224_v14  ;;  %4059 = vmatprep.subr.bf16.mxu0 %v7231_v15  ;;  %v7310_v14 = vld [vmem:[%s8749_s23 + $0x7a0] ss:$16 sps:$4 sm:$0xff]   ;;  %v7315_v15 = vld [vmem:[%s8749_s23 + $0x5c4] ss:$16 sps:$4 sm:$0xff]  }
 0x101   : > { %4100 = vmatprep.subr.bf16.mxu1 %v7234_v16  ;;  %v7318_v16 = vld [vmem:[%s8749_s23 + $0x7c4] ss:$16 sps:$4 sm:$0xff]  }
 0x102   : > { %4010 = vmatmul.mubr.bf16.vlgmr.msra.gmra.mrb[0].mxu0 %v8848_v17 }
 0x103   : > { %4051 = vmatmul.mubr.bf16.vlgmr.msra.gmra.mrb[0].mxu1 %v8850_v18  ;;  %4060 = vmatpush1.bf16.msra.mxu0 %v7229_v19  ;;  %v7313_v19 = vld [vmem:[%s8749_s23 + $0x5c0] ss:$16 sps:$4 sm:$0xff]  }
 0x104   : > { %4101 = vmatpush1.bf16.msra.mxu1 %v7232_v20  ;;  %4061 = vmatprep.subr.bf16.mxu0 %v7237_v21  ;;  %v7316_v20 = vld [vmem:[%s8749_s23 + $0x7c0] ss:$16 sps:$4 sm:$0xff]   ;;  %v7321_v21 = vld [vmem:[%s8749_s23 + $0x5e4] ss:$16 sps:$4 sm:$0xff]  }
 0x105   : > { %4102 = vmatprep.subr.bf16.mxu1 %v7240_v22  ;;  %4091 = vmatprep.mubr.bf16.mxu0 %v8888_v47  ;;  %v7324_v22 = vld [vmem:[%s8749_s23 + $0x7e4] ss:$16 sps:$4 sm:$0xff]  }
 0x106   : > { %4132 = vmatprep.mubr.bf16.mxu1 %v8892_v48 }
 0x107   : > { %4062 = vmatpush1.bf16.msra.mxu0 %v7235_v23  ;;  %v7319_v23 = vld [vmem:[%s8749_s23 + $0x5e0] ss:$16 sps:$4 sm:$0xff]  }
 0x108   : > { %4103 = vmatpush1.bf16.msra.mxu1 %v7238_v24  ;;  %4063 = vmatprep.subr.bf16.mxu0 %v7243_v25  ;;  %v7322_v24 = vld [vmem:[%s8749_s23 + $0x7e0] ss:$16 sps:$4 sm:$0xff]   ;;  %v7331_v25 = vld [vmem:[%s8749_s23 + $0x804] ss:$16 sps:$4 sm:$0xff]  }
 0x109   : > { %4104 = vmatprep.subr.bf16.mxu1 %v7246_v26  ;;  %v7334_v26 = vld [vmem:[%s8749_s23 + $0xa04] ss:$16 sps:$4 sm:$0xff]  }
 0x10b   : > { %4064 = vmatpush1.bf16.msra.mxu0 %v7241_v27  ;;  %v8936_v27 = vcombine.low %v8879_v43, %v8879_v43  ;;  %v7349_v43 = vld [vmem:[%s8749_s23 + $0x864] ss:$16 sps:$4 sm:$0xff]  }
 0x10c   : > { %4105 = vmatpush1.bf16.msra.mxu1 %v7244_v28  ;;  %4065 = vmatprep.subr.bf16.mxu0 %v7249_v29  ;;  %v8940_v28 = vcombine.low %v8882_v44, %v8882_v44  ;;  %v7329_v29 = vld [vmem:[%s8749_s23 + $0x800] ss:$16 sps:$4 sm:$0xff]   ;;  %v7352_v44 = vld [vmem:[%s8749_s23 + $0xa64] ss:$16 sps:$4 sm:$0xff]  }
 0x10d   : > { %4106 = vmatprep.subr.bf16.mxu1 %v7252_v30  ;;  %v7332_v30 = vld [vmem:[%s8749_s23 + $0xa00] ss:$16 sps:$4 sm:$0xff]  }
 0x10f   : > { %4066 = vmatpush1.bf16.msra.mxu0 %v7247_v31  ;;  %v7337_v31 = vld [vmem:[%s8749_s23 + $0x824] ss:$16 sps:$4 sm:$0xff]  }
 0x110   : > { %4107 = vmatpush1.bf16.msra.mxu1 %v7250_v32  ;;  %4067 = vmatprep.subr.bf16.mxu0 %v7255_v33  ;;  %v7340_v32 = vld [vmem:[%s8749_s23 + $0xa24] ss:$16 sps:$4 sm:$0xff]  }
 0x111   : > { %4108 = vmatprep.subr.bf16.mxu1 %v7258_v34  ;;  %v8947_v33 = vld [vmem:[%s8771_s17 + $0x20] sm:$0xff]  ;;  %v8950_v34 = vld [vmem:[%s8771_s17 + $0x28] sm:$0xff] }
 0x113   : > { %4068 = vmatpush1.bf16.msra.mxu0 %v7253_v35  ;;  %v8954_v35 = vcombine.high %v8947_v33, %v8947_v33 }
 0x114   : > { %4109 = vmatpush1.bf16.msra.mxu1 %v7256_v36  ;;  %4069 = vmatprep.subr.bf16.mxu0 %v7261_v37  ;;  %v8958_v36 = vcombine.high %v8950_v34, %v8950_v34  ;;  %v7335_v37 = vld [vmem:[%s8749_s23 + $0x820] ss:$16 sps:$4 sm:$0xff]  }
 0x115   : > { %4110 = vmatprep.subr.bf16.mxu1 %v7264_v38  ;;  %v7338_v38 = vld [vmem:[%s8749_s23 + $0xa20] ss:$16 sps:$4 sm:$0xff]  }
 0x117   : > { %4070 = vmatpush1.bf16.msra.mxu0 %v7259_v39  ;;  %v7343_v39 = vld [vmem:[%s8749_s23 + $0x844] ss:$16 sps:$4 sm:$0xff]  }
 0x118   : > { %4111 = vmatpush1.bf16.msra.mxu1 %v7262_v40  ;;  %4071 = vmatprep.subr.bf16.mxu0 %v7267_v41  ;;  %v7346_v40 = vld [vmem:[%s8749_s23 + $0xa44] ss:$16 sps:$4 sm:$0xff]   ;;  %v7341_v41 = vld [vmem:[%s8749_s23 + $0x840] ss:$16 sps:$4 sm:$0xff]  }
 0x119   : > { %4112 = vmatprep.subr.bf16.mxu1 %v7270_v42  ;;  %v7344_v42 = vld [vmem:[%s8749_s23 + $0xa40] ss:$16 sps:$4 sm:$0xff]  }
 0x11b   : > { %4072 = vmatpush1.bf16.msra.mxu0 %v7265_v45  ;;  %v7347_v45 = vld [vmem:[%s8749_s23 + $0x860] ss:$16 sps:$4 sm:$0xff]  }
 0x11c   : > { %4113 = vmatpush1.bf16.msra.mxu1 %v7268_v46  ;;  %4073 = vmatprep.subr.bf16.mxu0 %v7273_v49  ;;  %v7350_v46 = vld [vmem:[%s8749_s23 + $0xa60] ss:$16 sps:$4 sm:$0xff]   ;;  %v7355_v49 = vld [vmem:[%s8749_s23 + $0x884] ss:$16 sps:$4 sm:$0xff]  }
 0x11d   : > { %4114 = vmatprep.subr.bf16.mxu1 %v7276_v50  ;;  %v7358_v50 = vld [vmem:[%s8749_s23 + $0xa84] ss:$16 sps:$4 sm:$0xff]  }
 0x11f   : > { %4074 = vmatpush1.bf16.msra.mxu0 %v7271_v51  ;;  %v7353_v51 = vld [vmem:[%s8749_s23 + $0x880] ss:$16 sps:$4 sm:$0xff]  }
 0x120   : > { %4115 = vmatpush1.bf16.msra.mxu1 %v7274_v52  ;;  %4075 = vmatprep.subr.bf16.mxu0 %v7279_v53  ;;  %v7356_v52 = vld [vmem:[%s8749_s23 + $0xa80] ss:$16 sps:$4 sm:$0xff]   ;;  %v7361_v53 = vld [vmem:[%s8749_s23 + $0x8a4] ss:$16 sps:$4 sm:$0xff]  }
 0x121   : > { %4116 = vmatprep.subr.bf16.mxu1 %v7282_v54  ;;  %v7364_v54 = vld [vmem:[%s8749_s23 + $0xaa4] ss:$16 sps:$4 sm:$0xff]  }
 0x123   : > { %4076 = vmatpush1.bf16.msra.mxu0 %v7277_v55  ;;  %v7359_v55 = vld [vmem:[%s8749_s23 + $0x8a0] ss:$16 sps:$4 sm:$0xff]  }
 0x124   : > { %4117 = vmatpush1.bf16.msra.mxu1 %v7280_v56  ;;  %4077 = vmatprep.subr.bf16.mxu0 %v7285_v57  ;;  %v7362_v56 = vld [vmem:[%s8749_s23 + $0xaa0] ss:$16 sps:$4 sm:$0xff]   ;;  %v7367_v57 = vld [vmem:[%s8749_s23 + $0x8c4] ss:$16 sps:$4 sm:$0xff]  }
 0x125   : > { %4118 = vmatprep.subr.bf16.mxu1 %v7288_v59  ;;  %v7370_v59 = vld [vmem:[%s8749_s23 + $0xac4] ss:$16 sps:$4 sm:$0xff]  }
 0x127   : > { %4078 = vmatpush1.bf16.msra.mxu0 %v7283_v60  ;;  %v7365_v60 = vld [vmem:[%s8749_s23 + $0x8c0] ss:$16 sps:$4 sm:$0xff]  }
 0x128   : > { %4119 = vmatpush1.bf16.msra.mxu1 %v7286_v61  ;;  %4079 = vmatprep.subr.bf16.mxu0 %v7291_v63  ;;  %v7368_v61 = vld [vmem:[%s8749_s23 + $0xac0] ss:$16 sps:$4 sm:$0xff]   ;;  %v7373_v63 = vld [vmem:[%s8749_s23 + $0x8e4] ss:$16 sps:$4 sm:$0xff]  }
 0x129   : > { %4120 = vmatprep.subr.bf16.mxu1 %v7294_v0  ;;  %v7376_v0 = vld [vmem:[%s8749_s23 + $0xae4] ss:$16 sps:$4 sm:$0xff]  }
 0x12b   : > { %4080 = vmatpush1.bf16.msra.mxu0 %v7289_v1  ;;  %v7371_v1 = vld [vmem:[%s8749_s23 + $0x8e0] ss:$16 sps:$4 sm:$0xff]  }
 0x12c   : > { %4121 = vmatpush1.bf16.msra.mxu1 %v7292_v2  ;;  %4081 = vmatprep.subr.bf16.mxu0 %v7297_v3  ;;  %v7374_v2 = vld [vmem:[%s8749_s23 + $0xae0] ss:$16 sps:$4 sm:$0xff]   ;;  %v7379_v3 = vld [vmem:[%s8749_s23 + $0x904] ss:$16 sps:$4 sm:$0xff]  }
 0x12d   : > { %4122 = vmatprep.subr.bf16.mxu1 %v7300_v4  ;;  %v7382_v4 = vld [vmem:[%s8749_s23 + $0xb04] ss:$16 sps:$4 sm:$0xff]  }
 0x12f   : > { %4082 = vmatpush1.bf16.msra.mxu0 %v7295_v5  ;;  %v7377_v5 = vld [vmem:[%s8749_s23 + $0x900] ss:$16 sps:$4 sm:$0xff]  }
 0x130   : > { %4123 = vmatpush1.bf16.msra.mxu1 %v7298_v6  ;;  %4083 = vmatprep.subr.bf16.mxu0 %v7303_v7  ;;  %v7380_v6 = vld [vmem:[%s8749_s23 + $0xb00] ss:$16 sps:$4 sm:$0xff]   ;;  %v7385_v7 = vld [vmem:[%s8749_s23 + $0x924] ss:$16 sps:$4 sm:$0xff]  }
 0x131   : > { %4124 = vmatprep.subr.bf16.mxu1 %v7306_v8  ;;  %v7388_v8 = vld [vmem:[%s8749_s23 + $0xb24] ss:$16 sps:$4 sm:$0xff]  }
 0x133   : > { %4084 = vmatpush1.bf16.msra.mxu0 %v7301_v9  ;;  %v7383_v9 = vld [vmem:[%s8749_s23 + $0x920] ss:$16 sps:$4 sm:$0xff]  }
 0x134   : > { %4125 = vmatpush1.bf16.msra.mxu1 %v7304_v10  ;;  %4085 = vmatprep.subr.bf16.mxu0 %v7309_v11  ;;  %v7386_v10 = vld [vmem:[%s8749_s23 + $0xb20] ss:$16 sps:$4 sm:$0xff]   ;;  %v7391_v11 = vld [vmem:[%s8749_s23 + $0x944] ss:$16 sps:$4 sm:$0xff]  }
 0x135   : > { %4126 = vmatprep.subr.bf16.mxu1 %v7312_v12  ;;  %v7394_v12 = vld [vmem:[%s8749_s23 + $0xb44] ss:$16 sps:$4 sm:$0xff]  }
 0x137   : > { %4086 = vmatpush1.bf16.msra.mxu0 %v7307_v13  ;;  %v7389_v13 = vld [vmem:[%s8749_s23 + $0x940] ss:$16 sps:$4 sm:$0xff]  }
 0x138   : > { %4127 = vmatpush1.bf16.msra.mxu1 %v7310_v14  ;;  %4087 = vmatprep.subr.bf16.mxu0 %v7315_v15  ;;  %v7392_v14 = vld [vmem:[%s8749_s23 + $0xb40] ss:$16 sps:$4 sm:$0xff]   ;;  %v7397_v15 = vld [vmem:[%s8749_s23 + $0x964] ss:$16 sps:$4 sm:$0xff]  }
 0x139   : > { %4128 = vmatprep.subr.bf16.mxu1 %v7318_v16  ;;  %v7400_v16 = vld [vmem:[%s8749_s23 + $0xb64] ss:$16 sps:$4 sm:$0xff]  }
 0x13b   : > { %4088 = vmatpush1.bf16.msra.mxu0 %v7313_v19  ;;  %v7395_v19 = vld [vmem:[%s8749_s23 + $0x960] ss:$16 sps:$4 sm:$0xff]  }
 0x13c   : > { %4129 = vmatpush1.bf16.msra.mxu1 %v7316_v20  ;;  %4089 = vmatprep.subr.bf16.mxu0 %v7321_v21  ;;  %v7398_v20 = vld [vmem:[%s8749_s23 + $0xb60] ss:$16 sps:$4 sm:$0xff]   ;;  %v7403_v21 = vld [vmem:[%s8749_s23 + $0x984] ss:$16 sps:$4 sm:$0xff]  }
 0x13d   : > { %4130 = vmatprep.subr.bf16.mxu1 %v7324_v22  ;;  %v7406_v22 = vld [vmem:[%s8749_s23 + $0xb84] ss:$16 sps:$4 sm:$0xff]  }
 0x13f   : > { %4090 = vmatpush1.bf16.msra.mxu0 %v7319_v23  ;;  %v7401_v23 = vld [vmem:[%s8749_s23 + $0x980] ss:$16 sps:$4 sm:$0xff]  }
 0x140   : > { %4131 = vmatpush1.bf16.msra.mxu1 %v7322_v24  ;;  %4141 = vmatprep.subr.bf16.mxu0 %v7331_v25  ;;  %v7404_v24 = vld [vmem:[%s8749_s23 + $0xb80] ss:$16 sps:$4 sm:$0xff]   ;;  %v7409_v25 = vld [vmem:[%s8749_s23 + $0x9a4] ss:$16 sps:$4 sm:$0xff]  }
 0x141   : > { %4182 = vmatprep.subr.bf16.mxu1 %v7334_v26  ;;  %v7412_v26 = vld [vmem:[%s8749_s23 + $0xba4] ss:$16 sps:$4 sm:$0xff]  }
 0x142   : > { %4092 = vmatmul.mubr.bf16.vlgmr.msra.gmra.mrb[4].mxu0 %v8936_v27 }
 0x143   : > { %4133 = vmatmul.mubr.bf16.vlgmr.msra.gmra.mrb[4].mxu1 %v8940_v28  ;;  %4142 = vmatpush1.bf16.msra.mxu0 %v7329_v29  ;;  %v7407_v29 = vld [vmem:[%s8749_s23 + $0x9a0] ss:$16 sps:$4 sm:$0xff]  }
 0x144   : > { %4183 = vmatpush1.bf16.msra.mxu1 %v7332_v30  ;;  %4143 = vmatprep.subr.bf16.mxu0 %v7337_v31  ;;  %v7410_v30 = vld [vmem:[%s8749_s23 + $0xba0] ss:$16 sps:$4 sm:$0xff]   ;;  %v7415_v31 = vld [vmem:[%s8749_s23 + $0x9c4] ss:$16 sps:$4 sm:$0xff]  }
 0x145   : > { %4184 = vmatprep.subr.bf16.mxu1 %v7340_v32  ;;  %4173 = vmatprep.mubr.bf16.mxu0 %v8954_v35  ;;  %v7418_v32 = vld [vmem:[%s8749_s23 + $0xbc4] ss:$16 sps:$4 sm:$0xff]  }
 0x146   : > { %4214 = vmatprep.mubr.bf16.mxu1 %v8958_v36 }
 0x147   : > { %4144 = vmatpush1.bf16.msra.mxu0 %v7335_v37  ;;  %v7413_v37 = vld [vmem:[%s8749_s23 + $0x9c0] ss:$16 sps:$4 sm:$0xff]  }
 0x148   : > { %4185 = vmatpush1.bf16.msra.mxu1 %v7338_v38  ;;  %4145 = vmatprep.subr.bf16.mxu0 %v7343_v39  ;;  %v7416_v38 = vld [vmem:[%s8749_s23 + $0xbc0] ss:$16 sps:$4 sm:$0xff]   ;;  %v7421_v39 = vld [vmem:[%s8749_s23 + $0x9e4] ss:$16 sps:$4 sm:$0xff]  }
 0x149   : > { %4186 = vmatprep.subr.bf16.mxu1 %v7346_v40  ;;  %v7424_v40 = vld [vmem:[%s8749_s23 + $0xbe4] ss:$16 sps:$4 sm:$0xff]  }
 0x14b   : > { %4146 = vmatpush1.bf16.msra.mxu0 %v7341_v41  ;;  %v7419_v41 = vld [vmem:[%s8749_s23 + $0x9e0] ss:$16 sps:$4 sm:$0xff]  }
 0x14c   : > { %4187 = vmatpush1.bf16.msra.mxu1 %v7344_v42  ;;  %4147 = vmatprep.subr.bf16.mxu0 %v7349_v43  ;;  %v7422_v42 = vld [vmem:[%s8749_s23 + $0xbe0] ss:$16 sps:$4 sm:$0xff]   ;;  %v7431_v43 = vld [vmem:[%s8749_s23 + $0xc04] ss:$16 sps:$4 sm:$0xff]  }
 0x14d   : > { %4188 = vmatprep.subr.bf16.mxu1 %v7352_v44  ;;  %v7434_v44 = vld [vmem:[%s8749_s23 + $0xe04] ss:$16 sps:$4 sm:$0xff]  }
 0x14f   : > { %4148 = vmatpush1.bf16.msra.mxu0 %v7347_v45  ;;  %v7429_v45 = vld [vmem:[%s8749_s23 + $0xc00] ss:$16 sps:$4 sm:$0xff]  }
 0x150   : > { %4189 = vmatpush1.bf16.msra.mxu1 %v7350_v46  ;;  %4149 = vmatprep.subr.bf16.mxu0 %v7355_v49  ;;  %v7432_v46 = vld [vmem:[%s8749_s23 + $0xe00] ss:$16 sps:$4 sm:$0xff]   ;;  %v9028_v49 = vcombine.low %v8947_v33, %v8947_v33 }
 0x151   : > { %4190 = vmatprep.subr.bf16.mxu1 %v7358_v50  ;;  %v9032_v50 = vcombine.low %v8950_v34, %v8950_v34 }
 0x153   : > { %4150 = vmatpush1.bf16.msra.mxu0 %v7353_v51  ;;  %v9035_v51 = vld [vmem:[%s8771_s17 + $0x30] sm:$0xff] }
 0x154   : > { %4191 = vmatpush1.bf16.msra.mxu1 %v7356_v52  ;;  %4151 = vmatprep.subr.bf16.mxu0 %v7361_v53  ;;  %v9038_v52 = vld [vmem:[%s8771_s17 + $0x38] sm:$0xff]  ;;  %v7437_v53 = vld [vmem:[%s8749_s23 + $0xc24] ss:$16 sps:$4 sm:$0xff]   ;;  %v9044_v33 = vcombine.high %v9035_v51, %v9035_v51 }
 0x155   : > { %4192 = vmatprep.subr.bf16.mxu1 %v7364_v54  ;;  %v7440_v54 = vld [vmem:[%s8749_s23 + $0xe24] ss:$16 sps:$4 sm:$0xff]   ;;  %v9048_v34 = vcombine.high %v9038_v52, %v9038_v52 }
 0x157   : > { %4152 = vmatpush1.bf16.msra.mxu0 %v7359_v55  ;;  %v7435_v55 = vld [vmem:[%s8749_s23 + $0xc20] ss:$16 sps:$4 sm:$0xff]  }
 0x158   : > { %4193 = vmatpush1.bf16.msra.mxu1 %v7362_v56  ;;  %4153 = vmatprep.subr.bf16.mxu0 %v7367_v57  ;;  %v7438_v56 = vld [vmem:[%s8749_s23 + $0xe20] ss:$16 sps:$4 sm:$0xff]   ;;  %v7443_v57 = vld [vmem:[%s8749_s23 + $0xc44] ss:$16 sps:$4 sm:$0xff]  }
 0x159   : > { %4194 = vmatprep.subr.bf16.mxu1 %v7370_v59  ;;  %v7446_v59 = vld [vmem:[%s8749_s23 + $0xe44] ss:$16 sps:$4 sm:$0xff]  }
 0x15b   : > { %4154 = vmatpush1.bf16.msra.mxu0 %v7365_v60  ;;  %v7441_v60 = vld [vmem:[%s8749_s23 + $0xc40] ss:$16 sps:$4 sm:$0xff]  }
 0x15c   : > { %4195 = vmatpush1.bf16.msra.mxu1 %v7368_v61  ;;  %4155 = vmatprep.subr.bf16.mxu0 %v7373_v63  ;;  %v7444_v61 = vld [vmem:[%s8749_s23 + $0xe40] ss:$16 sps:$4 sm:$0xff]   ;;  %v7449_v63 = vld [vmem:[%s8749_s23 + $0xc64] ss:$16 sps:$4 sm:$0xff]  }
 0x15d   : > { %4196 = vmatprep.subr.bf16.mxu1 %v7376_v0  ;;  %v7452_v0 = vld [vmem:[%s8749_s23 + $0xe64] ss:$16 sps:$4 sm:$0xff]  }
 0x15f   : > { %4156 = vmatpush1.bf16.msra.mxu0 %v7371_v1  ;;  %v7447_v1 = vld [vmem:[%s8749_s23 + $0xc60] ss:$16 sps:$4 sm:$0xff]  }
 0x160   : > { %4197 = vmatpush1.bf16.msra.mxu1 %v7374_v2  ;;  %4157 = vmatprep.subr.bf16.mxu0 %v7379_v3  ;;  %v7450_v2 = vld [vmem:[%s8749_s23 + $0xe60] ss:$16 sps:$4 sm:$0xff]   ;;  %v7455_v3 = vld [vmem:[%s8749_s23 + $0xc84] ss:$16 sps:$4 sm:$0xff]  }
 0x161   : > { %4198 = vmatprep.subr.bf16.mxu1 %v7382_v4  ;;  %v7458_v4 = vld [vmem:[%s8749_s23 + $0xe84] ss:$16 sps:$4 sm:$0xff]  }
 0x163   : > { %4158 = vmatpush1.bf16.msra.mxu0 %v7377_v5  ;;  %v7453_v5 = vld [vmem:[%s8749_s23 + $0xc80] ss:$16 sps:$4 sm:$0xff]  }
 0x164   : > { %4199 = vmatpush1.bf16.msra.mxu1 %v7380_v6  ;;  %4159 = vmatprep.subr.bf16.mxu0 %v7385_v7  ;;  %v7456_v6 = vld [vmem:[%s8749_s23 + $0xe80] ss:$16 sps:$4 sm:$0xff]   ;;  %v7461_v7 = vld [vmem:[%s8749_s23 + $0xca4] ss:$16 sps:$4 sm:$0xff]  }
 0x165   : > { %4200 = vmatprep.subr.bf16.mxu1 %v7388_v8  ;;  %v7464_v8 = vld [vmem:[%s8749_s23 + $0xea4] ss:$16 sps:$4 sm:$0xff]  }
 0x167   : > { %4160 = vmatpush1.bf16.msra.mxu0 %v7383_v9  ;;  %v7459_v9 = vld [vmem:[%s8749_s23 + $0xca0] ss:$16 sps:$4 sm:$0xff]  }
 0x168   : > { %4201 = vmatpush1.bf16.msra.mxu1 %v7386_v10  ;;  %4161 = vmatprep.subr.bf16.mxu0 %v7391_v11  ;;  %v7462_v10 = vld [vmem:[%s8749_s23 + $0xea0] ss:$16 sps:$4 sm:$0xff]   ;;  %v7467_v11 = vld [vmem:[%s8749_s23 + $0xcc4] ss:$16 sps:$4 sm:$0xff]  }
 0x169   : > { %4202 = vmatprep.subr.bf16.mxu1 %v7394_v12  ;;  %v7470_v12 = vld [vmem:[%s8749_s23 + $0xec4] ss:$16 sps:$4 sm:$0xff]  }
 0x16b   : > { %4162 = vmatpush1.bf16.msra.mxu0 %v7389_v13  ;;  %v7465_v13 = vld [vmem:[%s8749_s23 + $0xcc0] ss:$16 sps:$4 sm:$0xff]  }
 0x16c   : > { %4203 = vmatpush1.bf16.msra.mxu1 %v7392_v14  ;;  %4163 = vmatprep.subr.bf16.mxu0 %v7397_v15  ;;  %v7468_v14 = vld [vmem:[%s8749_s23 + $0xec0] ss:$16 sps:$4 sm:$0xff]   ;;  %v7473_v15 = vld [vmem:[%s8749_s23 + $0xce4] ss:$16 sps:$4 sm:$0xff]  }
 0x16d   : > { %4204 = vmatprep.subr.bf16.mxu1 %v7400_v16  ;;  %v7476_v16 = vld [vmem:[%s8749_s23 + $0xee4] ss:$16 sps:$4 sm:$0xff]  }
 0x16f   : > { %4164 = vmatpush1.bf16.msra.mxu0 %v7395_v19  ;;  %v7471_v19 = vld [vmem:[%s8749_s23 + $0xce0] ss:$16 sps:$4 sm:$0xff]  }
 0x170   : > { %4205 = vmatpush1.bf16.msra.mxu1 %v7398_v20  ;;  %4165 = vmatprep.subr.bf16.mxu0 %v7403_v21  ;;  %v7474_v20 = vld [vmem:[%s8749_s23 + $0xee0] ss:$16 sps:$4 sm:$0xff]   ;;  %v7479_v21 = vld [vmem:[%s8749_s23 + $0xd04] ss:$16 sps:$4 sm:$0xff]  }
 0x171   : > { %4206 = vmatprep.subr.bf16.mxu1 %v7406_v22  ;;  %v7482_v22 = vld [vmem:[%s8749_s23 + $0xf04] ss:$16 sps:$4 sm:$0xff]  }
 0x173   : > { %4166 = vmatpush1.bf16.msra.mxu0 %v7401_v23  ;;  %v7477_v23 = vld [vmem:[%s8749_s23 + $0xd00] ss:$16 sps:$4 sm:$0xff]  }
 0x174   : > { %4207 = vmatpush1.bf16.msra.mxu1 %v7404_v24  ;;  %4167 = vmatprep.subr.bf16.mxu0 %v7409_v25  ;;  %v7480_v24 = vld [vmem:[%s8749_s23 + $0xf00] ss:$16 sps:$4 sm:$0xff]   ;;  %v7485_v25 = vld [vmem:[%s8749_s23 + $0xd24] ss:$16 sps:$4 sm:$0xff]  }
 0x175   : > { %4208 = vmatprep.subr.bf16.mxu1 %v7412_v26  ;;  %v7488_v26 = vld [vmem:[%s8749_s23 + $0xf24] ss:$16 sps:$4 sm:$0xff]  }
 0x177   : > { %4168 = vmatpush1.bf16.msra.mxu0 %v7407_v29  ;;  %v7483_v29 = vld [vmem:[%s8749_s23 + $0xd20] ss:$16 sps:$4 sm:$0xff]  }
 0x178   : > { %4209 = vmatpush1.bf16.msra.mxu1 %v7410_v30  ;;  %4169 = vmatprep.subr.bf16.mxu0 %v7415_v31  ;;  %v7486_v30 = vld [vmem:[%s8749_s23 + $0xf20] ss:$16 sps:$4 sm:$0xff]   ;;  %v7491_v31 = vld [vmem:[%s8749_s23 + $0xd44] ss:$16 sps:$4 sm:$0xff]  }
 0x179   : > { %4210 = vmatprep.subr.bf16.mxu1 %v7418_v32  ;;  %v7494_v32 = vld [vmem:[%s8749_s23 + $0xf44] ss:$16 sps:$4 sm:$0xff]  }
 0x17b   : > { %4170 = vmatpush1.bf16.msra.mxu0 %v7413_v37  ;;  %v7489_v37 = vld [vmem:[%s8749_s23 + $0xd40] ss:$16 sps:$4 sm:$0xff]  }
 0x17c   : > { %4211 = vmatpush1.bf16.msra.mxu1 %v7416_v38  ;;  %4171 = vmatprep.subr.bf16.mxu0 %v7421_v39  ;;  %v7492_v38 = vld [vmem:[%s8749_s23 + $0xf40] ss:$16 sps:$4 sm:$0xff]   ;;  %v7497_v39 = vld [vmem:[%s8749_s23 + $0xd64] ss:$16 sps:$4 sm:$0xff]  }
 0x17d   : > { %4212 = vmatprep.subr.bf16.mxu1 %v7424_v40  ;;  %v7500_v40 = vld [vmem:[%s8749_s23 + $0xf64] ss:$16 sps:$4 sm:$0xff]  }
 0x17f   : > { %4172 = vmatpush1.bf16.msra.mxu0 %v7419_v41  ;;  %v7495_v41 = vld [vmem:[%s8749_s23 + $0xd60] ss:$16 sps:$4 sm:$0xff]  }
 0x180   : > { %4213 = vmatpush1.bf16.msra.mxu1 %v7422_v42  ;;  %4223 = vmatprep.subr.bf16.mxu0 %v7431_v43  ;;  %v7498_v42 = vld [vmem:[%s8749_s23 + $0xf60] ss:$16 sps:$4 sm:$0xff]   ;;  %v7503_v43 = vld [vmem:[%s8749_s23 + $0xd84] ss:$16 sps:$4 sm:$0xff]  }
 0x181   : > { %4264 = vmatprep.subr.bf16.mxu1 %v7434_v44  ;;  %v7506_v44 = vld [vmem:[%s8749_s23 + $0xf84] ss:$16 sps:$4 sm:$0xff]  }
 0x182   : > { %4174 = vmatmul.mubr.bf16.vlgmr.msra.gmra.mrb[8].mxu0 %v9028_v49 }
 0x183   : > { %4215 = vmatmul.mubr.bf16.vlgmr.msra.gmra.mrb[8].mxu1 %v9032_v50  ;;  %4224 = vmatpush1.bf16.msra.mxu0 %v7429_v45  ;;  %v7501_v45 = vld [vmem:[%s8749_s23 + $0xd80] ss:$16 sps:$4 sm:$0xff]  }
 0x184   : > { %4265 = vmatpush1.bf16.msra.mxu1 %v7432_v46  ;;  %4225 = vmatprep.subr.bf16.mxu0 %v7437_v53  ;;  %v7504_v46 = vld [vmem:[%s8749_s23 + $0xf80] ss:$16 sps:$4 sm:$0xff]   ;;  %v7509_v53 = vld [vmem:[%s8749_s23 + $0xda4] ss:$16 sps:$4 sm:$0xff]  }
 0x185   : > { %4266 = vmatprep.subr.bf16.mxu1 %v7440_v54  ;;  %4255 = vmatprep.mubr.bf16.mxu0 %v9044_v33  ;;  %v7512_v54 = vld [vmem:[%s8749_s23 + $0xfa4] ss:$16 sps:$4 sm:$0xff]  }
 0x186   : > { %4296 = vmatprep.mubr.bf16.mxu1 %v9048_v34 }
 0x187   : > { %4226 = vmatpush1.bf16.msra.mxu0 %v7435_v55  ;;  %v7507_v55 = vld [vmem:[%s8749_s23 + $0xda0] ss:$16 sps:$4 sm:$0xff]  }
 0x188   : > { %4267 = vmatpush1.bf16.msra.mxu1 %v7438_v56  ;;  %4227 = vmatprep.subr.bf16.mxu0 %v7443_v57  ;;  %v7510_v56 = vld [vmem:[%s8749_s23 + $0xfa0] ss:$16 sps:$4 sm:$0xff]   ;;  %v7515_v57 = vld [vmem:[%s8749_s23 + $0xdc4] ss:$16 sps:$4 sm:$0xff]  }
 0x189   : > { %4268 = vmatprep.subr.bf16.mxu1 %v7446_v59  ;;  %v7518_v59 = vld [vmem:[%s8749_s23 + $0xfc4] ss:$16 sps:$4 sm:$0xff]  }
 0x18b   : > { %4228 = vmatpush1.bf16.msra.mxu0 %v7441_v60  ;;  %v7513_v60 = vld [vmem:[%s8749_s23 + $0xdc0] ss:$16 sps:$4 sm:$0xff]  }
 0x18c   : > { %4269 = vmatpush1.bf16.msra.mxu1 %v7444_v61  ;;  %4229 = vmatprep.subr.bf16.mxu0 %v7449_v63  ;;  %v7516_v61 = vld [vmem:[%s8749_s23 + $0xfc0] ss:$16 sps:$4 sm:$0xff]   ;;  %v7521_v63 = vld [vmem:[%s8749_s23 + $0xde4] ss:$16 sps:$4 sm:$0xff]  }
 0x18d   : > { %4270 = vmatprep.subr.bf16.mxu1 %v7452_v0  ;;  %v7524_v0 = vld [vmem:[%s8749_s23 + $0xfe4] ss:$16 sps:$4 sm:$0xff]  }
 0x18f   : > { %4230 = vmatpush1.bf16.msra.mxu0 %v7447_v1  ;;  %v7519_v1 = vld [vmem:[%s8749_s23 + $0xde0] ss:$16 sps:$4 sm:$0xff]  }
 0x190   : > { %4271 = vmatpush1.bf16.msra.mxu1 %v7450_v2  ;;  %4231 = vmatprep.subr.bf16.mxu0 %v7455_v3  ;;  %v7522_v2 = vld [vmem:[%s8749_s23 + $0xfe0] ss:$16 sps:$4 sm:$0xff]   ;;  %v7531_v3 = vld [vmem:[%s8749_s23 + $0x1004] ss:$16 sps:$4 sm:$0xff]  }
 0x191   : > { %4272 = vmatprep.subr.bf16.mxu1 %v7458_v4  ;;  %v7534_v4 = vld [vmem:[%s8749_s23 + $0xc] ss:$16 sps:$4 sm:$0xff]  }
 0x193   : > { %4232 = vmatpush1.bf16.msra.mxu0 %v7453_v5  ;;  %v7529_v5 = vld [vmem:[%s8749_s23 + $0x1000] ss:$16 sps:$4 sm:$0xff]  }
 0x194   : > { %4273 = vmatpush1.bf16.msra.mxu1 %v7456_v6  ;;  %4233 = vmatprep.subr.bf16.mxu0 %v7461_v7  ;;  %v9117_v6 = vcombine.low %v9035_v51, %v9035_v51  ;;  %v9121_v7 = vcombine.low %v9038_v52, %v9038_v52  ;;  %v7535_v52 = vld [vmem:[%s8749_s23 + $0x1020] ss:$16 sps:$4 sm:$0xff]  }
 0x195   : > { %4274 = vmatprep.subr.bf16.mxu1 %v7464_v8  ;;  %v9124_v8 = vld [vmem:[%s8771_s17 + $0x40] sm:$0xff] }
 0x196   : > { %v9131_v51 = vcombine.high %v9124_v8, %v9124_v8 }
 0x197   : > { %4234 = vmatpush1.bf16.msra.mxu0 %v7459_v9  ;;  %v7532_v9 = vld [vmem:[%s8749_s23 + $0x8] ss:$16 sps:$4 sm:$0xff]  }
 0x198   : > { %4275 = vmatpush1.bf16.msra.mxu1 %v7462_v10  ;;  %4235 = vmatprep.subr.bf16.mxu0 %v7467_v11  ;;  %v7537_v10 = vld [vmem:[%s8749_s23 + $0x1024] ss:$16 sps:$4 sm:$0xff]   ;;  %v7540_v11 = vld [vmem:[%s8749_s23 + $0x2c] ss:$16 sps:$4 sm:$0xff]  }
 0x199   : > { %4276 = vmatprep.subr.bf16.mxu1 %v7470_v12  ;;  %v7538_v12 = vld [vmem:[%s8749_s23 + $0x28] ss:$16 sps:$4 sm:$0xff]  }
 0x19b   : > { %4236 = vmatpush1.bf16.msra.mxu0 %v7465_v13  ;;  %v7543_v13 = vld [vmem:[%s8749_s23 + $0x1044] ss:$16 sps:$4 sm:$0xff]  }
 0x19c   : > { %4277 = vmatpush1.bf16.msra.mxu1 %v7468_v14  ;;  %4237 = vmatprep.subr.bf16.mxu0 %v7473_v15  ;;  %v7546_v14 = vld [vmem:[%s8749_s23 + $0x4c] ss:$16 sps:$4 sm:$0xff]   ;;  %v7541_v15 = vld [vmem:[%s8749_s23 + $0x1040] ss:$16 sps:$4 sm:$0xff]  }
 0x19d   : > { %4278 = vmatprep.subr.bf16.mxu1 %v7476_v16  ;;  %v7544_v16 = vld [vmem:[%s8749_s23 + $0x48] ss:$16 sps:$4 sm:$0xff]  }
 0x19f   : > { %4238 = vmatpush1.bf16.msra.mxu0 %v7471_v19  ;;  %v7549_v19 = vld [vmem:[%s8749_s23 + $0x1064] ss:$16 sps:$4 sm:$0xff]  }
 0x1a0   : > { %4279 = vmatpush1.bf16.msra.mxu1 %v7474_v20  ;;  %4239 = vmatprep.subr.bf16.mxu0 %v7479_v21  ;;  %v7552_v20 = vld [vmem:[%s8749_s23 + $0x6c] ss:$16 sps:$4 sm:$0xff]   ;;  %v7547_v21 = vld [vmem:[%s8749_s23 + $0x1060] ss:$16 sps:$4 sm:$0xff]  }
 0x1a1   : > { %4280 = vmatprep.subr.bf16.mxu1 %v7482_v22  ;;  %v7550_v22 = vld [vmem:[%s8749_s23 + $0x68] ss:$16 sps:$4 sm:$0xff]  }
 0x1a3   : > { %4240 = vmatpush1.bf16.msra.mxu0 %v7477_v23  ;;  %v7558_v23 = vld [vmem:[%s8749_s23 + $0x8c] ss:$16 sps:$4 sm:$0xff]  }
 0x1a4   : > { %4281 = vmatpush1.bf16.msra.mxu1 %v7480_v24  ;;  %4241 = vmatprep.subr.bf16.mxu0 %v7485_v25  ;;  %v7553_v24 = vld [vmem:[%s8749_s23 + $0x1080] ss:$16 sps:$4 sm:$0xff]   ;;  %v7556_v25 = vld [vmem:[%s8749_s23 + $0x88] ss:$16 sps:$4 sm:$0xff]  }
 0x1a5   : > { %4282 = vmatprep.subr.bf16.mxu1 %v7488_v26  ;;  %v7561_v26 = vld [vmem:[%s8749_s23 + $0x10a4] ss:$16 sps:$4 sm:$0xff]  }
 0x1a7   : > { %4242 = vmatpush1.bf16.msra.mxu0 %v7483_v29  ;;  %v7564_v29 = vld [vmem:[%s8749_s23 + $0xac] ss:$16 sps:$4 sm:$0xff]  }
 0x1a8   : > { %4283 = vmatpush1.bf16.msra.mxu1 %v7486_v30  ;;  %4243 = vmatprep.subr.bf16.mxu0 %v7491_v31  ;;  %v7559_v30 = vld [vmem:[%s8749_s23 + $0x10a0] ss:$16 sps:$4 sm:$0xff]   ;;  %v7562_v31 = vld [vmem:[%s8749_s23 + $0xa8] ss:$16 sps:$4 sm:$0xff]  }
 0x1a9   : > { %4284 = vmatprep.subr.bf16.mxu1 %v7494_v32  ;;  %v7567_v32 = vld [vmem:[%s8749_s23 + $0x10c4] ss:$16 sps:$4 sm:$0xff]  }
 0x1ab   : > { %4244 = vmatpush1.bf16.msra.mxu0 %v7489_v37  ;;  %v7570_v37 = vld [vmem:[%s8749_s23 + $0xcc] ss:$16 sps:$4 sm:$0xff]  }
 0x1ac   : > { %4285 = vmatpush1.bf16.msra.mxu1 %v7492_v38  ;;  %4245 = vmatprep.subr.bf16.mxu0 %v7497_v39 }
 0x1ad   : > { %4286 = vmatprep.subr.bf16.mxu1 %v7500_v40  ;;  %v7565_v40 = vld [vmem:[%s8749_s23 + $0x10c0] ss:$16 sps:$4 sm:$0xff]  }
 0x1af   : > { %4246 = vmatpush1.bf16.msra.mxu0 %v7495_v41  ;;  %v7568_v41 = vld [vmem:[%s8749_s23 + $0xc8] ss:$16 sps:$4 sm:$0xff]  }
 0x1b0   : > { %4287 = vmatpush1.bf16.msra.mxu1 %v7498_v42  ;;  %4247 = vmatprep.subr.bf16.mxu0 %v7503_v43 }
 0x1b1   : > { %4288 = vmatprep.subr.bf16.mxu1 %v7506_v44 }
 0x1b3   : > { %4248 = vmatpush1.bf16.msra.mxu0 %v7501_v45 }
 0x1b4   : > { %4289 = vmatpush1.bf16.msra.mxu1 %v7504_v46  ;;  %4249 = vmatprep.subr.bf16.mxu0 %v7509_v53 }
 0x1b5   : > { %4290 = vmatprep.subr.bf16.mxu1 %v7512_v54 }
 0x1b7   : > { %4250 = vmatpush1.bf16.msra.mxu0 %v7507_v55 }
 0x1b8   : > { %4291 = vmatpush1.bf16.msra.mxu1 %v7510_v56  ;;  %4251 = vmatprep.subr.bf16.mxu0 %v7515_v57  ;;  %v7573_v56 = vld [vmem:[%s8749_s23 + $0x10e4] ss:$16 sps:$4 sm:$0xff]   ;;  %v7576_v57 = vld [vmem:[%s8749_s23 + $0xec] ss:$16 sps:$4 sm:$0xff]  }
 0x1b9   : > { %4292 = vmatprep.subr.bf16.mxu1 %v7518_v59  ;;  %v7571_v59 = vld [vmem:[%s8749_s23 + $0x10e0] ss:$16 sps:$4 sm:$0xff]  }
 0x1bb   : > { %4252 = vmatpush1.bf16.msra.mxu0 %v7513_v60  ;;  %v7574_v60 = vld [vmem:[%s8749_s23 + $0xe8] ss:$16 sps:$4 sm:$0xff]  }
 0x1bc   : > { %4293 = vmatpush1.bf16.msra.mxu1 %v7516_v61  ;;  %4253 = vmatprep.subr.bf16.mxu0 %v7521_v63  ;;  %v7579_v61 = vld [vmem:[%s8749_s23 + $0x1104] ss:$16 sps:$4 sm:$0xff]   ;;  %v7582_v63 = vld [vmem:[%s8749_s23 + $0x10c] ss:$16 sps:$4 sm:$0xff]  }
 0x1bd   : > { %4294 = vmatprep.subr.bf16.mxu1 %v7524_v0  ;;  %v7577_v0 = vld [vmem:[%s8749_s23 + $0x1100] ss:$16 sps:$4 sm:$0xff]  }
 0x1bf   : > { %4254 = vmatpush1.bf16.msra.mxu0 %v7519_v1  ;;  %v7580_v1 = vld [vmem:[%s8749_s23 + $0x108] ss:$16 sps:$4 sm:$0xff]  }
 0x1c0   : > { %4295 = vmatpush1.bf16.msra.mxu1 %v7522_v2  ;;  %4305 = vmatprep.subr.bf16.mxu0 %v7531_v3  ;;  %v7585_v2 = vld [vmem:[%s8749_s23 + $0x1124] ss:$16 sps:$4 sm:$0xff]   ;;  %v7588_v3 = vld [vmem:[%s8749_s23 + $0x12c] ss:$16 sps:$4 sm:$0xff]  }
 0x1c1   : > { %4346 = vmatprep.subr.bf16.mxu1 %v7534_v4  ;;  %v7583_v4 = vld [vmem:[%s8749_s23 + $0x1120] ss:$16 sps:$4 sm:$0xff]  }
 0x1c2   : > { %4256 = vmatmul.mubr.bf16.vlgmr.msra.gmra.mrb[12].mxu0 %v9117_v6 }
 0x1c3   : > { %4297 = vmatmul.mubr.bf16.vlgmr.msra.gmra.mrb[12].mxu1 %v9121_v7  ;;  %4306 = vmatpush1.bf16.msra.mxu0 %v7529_v5  ;;  %v7586_v5 = vld [vmem:[%s8749_s23 + $0x128] ss:$16 sps:$4 sm:$0xff]  }
 0x1c4   : > { %4347 = vmatpush1.bf16.msra.mxu1 %v7532_v9  ;;  %4307 = vmatprep.subr.bf16.mxu0 %v7537_v10  ;;  %v7591_v9 = vld [vmem:[%s8749_s23 + $0x1144] ss:$16 sps:$4 sm:$0xff]   ;;  %v7594_v10 = vld [vmem:[%s8749_s23 + $0x14c] ss:$16 sps:$4 sm:$0xff]  }
 0x1c5   : > { %4348 = vmatprep.subr.bf16.mxu1 %v7540_v11  ;;  %4337 = vmatprep.mubr.bf16.mxu0 %v9131_v51  ;;  %v7589_v11 = vld [vmem:[%s8749_s23 + $0x1140] ss:$16 sps:$4 sm:$0xff]  }
 0x1c6   : > { %4378 = vmatprep.mubr.bf16.mxu1 %v8821_v58  ;;  %v7555_v58 = vld [vmem:[%s8749_s23 + $0x1084] ss:$16 sps:$4 sm:$0xff]  }
 0x1c7   : > { %4308 = vmatpush1.bf16.msra.mxu0 %v7535_v52  ;;  %v7592_v52 = vld [vmem:[%s8749_s23 + $0x148] ss:$16 sps:$4 sm:$0xff]  }
 0x1c8   : > { %4349 = vmatpush1.bf16.msra.mxu1 %v7538_v12  ;;  %4309 = vmatprep.subr.bf16.mxu0 %v7543_v13  ;;  %v7597_v12 = vld [vmem:[%s8749_s23 + $0x1164] ss:$16 sps:$4 sm:$0xff]   ;;  %v7600_v13 = vld [vmem:[%s8749_s23 + $0x16c] ss:$16 sps:$4 sm:$0xff]  }
 0x1c9   : > { %4350 = vmatprep.subr.bf16.mxu1 %v7546_v14  ;;  %v7595_v14 = vld [vmem:[%s8749_s23 + $0x1160] ss:$16 sps:$4 sm:$0xff]  }
 0x1cb   : > { %4310 = vmatpush1.bf16.msra.mxu0 %v7541_v15  ;;  %v7598_v15 = vld [vmem:[%s8749_s23 + $0x168] ss:$16 sps:$4 sm:$0xff]  }
 0x1cc   : > { %4351 = vmatpush1.bf16.msra.mxu1 %v7544_v16  ;;  %4311 = vmatprep.subr.bf16.mxu0 %v7549_v19  ;;  %v7603_v16 = vld [vmem:[%s8749_s23 + $0x1184] ss:$16 sps:$4 sm:$0xff]   ;;  %v7606_v19 = vld [vmem:[%s8749_s23 + $0x18c] ss:$16 sps:$4 sm:$0xff]  }
 0x1cd   : > { %4352 = vmatprep.subr.bf16.mxu1 %v7552_v20  ;;  %v7601_v20 = vld [vmem:[%s8749_s23 + $0x1180] ss:$16 sps:$4 sm:$0xff]  }
 0x1cf   : > { %4312 = vmatpush1.bf16.msra.mxu0 %v7547_v21  ;;  %v7604_v21 = vld [vmem:[%s8749_s23 + $0x188] ss:$16 sps:$4 sm:$0xff]  }
 0x1d0   : > { %4353 = vmatpush1.bf16.msra.mxu1 %v7550_v22  ;;  %4313 = vmatprep.subr.bf16.mxu0 %v7555_v58  ;;  %v7609_v22 = vld [vmem:[%s8749_s23 + $0x11a4] ss:$16 sps:$4 sm:$0xff]   ;;  %v7612_v58 = vld [vmem:[%s8749_s23 + $0x1ac] ss:$16 sps:$4 sm:$0xff]  }
 0x1d1   : > { %4354 = vmatprep.subr.bf16.mxu1 %v7558_v23  ;;  %v7607_v23 = vld [vmem:[%s8749_s23 + $0x11a0] ss:$16 sps:$4 sm:$0xff]  }
 0x1d3   : > { %4314 = vmatpush1.bf16.msra.mxu0 %v7553_v24  ;;  %v7610_v24 = vld [vmem:[%s8749_s23 + $0x1a8] ss:$16 sps:$4 sm:$0xff]  }
 0x1d4   : > { %4355 = vmatpush1.bf16.msra.mxu1 %v7556_v25  ;;  %4315 = vmatprep.subr.bf16.mxu0 %v7561_v26  ;;  %v7615_v25 = vld [vmem:[%s8749_s23 + $0x11c4] ss:$16 sps:$4 sm:$0xff]   ;;  %v7618_v26 = vld [vmem:[%s8749_s23 + $0x1cc] ss:$16 sps:$4 sm:$0xff]  }
 0x1d5   : > { %4356 = vmatprep.subr.bf16.mxu1 %v7564_v29  ;;  %v4011_v38 = vpop.f32.mrb[0].mxu0  ;;  %v7613_v29 = vld [vmem:[%s8749_s23 + $0x11c0] ss:$16 sps:$4 sm:$0xff]  }
 0x1d6   : > { %v4052_v39 = vpop.f32.mrb[0].mxu1  ;;  %v4013_v43 = vpop.f32.mrb[1].mxu0 }
 0x1d7   : > { %v9159_v42 = vadd.f32 %v4052_v39, %v4011_v38  ;;  %v4054_v44 = vpop.f32.mrb[1].mxu1  ;;  %v4015_v46 = vpop.f32.mrb[2].mxu0  ;;  %4316 = vmatpush1.bf16.msra.mxu0 %v7559_v30  ;;  %v7616_v30 = vld [vmem:[%s8749_s23 + $0x1c8] ss:$16 sps:$4 sm:$0xff]   ;;  %v7629_v39 = vld [vmem:[%s8749_s23 + $0x20c] ss:$16 sps:$4 sm:$0xff]  }
 0x1d8   : > { %v9161_v45 = vadd.f32 %v4054_v44, %v4013_v43  ;;  %v4056_v53 = vpop.f32.mrb[2].mxu1  ;;  %4357 = vmatpush1.bf16.msra.mxu1 %v7562_v31  ;;  %v4016_v54 = vpop.f32.mrb[3].mxu0  ;;  %4317 = vmatprep.subr.bf16.mxu0 %v7567_v32  ;;  %v7621_v31 = vld [vmem:[%s8749_s23 + $0x11e4] ss:$16 sps:$4 sm:$0xff]   ;;  %v7624_v32 = vld [vmem:[%s8749_s23 + $0x1ec] ss:$16 sps:$4 sm:$0xff]   ;;  %v9205_v44 = vcombine.low %v9124_v8, %v9124_v8 }
 0x1d9   : > { %v4057_v55 = vpop.f32.mrb[3].mxu1  ;;  %4358 = vmatprep.subr.bf16.mxu1 %v7570_v37  ;;  %v7619_v37 = vld [vmem:[%s8749_s23 + $0x11e0] ss:$16 sps:$4 sm:$0xff]   ;;  %v7622_v38 = vld [vmem:[%s8749_s23 + $0x1e8] ss:$16 sps:$4 sm:$0xff]  }
 0x1da   : > { %v7630_v43 = vld [vmem:[%s8749_s23 + $0x408] ss:$16 sps:$4 sm:$0xff]   ;;  %v7635_v46 = vld [vmem:[%s8749_s23 + $0x22c] ss:$16 sps:$4 sm:$0xff]  }
 0x1db   : > { %4318 = vmatpush1.bf16.msra.mxu0 %v7565_v40  ;;  %v7632_v40 = vld [vmem:[%s8749_s23 + $0x40c] ss:$16 sps:$4 sm:$0xff]   ;;  %v7633_v54 = vld [vmem:[%s8749_s23 + $0x228] ss:$16 sps:$4 sm:$0xff]  }
 0x1dc   : > { %4359 = vmatpush1.bf16.msra.mxu1 %v7568_v41  ;;  %4319 = vmatprep.subr.bf16.mxu0 %v7573_v56  ;;  %v7627_v41 = vld [vmem:[%s8749_s23 + $0x208] ss:$16 sps:$4 sm:$0xff]   ;;  %v7638_v53 = vld [vmem:[%s8749_s23 + $0x42c] ss:$16 sps:$4 sm:$0xff]  }
 0x1dd   : > { %4360 = vmatprep.subr.bf16.mxu1 %v7576_v57  ;;  %v7636_v8 = vld [vmem:[%s8749_s23 + $0x428] ss:$16 sps:$4 sm:$0xff]   ;;  %v7641_v55 = vld [vmem:[%s8749_s23 + $0x24c] ss:$16 sps:$4 sm:$0xff]  }
 0x1de   : > { %v7644_v56 = vld [vmem:[%s8749_s23 + $0x44c] ss:$16 sps:$4 sm:$0xff]   ;;  %v7642_v57 = vld [vmem:[%s8749_s23 + $0x448] ss:$16 sps:$4 sm:$0xff]  }
 0x1df   : > { %4320 = vmatpush1.bf16.msra.mxu0 %v7571_v59  ;;  %v7647_v59 = vld [vmem:[%s8749_s23 + $0x26c] ss:$16 sps:$4 sm:$0xff]  }
 0x1e0   : > { %4361 = vmatpush1.bf16.msra.mxu1 %v7574_v60  ;;  %4321 = vmatprep.subr.bf16.mxu0 %v7579_v61  ;;  %v7650_v60 = vld [vmem:[%s8749_s23 + $0x46c] ss:$16 sps:$4 sm:$0xff]   ;;  %v7648_v61 = vld [vmem:[%s8749_s23 + $0x468] ss:$16 sps:$4 sm:$0xff]  }
 0x1e1   : > { %4362 = vmatprep.subr.bf16.mxu1 %v7582_v63  ;;  %v7656_v63 = vld [vmem:[%s8749_s23 + $0x48c] ss:$16 sps:$4 sm:$0xff]  }
 0x1e3   : > { %4322 = vmatpush1.bf16.msra.mxu0 %v7577_v0  ;;  %v7651_v0 = vld [vmem:[%s8749_s23 + $0x288] ss:$16 sps:$4 sm:$0xff]  }
 0x1e4   : > { %4363 = vmatpush1.bf16.msra.mxu1 %v7580_v1  ;;  %4323 = vmatprep.subr.bf16.mxu0 %v7585_v2  ;;  %v7654_v1 = vld [vmem:[%s8749_s23 + $0x488] ss:$16 sps:$4 sm:$0xff]   ;;  %v7659_v2 = vld [vmem:[%s8749_s23 + $0x2ac] ss:$16 sps:$4 sm:$0xff]  }
 0x1e5   : > { %4364 = vmatprep.subr.bf16.mxu1 %v7588_v3  ;;  %v7662_v3 = vld [vmem:[%s8749_s23 + $0x4ac] ss:$16 sps:$4 sm:$0xff]  }
 0x1e7   : > { %4324 = vmatpush1.bf16.msra.mxu0 %v7583_v4  ;;  %v7657_v4 = vld [vmem:[%s8749_s23 + $0x2a8] ss:$16 sps:$4 sm:$0xff]  }
 0x1e8   : > { %4365 = vmatpush1.bf16.msra.mxu1 %v7586_v5  ;;  %4325 = vmatprep.subr.bf16.mxu0 %v7591_v9  ;;  %v7660_v5 = vld [vmem:[%s8749_s23 + $0x4a8] ss:$16 sps:$4 sm:$0xff]   ;;  %v7665_v9 = vld [vmem:[%s8749_s23 + $0x2cc] ss:$16 sps:$4 sm:$0xff]  }
 0x1e9   : > { %4366 = vmatprep.subr.bf16.mxu1 %v7594_v10  ;;  %v7668_v10 = vld [vmem:[%s8749_s23 + $0x4cc] ss:$16 sps:$4 sm:$0xff]  }
 0x1eb   : > { %4326 = vmatpush1.bf16.msra.mxu0 %v7589_v11 }
 0x1ec   : > { %4367 = vmatpush1.bf16.msra.mxu1 %v7592_v52  ;;  %4327 = vmatprep.subr.bf16.mxu0 %v7597_v12  ;;  %v7663_v12 = vld [vmem:[%s8749_s23 + $0x2c8] ss:$16 sps:$4 sm:$0xff]  }
 0x1ed   : > { %4368 = vmatprep.subr.bf16.mxu1 %v7600_v13  ;;  %v7666_v13 = vld [vmem:[%s8749_s23 + $0x4c8] ss:$16 sps:$4 sm:$0xff]  }
 0x1ef   : > { %4328 = vmatpush1.bf16.msra.mxu0 %v7595_v14 }
 0x1f0   : > { %4369 = vmatpush1.bf16.msra.mxu1 %v7598_v15  ;;  %4329 = vmatprep.subr.bf16.mxu0 %v7603_v16 }
 0x1f1   : > { %4370 = vmatprep.subr.bf16.mxu1 %v7606_v19 }
 0x1f3   : > { %4330 = vmatpush1.bf16.msra.mxu0 %v7601_v20 }
 0x1f4   : > { %4371 = vmatpush1.bf16.msra.mxu1 %v7604_v21  ;;  %4331 = vmatprep.subr.bf16.mxu0 %v7609_v22 }
 0x1f5   : > { %4372 = vmatprep.subr.bf16.mxu1 %v7612_v58 }
 0x1f7   : > { %4332 = vmatpush1.bf16.msra.mxu0 %v7607_v23 }
 0x1f8   : > { %4373 = vmatpush1.bf16.msra.mxu1 %v7610_v24  ;;  %4333 = vmatprep.subr.bf16.mxu0 %v7615_v25  ;;  %v7674_v24 = vld [vmem:[%s8749_s23 + $0x4ec] ss:$16 sps:$4 sm:$0xff]  }
 0x1f9   : > { %4374 = vmatprep.subr.bf16.mxu1 %v7618_v26  ;;  %v7672_v26 = vld [vmem:[%s8749_s23 + $0x4e8] ss:$16 sps:$4 sm:$0xff]  }
 0x1fb   : > { %4334 = vmatpush1.bf16.msra.mxu0 %v7613_v29  ;;  %v7677_v29 = vld [vmem:[%s8749_s23 + $0x30c] ss:$16 sps:$4 sm:$0xff]  }
 0x1fc   : > { %4375 = vmatpush1.bf16.msra.mxu1 %v7616_v30  ;;  %4335 = vmatprep.subr.bf16.mxu0 %v7621_v31  ;;  %v7680_v30 = vld [vmem:[%s8749_s23 + $0x50c] ss:$16 sps:$4 sm:$0xff]   ;;  %v7675_v31 = vld [vmem:[%s8749_s23 + $0x308] ss:$16 sps:$4 sm:$0xff]  }
 0x1fd   : > { %4376 = vmatprep.subr.bf16.mxu1 %v7624_v32  ;;  %v7678_v32 = vld [vmem:[%s8749_s23 + $0x508] ss:$16 sps:$4 sm:$0xff]  }
 0x1ff   : > { %4336 = vmatpush1.bf16.msra.mxu0 %v7619_v37  ;;  %v7683_v37 = vld [vmem:[%s8749_s23 + $0x32c] ss:$16 sps:$4 sm:$0xff]  }
 0x200   : > { %4377 = vmatpush1.bf16.msra.mxu1 %v7622_v38  ;;  %4387 = vmatprep.subr.bf16.mxu0 %v7629_v39  ;;  %v7686_v38 = vld [vmem:[%s8749_s23 + $0x52c] ss:$16 sps:$4 sm:$0xff]   ;;  %v7681_v39 = vld [vmem:[%s8749_s23 + $0x328] ss:$16 sps:$4 sm:$0xff]  }
 0x201   : > { %4428 = vmatprep.subr.bf16.mxu1 %v7632_v40  ;;  %v7684_v40 = vld [vmem:[%s8749_s23 + $0x528] ss:$16 sps:$4 sm:$0xff]  }
 0x202   : > { %4338 = vmatmul.mubr.bf16.vlgmr.msra.gmra.mrb[16].mxu0 %v9205_v44 }
 0x203   : > { %4379 = vmatmul.mubr.bf16.vlgmr.msra.gmra.mrb[16].mxu1 %v8848_v17  ;;  %4388 = vmatpush1.bf16.msra.mxu0 %v7627_v41  ;;  %v7639_v17 = vld [vmem:[%s8749_s23 + $0x248] ss:$16 sps:$4 sm:$0xff]   ;;  %v7689_v41 = vld [vmem:[%s8749_s23 + $0x34c] ss:$16 sps:$4 sm:$0xff]  }
 0x204   : > { %4429 = vmatpush1.bf16.msra.mxu1 %v7630_v43  ;;  %4389 = vmatprep.subr.bf16.mxu0 %v7635_v46  ;;  %v7692_v43 = vld [vmem:[%s8749_s23 + $0x54c] ss:$16 sps:$4 sm:$0xff]   ;;  %v7687_v46 = vld [vmem:[%s8749_s23 + $0x348] ss:$16 sps:$4 sm:$0xff]  }
 0x205   : > { %4430 = vmatprep.subr.bf16.mxu1 %v7638_v53  ;;  %4419 = vmatprep.mubr.bf16.mxu0 %v8826_v62  ;;  %v7645_v62 = vld [vmem:[%s8749_s23 + $0x268] ss:$16 sps:$4 sm:$0xff]  }
 0x206   : > { %4460 = vmatprep.mubr.bf16.mxu1 %v8888_v47  ;;  %v7653_v47 = vld [vmem:[%s8749_s23 + $0x28c] ss:$16 sps:$4 sm:$0xff]   ;;  %v7690_v53 = vld [vmem:[%s8749_s23 + $0x548] ss:$16 sps:$4 sm:$0xff]  }
 0x207   : > { %4390 = vmatpush1.bf16.msra.mxu0 %v7633_v54  ;;  %v7695_v54 = vld [vmem:[%s8749_s23 + $0x36c] ss:$16 sps:$4 sm:$0xff]  }
 0x208   : > { %4431 = vmatpush1.bf16.msra.mxu1 %v7636_v8  ;;  %4391 = vmatprep.subr.bf16.mxu0 %v7641_v55  ;;  %v7698_v8 = vld [vmem:[%s8749_s23 + $0x56c] ss:$16 sps:$4 sm:$0xff]   ;;  %v7693_v55 = vld [vmem:[%s8749_s23 + $0x368] ss:$16 sps:$4 sm:$0xff]  }
 0x209   : > { %4432 = vmatprep.subr.bf16.mxu1 %v7644_v56  ;;  %v7696_v56 = vld [vmem:[%s8749_s23 + $0x568] ss:$16 sps:$4 sm:$0xff]  }
 0x20b   : > { %4392 = vmatpush1.bf16.msra.mxu0 %v7639_v17  ;;  %v7701_v17 = vld [vmem:[%s8749_s23 + $0x38c] ss:$16 sps:$4 sm:$0xff]  }
 0x20c   : > { %4433 = vmatpush1.bf16.msra.mxu1 %v7642_v57  ;;  %4393 = vmatprep.subr.bf16.mxu0 %v7647_v59  ;;  %v7704_v57 = vld [vmem:[%s8749_s23 + $0x58c] ss:$16 sps:$4 sm:$0xff]   ;;  %v7699_v59 = vld [vmem:[%s8749_s23 + $0x388] ss:$16 sps:$4 sm:$0xff]  }
 0x20d   : > { %4434 = vmatprep.subr.bf16.mxu1 %v7650_v60  ;;  %v7702_v60 = vld [vmem:[%s8749_s23 + $0x588] ss:$16 sps:$4 sm:$0xff]  }
 0x20f   : > { %4394 = vmatpush1.bf16.msra.mxu0 %v7645_v62  ;;  %v7707_v62 = vld [vmem:[%s8749_s23 + $0x3ac] ss:$16 sps:$4 sm:$0xff]  }
 0x210   : > { %4435 = vmatpush1.bf16.msra.mxu1 %v7648_v61  ;;  %4395 = vmatprep.subr.bf16.mxu0 %v7653_v47  ;;  %v7710_v61 = vld [vmem:[%s8749_s23 + $0x5ac] ss:$16 sps:$4 sm:$0xff]   ;;  %v7705_v47 = vld [vmem:[%s8749_s23 + $0x3a8] ss:$16 sps:$4 sm:$0xff]  }
 0x211   : > { %4436 = vmatprep.subr.bf16.mxu1 %v7656_v63  ;;  %v7708_v63 = vld [vmem:[%s8749_s23 + $0x5a8] ss:$16 sps:$4 sm:$0xff]  }
 0x213   : > { %4396 = vmatpush1.bf16.msra.mxu0 %v7651_v0  ;;  %v7713_v0 = vld [vmem:[%s8749_s23 + $0x3cc] ss:$16 sps:$4 sm:$0xff]  }
 0x214   : > { %4437 = vmatpush1.bf16.msra.mxu1 %v7654_v1  ;;  %4397 = vmatprep.subr.bf16.mxu0 %v7659_v2  ;;  %v7716_v1 = vld [vmem:[%s8749_s23 + $0x5cc] ss:$16 sps:$4 sm:$0xff]   ;;  %v7711_v2 = vld [vmem:[%s8749_s23 + $0x3c8] ss:$16 sps:$4 sm:$0xff]  }
 0x215   : > { %4438 = vmatprep.subr.bf16.mxu1 %v7662_v3  ;;  %v4093_v11 = vpop.f32.mrb[4].mxu0  ;;  %v7714_v3 = vld [vmem:[%s8749_s23 + $0x5c8] ss:$16 sps:$4 sm:$0xff]  }
 0x216   : > { %v4134_v52 = vpop.f32.mrb[4].mxu1  ;;  %v4094_v14 = vadd.f32 %v4093_v11, %v9159_v42  ;;  %v4095_v15 = vpop.f32.mrb[5].mxu0  ;;  %v7671_v42 = vld [vmem:[%s8749_s23 + $0x2ec] ss:$16 sps:$4 sm:$0xff]  }
 0x217   : > { %v4136_v16 = vpop.f32.mrb[5].mxu1  ;;  %v4096_v19 = vadd.f32 %v4095_v15, %v9161_v45  ;;  %v4097_v20 = vpop.f32.mrb[6].mxu0  ;;  %4398 = vmatpush1.bf16.msra.mxu0 %v7657_v4  ;;  %v7669_v45 = vld [vmem:[%s8749_s23 + $0x2e8] ss:$16 sps:$4 sm:$0xff]   ;;  %v7719_v4 = vld [vmem:[%s8749_s23 + $0x3ec] ss:$16 sps:$4 sm:$0xff]  }
 0x218   : > { %v4138_v21 = vpop.f32.mrb[6].mxu1  ;;  %4439 = vmatpush1.bf16.msra.mxu1 %v7660_v5  ;;  %v9237_v22 = vadd.f32 %v4134_v52, %v4094_v14  ;;  %v4098_v58 = vpop.f32.mrb[7].mxu0  ;;  %4399 = vmatprep.subr.bf16.mxu0 %v7665_v9  ;;  %v7722_v5 = vld [vmem:[%s8749_s23 + $0x5ec] ss:$16 sps:$4 sm:$0xff]   ;;  %v7717_v9 = vld [vmem:[%s8749_s23 + $0x3e8] ss:$16 sps:$4 sm:$0xff]  }
 0x219   : > { %v4139_v23 = vpop.f32.mrb[7].mxu1  ;;  %4440 = vmatprep.subr.bf16.mxu1 %v7668_v10  ;;  %v9241_v25 = vadd.f32 %v4136_v16, %v4096_v19  ;;  %v7720_v10 = vld [vmem:[%s8749_s23 + $0x5e8] ss:$16 sps:$4 sm:$0xff]   ;;  %v7725_v11 = vld [vmem:[%s8749_s23 + $0x60c] ss:$16 sps:$4 sm:$0xff]  }
 0x21a   : > { %v7728_v52 = vld [vmem:[%s8749_s23 + $0x80c] ss:$16 sps:$4 sm:$0xff]   ;;  %v7729_v16 = vld [vmem:[%s8749_s23 + $0x628] ss:$16 sps:$4 sm:$0xff]  }
 0x21b   : > { %4400 = vmatpush1.bf16.msra.mxu0 %v7663_v12  ;;  %v7723_v12 = vld [vmem:[%s8749_s23 + $0x608] ss:$16 sps:$4 sm:$0xff]   ;;  %v7731_v14 = vld [vmem:[%s8749_s23 + $0x62c] ss:$16 sps:$4 sm:$0xff]  }
 0x21c   : > { %4441 = vmatpush1.bf16.msra.mxu1 %v7666_v13  ;;  %4401 = vmatprep.subr.bf16.mxu0 %v7671_v42  ;;  %v7726_v13 = vld [vmem:[%s8749_s23 + $0x808] ss:$16 sps:$4 sm:$0xff]   ;;  %v7734_v15 = vld [vmem:[%s8749_s23 + $0x82c] ss:$16 sps:$4 sm:$0xff]  }
 0x21d   : > { %4442 = vmatprep.subr.bf16.mxu1 %v7674_v24  ;;  %v7732_v19 = vld [vmem:[%s8749_s23 + $0x828] ss:$16 sps:$4 sm:$0xff]   ;;  %v7737_v20 = vld [vmem:[%s8749_s23 + $0x64c] ss:$16 sps:$4 sm:$0xff]  }
 0x21e   : > { %v7740_v21 = vld [vmem:[%s8749_s23 + $0x84c] ss:$16 sps:$4 sm:$0xff]   ;;  %v7741_v42 = vld [vmem:[%s8749_s23 + $0x668] ss:$16 sps:$4 sm:$0xff]  }
 0x21f   : > { %4402 = vmatpush1.bf16.msra.mxu0 %v7669_v45  ;;  %v7743_v58 = vld [vmem:[%s8749_s23 + $0x66c] ss:$16 sps:$4 sm:$0xff]   ;;  %v7747_v45 = vld [vmem:[%s8749_s23 + $0x688] ss:$16 sps:$4 sm:$0xff]  }
 0x220   : > { %4443 = vmatpush1.bf16.msra.mxu1 %v7672_v26  ;;  %4403 = vmatprep.subr.bf16.mxu0 %v7677_v29  ;;  %v7746_v23 = vld [vmem:[%s8749_s23 + $0x86c] ss:$16 sps:$4 sm:$0xff]   ;;  %v7750_v26 = vld [vmem:[%s8749_s23 + $0x888] ss:$16 sps:$4 sm:$0xff]  }
 0x221   : > { %4444 = vmatprep.subr.bf16.mxu1 %v7680_v30  ;;  %v7752_v24 = vld [vmem:[%s8749_s23 + $0x88c] ss:$16 sps:$4 sm:$0xff]  }
 0x222   : > { %v7755_v29 = vld [vmem:[%s8749_s23 + $0x6ac] ss:$16 sps:$4 sm:$0xff]  }
 0x223   : > { %4404 = vmatpush1.bf16.msra.mxu0 %v7675_v31  ;;  %v7758_v30 = vld [vmem:[%s8749_s23 + $0x8ac] ss:$16 sps:$4 sm:$0xff]   ;;  %v7753_v31 = vld [vmem:[%s8749_s23 + $0x6a8] ss:$16 sps:$4 sm:$0xff]  }
 0x224   : > { %4445 = vmatpush1.bf16.msra.mxu1 %v7678_v32  ;;  %4405 = vmatprep.subr.bf16.mxu0 %v7683_v37  ;;  %v7756_v32 = vld [vmem:[%s8749_s23 + $0x8a8] ss:$16 sps:$4 sm:$0xff]   ;;  %v7761_v37 = vld [vmem:[%s8749_s23 + $0x6cc] ss:$16 sps:$4 sm:$0xff]  }
 0x225   : > { %4446 = vmatprep.subr.bf16.mxu1 %v7686_v38  ;;  %v7764_v38 = vld [vmem:[%s8749_s23 + $0x8cc] ss:$16 sps:$4 sm:$0xff]  }
 0x227   : > { %4406 = vmatpush1.bf16.msra.mxu0 %v7681_v39 }
 0x228   : > { %4447 = vmatpush1.bf16.msra.mxu1 %v7684_v40  ;;  %4407 = vmatprep.subr.bf16.mxu0 %v7689_v41 }
 0x229   : > { %4448 = vmatprep.subr.bf16.mxu1 %v7692_v43 }
 0x22b   : > { %4408 = vmatpush1.bf16.msra.mxu0 %v7687_v46 }
 0x22c   : > { %4449 = vmatpush1.bf16.msra.mxu1 %v7690_v53  ;;  %4409 = vmatprep.subr.bf16.mxu0 %v7695_v54 }
 0x22d   : > { %4450 = vmatprep.subr.bf16.mxu1 %v7698_v8 }
 0x22f   : > { %4410 = vmatpush1.bf16.msra.mxu0 %v7693_v55  ;;  %v7759_v55 = vld [vmem:[%s8749_s23 + $0x6c8] ss:$16 sps:$4 sm:$0xff]  }
 0x230   : > { %4451 = vmatpush1.bf16.msra.mxu1 %v7696_v56  ;;  %4411 = vmatprep.subr.bf16.mxu0 %v7701_v17  ;;  %v7762_v56 = vld [vmem:[%s8749_s23 + $0x8c8] ss:$16 sps:$4 sm:$0xff]  }
 0x231   : > { %4452 = vmatprep.subr.bf16.mxu1 %v7704_v57 }
 0x233   : > { %4412 = vmatpush1.bf16.msra.mxu0 %v7699_v59 }
 0x234   : > { %4453 = vmatpush1.bf16.msra.mxu1 %v7702_v60  ;;  %4413 = vmatprep.subr.bf16.mxu0 %v7707_v62  ;;  %v7765_v62 = vld [vmem:[%s8749_s23 + $0x6e8] ss:$16 sps:$4 sm:$0xff]  }
 0x235   : > { %4454 = vmatprep.subr.bf16.mxu1 %v7710_v61  ;;  %v7768_v61 = vld [vmem:[%s8749_s23 + $0x8e8] ss:$16 sps:$4 sm:$0xff]  }
 0x237   : > { %4414 = vmatpush1.bf16.msra.mxu0 %v7705_v47  ;;  %v7773_v47 = vld [vmem:[%s8749_s23 + $0x70c] ss:$16 sps:$4 sm:$0xff]  }
 0x238   : > { %4455 = vmatpush1.bf16.msra.mxu1 %v7708_v63  ;;  %4415 = vmatprep.subr.bf16.mxu0 %v7713_v0  ;;  %v7776_v63 = vld [vmem:[%s8749_s23 + $0x90c] ss:$16 sps:$4 sm:$0xff]   ;;  %v7771_v0 = vld [vmem:[%s8749_s23 + $0x708] ss:$16 sps:$4 sm:$0xff]  }
 0x239   : > { %4456 = vmatprep.subr.bf16.mxu1 %v7716_v1  ;;  %v7774_v1 = vld [vmem:[%s8749_s23 + $0x908] ss:$16 sps:$4 sm:$0xff]  }
 0x23b   : > { %4416 = vmatpush1.bf16.msra.mxu0 %v7711_v2  ;;  %v7779_v2 = vld [vmem:[%s8749_s23 + $0x72c] ss:$16 sps:$4 sm:$0xff]  }
 0x23c   : > { %4457 = vmatpush1.bf16.msra.mxu1 %v7714_v3  ;;  %4417 = vmatprep.subr.bf16.mxu0 %v7719_v4  ;;  %v7782_v3 = vld [vmem:[%s8749_s23 + $0x92c] ss:$16 sps:$4 sm:$0xff]   ;;  %v7777_v4 = vld [vmem:[%s8749_s23 + $0x728] ss:$16 sps:$4 sm:$0xff]  }
 0x23d   : > { %4458 = vmatprep.subr.bf16.mxu1 %v7722_v5  ;;  %v7780_v5 = vld [vmem:[%s8749_s23 + $0x928] ss:$16 sps:$4 sm:$0xff]  }
 0x23f   : > { %4418 = vmatpush1.bf16.msra.mxu0 %v7717_v9  ;;  %v7785_v9 = vld [vmem:[%s8749_s23 + $0x74c] ss:$16 sps:$4 sm:$0xff]  }
 0x240   : > { %4459 = vmatpush1.bf16.msra.mxu1 %v7720_v10  ;;  %4469 = vmatprep.subr.bf16.mxu0 %v7725_v11  ;;  %v7788_v10 = vld [vmem:[%s8749_s23 + $0x94c] ss:$16 sps:$4 sm:$0xff]   ;;  %v7783_v11 = vld [vmem:[%s8749_s23 + $0x748] ss:$16 sps:$4 sm:$0xff]  }
 0x241   : > { %4510 = vmatprep.subr.bf16.mxu1 %v7728_v52  ;;  %v7786_v52 = vld [vmem:[%s8749_s23 + $0x948] ss:$16 sps:$4 sm:$0xff]  }
 0x242   : > { %4420 = vmatmul.mubr.bf16.vlgmr.msra.gmra.mrb[20].mxu0 %v8850_v18  ;;  %v7735_v18 = vld [vmem:[%s8749_s23 + $0x648] ss:$16 sps:$4 sm:$0xff]  }
 0x243   : > { %4461 = vmatmul.mubr.bf16.vlgmr.msra.gmra.mrb[20].mxu1 %v8936_v27  ;;  %4470 = vmatpush1.bf16.msra.mxu0 %v7723_v12  ;;  %v7738_v27 = vld [vmem:[%s8749_s23 + $0x848] ss:$16 sps:$4 sm:$0xff]   ;;  %v7791_v12 = vld [vmem:[%s8749_s23 + $0x76c] ss:$16 sps:$4 sm:$0xff]  }
 0x244   : > { %4511 = vmatpush1.bf16.msra.mxu1 %v7726_v13  ;;  %4471 = vmatprep.subr.bf16.mxu0 %v7731_v14  ;;  %v7794_v13 = vld [vmem:[%s8749_s23 + $0x96c] ss:$16 sps:$4 sm:$0xff]   ;;  %v7789_v14 = vld [vmem:[%s8749_s23 + $0x768] ss:$16 sps:$4 sm:$0xff]  }
 0x245   : > { %4512 = vmatprep.subr.bf16.mxu1 %v7734_v15  ;;  %4501 = vmatprep.mubr.bf16.mxu0 %v8892_v48  ;;  %v7744_v48 = vld [vmem:[%s8749_s23 + $0x868] ss:$16 sps:$4 sm:$0xff]  }
 0x246   : > { %4542 = vmatprep.mubr.bf16.mxu1 %v8954_v35  ;;  %v7749_v35 = vld [vmem:[%s8749_s23 + $0x68c] ss:$16 sps:$4 sm:$0xff]   ;;  %v7792_v15 = vld [vmem:[%s8749_s23 + $0x968] ss:$16 sps:$4 sm:$0xff]  }
 0x247   : > { %4472 = vmatpush1.bf16.msra.mxu0 %v7729_v16  ;;  %v7797_v16 = vld [vmem:[%s8749_s23 + $0x78c] ss:$16 sps:$4 sm:$0xff]  }
 0x248   : > { %4513 = vmatpush1.bf16.msra.mxu1 %v7732_v19  ;;  %4473 = vmatprep.subr.bf16.mxu0 %v7737_v20  ;;  %v7800_v19 = vld [vmem:[%s8749_s23 + $0x98c] ss:$16 sps:$4 sm:$0xff]   ;;  %v7795_v20 = vld [vmem:[%s8749_s23 + $0x788] ss:$16 sps:$4 sm:$0xff]  }
 0x249   : > { %4514 = vmatprep.subr.bf16.mxu1 %v7740_v21  ;;  %v7798_v21 = vld [vmem:[%s8749_s23 + $0x988] ss:$16 sps:$4 sm:$0xff]  }
 0x24b   : > { %4474 = vmatpush1.bf16.msra.mxu0 %v7735_v18  ;;  %v7803_v18 = vld [vmem:[%s8749_s23 + $0x7ac] ss:$16 sps:$4 sm:$0xff]  }
 0x24c   : > { %4515 = vmatpush1.bf16.msra.mxu1 %v7738_v27  ;;  %4475 = vmatprep.subr.bf16.mxu0 %v7743_v58  ;;  %v7806_v27 = vld [vmem:[%s8749_s23 + $0x9ac] ss:$16 sps:$4 sm:$0xff]   ;;  %v7801_v58 = vld [vmem:[%s8749_s23 + $0x7a8] ss:$16 sps:$4 sm:$0xff]  }
 0x24d   : > { %4516 = vmatprep.subr.bf16.mxu1 %v7746_v23  ;;  %v7804_v23 = vld [vmem:[%s8749_s23 + $0x9a8] ss:$16 sps:$4 sm:$0xff]  }
 0x24f   : > { %4476 = vmatpush1.bf16.msra.mxu0 %v7741_v42  ;;  %v7809_v42 = vld [vmem:[%s8749_s23 + $0x7cc] ss:$16 sps:$4 sm:$0xff]  }
 0x250   : > { %4517 = vmatpush1.bf16.msra.mxu1 %v7744_v48  ;;  %4477 = vmatprep.subr.bf16.mxu0 %v7749_v35  ;;  %v7812_v48 = vld [vmem:[%s8749_s23 + $0x9cc] ss:$16 sps:$4 sm:$0xff]   ;;  %v7807_v35 = vld [vmem:[%s8749_s23 + $0x7c8] ss:$16 sps:$4 sm:$0xff]  }
 0x251   : > { %4518 = vmatprep.subr.bf16.mxu1 %v7752_v24  ;;  %v7810_v24 = vld [vmem:[%s8749_s23 + $0x9c8] ss:$16 sps:$4 sm:$0xff]  }
 0x253   : > { %4478 = vmatpush1.bf16.msra.mxu0 %v7747_v45  ;;  %v7815_v45 = vld [vmem:[%s8749_s23 + $0x7ec] ss:$16 sps:$4 sm:$0xff]  }
 0x254   : > { %4519 = vmatpush1.bf16.msra.mxu1 %v7750_v26  ;;  %4479 = vmatprep.subr.bf16.mxu0 %v7755_v29  ;;  %v7818_v26 = vld [vmem:[%s8749_s23 + $0x9ec] ss:$16 sps:$4 sm:$0xff]   ;;  %v7813_v29 = vld [vmem:[%s8749_s23 + $0x7e8] ss:$16 sps:$4 sm:$0xff]  }
 0x255   : > { %4520 = vmatprep.subr.bf16.mxu1 %v7758_v30  ;;  %v4175_v39 = vpop.f32.mrb[8].mxu0  ;;  %v7816_v30 = vld [vmem:[%s8749_s23 + $0x9e8] ss:$16 sps:$4 sm:$0xff]  }
 0x256   : > { %v4216_v40 = vpop.f32.mrb[8].mxu1  ;;  %v4176_v41 = vadd.f32 %v4175_v39, %v9237_v22  ;;  %v4177_v43 = vpop.f32.mrb[9].mxu0  ;;  %v7767_v22 = vld [vmem:[%s8749_s23 + $0x6ec] ss:$16 sps:$4 sm:$0xff]  }
 0x257   : > { %v4218_v46 = vpop.f32.mrb[9].mxu1  ;;  %v4178_v53 = vadd.f32 %v4177_v43, %v9241_v25  ;;  %v4179_v54 = vpop.f32.mrb[10].mxu0  ;;  %4480 = vmatpush1.bf16.msra.mxu0 %v7753_v31  ;;  %v7770_v25 = vld [vmem:[%s8749_s23 + $0x8ec] ss:$16 sps:$4 sm:$0xff]   ;;  %v7828_v43 = vld [vmem:[%s8749_s23 + $0xc28] ss:$16 sps:$4 sm:$0xff]  }
 0x258   : > { %v4220_v8 = vpop.f32.mrb[10].mxu1  ;;  %4521 = vmatpush1.bf16.msra.mxu1 %v7756_v32  ;;  %v9311_v17 = vadd.f32 %v4216_v40, %v4176_v41  ;;  %v4180_v57 = vpop.f32.mrb[11].mxu0  ;;  %4481 = vmatprep.subr.bf16.mxu0 %v7761_v37  ;;  %v7821_v31 = vld [vmem:[%s8749_s23 + $0xa0c] ss:$16 sps:$4 sm:$0xff]   ;;  %v7819_v37 = vld [vmem:[%s8749_s23 + $0xa08] ss:$16 sps:$4 sm:$0xff]  }
 0x259   : > { %v4221_v59 = vpop.f32.mrb[11].mxu1  ;;  %4522 = vmatprep.subr.bf16.mxu1 %v7764_v38  ;;  %v9315_v60 = vadd.f32 %v4218_v46, %v4178_v53  ;;  %v7824_v32 = vld [vmem:[%s8749_s23 + $0xc0c] ss:$16 sps:$4 sm:$0xff]   ;;  %v7822_v38 = vld [vmem:[%s8749_s23 + $0xc08] ss:$16 sps:$4 sm:$0xff]  }
 0x25a   : > { %v7827_v39 = vld [vmem:[%s8749_s23 + $0xa2c] ss:$16 sps:$4 sm:$0xff]   ;;  %v7825_v41 = vld [vmem:[%s8749_s23 + $0xa28] ss:$16 sps:$4 sm:$0xff]  }
 0x25b   : > { %4482 = vmatpush1.bf16.msra.mxu0 %v7759_v55  ;;  %v7830_v40 = vld [vmem:[%s8749_s23 + $0xc2c] ss:$16 sps:$4 sm:$0xff]   ;;  %v7837_v55 = vld [vmem:[%s8749_s23 + $0xa68] ss:$16 sps:$4 sm:$0xff]  }
 0x25c   : > { %4523 = vmatpush1.bf16.msra.mxu1 %v7762_v56  ;;  %4483 = vmatprep.subr.bf16.mxu0 %v7767_v22  ;;  %v7833_v46 = vld [vmem:[%s8749_s23 + $0xa4c] ss:$16 sps:$4 sm:$0xff]   ;;  %v7843_v57 = vld [vmem:[%s8749_s23 + $0xa88] ss:$16 sps:$4 sm:$0xff]  }
 0x25d   : > { %4524 = vmatprep.subr.bf16.mxu1 %v7770_v25  ;;  %v7836_v53 = vld [vmem:[%s8749_s23 + $0xc4c] ss:$16 sps:$4 sm:$0xff]   ;;  %v7846_v59 = vld [vmem:[%s8749_s23 + $0xc88] ss:$16 sps:$4 sm:$0xff]  }
 0x25e   : > { %v7839_v54 = vld [vmem:[%s8749_s23 + $0xa6c] ss:$16 sps:$4 sm:$0xff]  }
 0x25f   : > { %4484 = vmatpush1.bf16.msra.mxu0 %v7765_v62  ;;  %v7842_v8 = vld [vmem:[%s8749_s23 + $0xc6c] ss:$16 sps:$4 sm:$0xff]   ;;  %v7849_v62 = vld [vmem:[%s8749_s23 + $0xaa8] ss:$16 sps:$4 sm:$0xff]  }
 0x260   : > { %4525 = vmatpush1.bf16.msra.mxu1 %v7768_v61  ;;  %4485 = vmatprep.subr.bf16.mxu0 %v7773_v47  ;;  %v7848_v56 = vld [vmem:[%s8749_s23 + $0xc8c] ss:$16 sps:$4 sm:$0xff]   ;;  %v7852_v61 = vld [vmem:[%s8749_s23 + $0xca8] ss:$16 sps:$4 sm:$0xff]  }
 0x261   : > { %4526 = vmatprep.subr.bf16.mxu1 %v7776_v63  ;;  %v7851_v22 = vld [vmem:[%s8749_s23 + $0xaac] ss:$16 sps:$4 sm:$0xff]  }
 0x262   : > { %v7854_v25 = vld [vmem:[%s8749_s23 + $0xcac] ss:$16 sps:$4 sm:$0xff]  }
 0x263   : > { %4486 = vmatpush1.bf16.msra.mxu0 %v7771_v0  ;;  %v7857_v47 = vld [vmem:[%s8749_s23 + $0xacc] ss:$16 sps:$4 sm:$0xff]  }
 0x264   : > { %4527 = vmatpush1.bf16.msra.mxu1 %v7774_v1  ;;  %4487 = vmatprep.subr.bf16.mxu0 %v7779_v2  ;;  %v7860_v63 = vld [vmem:[%s8749_s23 + $0xccc] ss:$16 sps:$4 sm:$0xff]  }
 0x265   : > { %4528 = vmatprep.subr.bf16.mxu1 %v7782_v3 }
 0x267   : > { %4488 = vmatpush1.bf16.msra.mxu0 %v7777_v4 }
 0x268   : > { %4529 = vmatpush1.bf16.msra.mxu1 %v7780_v5  ;;  %4489 = vmatprep.subr.bf16.mxu0 %v7785_v9 }
 0x269   : > { %4530 = vmatprep.subr.bf16.mxu1 %v7788_v10 }
 0x26b   : > { %4490 = vmatpush1.bf16.msra.mxu0 %v7783_v11  ;;  %v7855_v11 = vld [vmem:[%s8749_s23 + $0xac8] ss:$16 sps:$4 sm:$0xff]  }
 0x26c   : > { %4531 = vmatpush1.bf16.msra.mxu1 %v7786_v52  ;;  %4491 = vmatprep.subr.bf16.mxu0 %v7791_v12  ;;  %v7858_v52 = vld [vmem:[%s8749_s23 + $0xcc8] ss:$16 sps:$4 sm:$0xff]  }
 0x26d   : > { %4532 = vmatprep.subr.bf16.mxu1 %v7794_v13 }
 0x26f   : > { %4492 = vmatpush1.bf16.msra.mxu0 %v7789_v14 }
 0x270   : > { %4533 = vmatpush1.bf16.msra.mxu1 %v7792_v15  ;;  %4493 = vmatprep.subr.bf16.mxu0 %v7797_v16  ;;  %v7861_v16 = vld [vmem:[%s8749_s23 + $0xae8] ss:$16 sps:$4 sm:$0xff]  }
 0x271   : > { %4534 = vmatprep.subr.bf16.mxu1 %v7800_v19  ;;  %v7864_v19 = vld [vmem:[%s8749_s23 + $0xce8] ss:$16 sps:$4 sm:$0xff]  }
 0x273   : > { %4494 = vmatpush1.bf16.msra.mxu0 %v7795_v20  ;;  %v7869_v20 = vld [vmem:[%s8749_s23 + $0xb0c] ss:$16 sps:$4 sm:$0xff]  }
 0x274   : > { %4535 = vmatpush1.bf16.msra.mxu1 %v7798_v21  ;;  %4495 = vmatprep.subr.bf16.mxu0 %v7803_v18  ;;  %v7872_v21 = vld [vmem:[%s8749_s23 + $0xd0c] ss:$16 sps:$4 sm:$0xff]   ;;  %v7867_v18 = vld [vmem:[%s8749_s23 + $0xb08] ss:$16 sps:$4 sm:$0xff]  }
 0x275   : > { %4536 = vmatprep.subr.bf16.mxu1 %v7806_v27  ;;  %v7870_v27 = vld [vmem:[%s8749_s23 + $0xd08] ss:$16 sps:$4 sm:$0xff]  }
 0x277   : > { %4496 = vmatpush1.bf16.msra.mxu0 %v7801_v58  ;;  %v7875_v58 = vld [vmem:[%s8749_s23 + $0xb2c] ss:$16 sps:$4 sm:$0xff]  }
 0x278   : > { %4537 = vmatpush1.bf16.msra.mxu1 %v7804_v23  ;;  %4497 = vmatprep.subr.bf16.mxu0 %v7809_v42  ;;  %v7878_v23 = vld [vmem:[%s8749_s23 + $0xd2c] ss:$16 sps:$4 sm:$0xff]   ;;  %v7873_v42 = vld [vmem:[%s8749_s23 + $0xb28] ss:$16 sps:$4 sm:$0xff]  }
 0x279   : > { %4538 = vmatprep.subr.bf16.mxu1 %v7812_v48  ;;  %v7876_v48 = vld [vmem:[%s8749_s23 + $0xd28] ss:$16 sps:$4 sm:$0xff]  }
 0x27b   : > { %4498 = vmatpush1.bf16.msra.mxu0 %v7807_v35  ;;  %v7881_v35 = vld [vmem:[%s8749_s23 + $0xb4c] ss:$16 sps:$4 sm:$0xff]  }
 0x27c   : > { %4539 = vmatpush1.bf16.msra.mxu1 %v7810_v24  ;;  %4499 = vmatprep.subr.bf16.mxu0 %v7815_v45  ;;  %v7884_v24 = vld [vmem:[%s8749_s23 + $0xd4c] ss:$16 sps:$4 sm:$0xff]   ;;  %v7879_v45 = vld [vmem:[%s8749_s23 + $0xb48] ss:$16 sps:$4 sm:$0xff]  }
 0x27d   : > { %4540 = vmatprep.subr.bf16.mxu1 %v7818_v26  ;;  %v7882_v26 = vld [vmem:[%s8749_s23 + $0xd48] ss:$16 sps:$4 sm:$0xff]  }
 0x27f   : > { %4500 = vmatpush1.bf16.msra.mxu0 %v7813_v29  ;;  %v7887_v29 = vld [vmem:[%s8749_s23 + $0xb6c] ss:$16 sps:$4 sm:$0xff]  }
 0x280   : > { %4541 = vmatpush1.bf16.msra.mxu1 %v7816_v30  ;;  %4551 = vmatprep.subr.bf16.mxu0 %v7821_v31  ;;  %v7890_v30 = vld [vmem:[%s8749_s23 + $0xd6c] ss:$16 sps:$4 sm:$0xff]   ;;  %v7885_v31 = vld [vmem:[%s8749_s23 + $0xb68] ss:$16 sps:$4 sm:$0xff]  }
 0x281   : > { %4592 = vmatprep.subr.bf16.mxu1 %v7824_v32  ;;  %v7888_v32 = vld [vmem:[%s8749_s23 + $0xd68] ss:$16 sps:$4 sm:$0xff]  }
 0x282   : > { %4502 = vmatmul.mubr.bf16.vlgmr.msra.gmra.mrb[24].mxu0 %v8940_v28  ;;  %v7831_v28 = vld [vmem:[%s8749_s23 + $0xa48] ss:$16 sps:$4 sm:$0xff]  }
 0x283   : > { %4543 = vmatmul.mubr.bf16.vlgmr.msra.gmra.mrb[24].mxu1 %v9028_v49  ;;  %4552 = vmatpush1.bf16.msra.mxu0 %v7819_v37  ;;  %v7834_v49 = vld [vmem:[%s8749_s23 + $0xc48] ss:$16 sps:$4 sm:$0xff]   ;;  %v7893_v37 = vld [vmem:[%s8749_s23 + $0xb8c] ss:$16 sps:$4 sm:$0xff]  }
 0x284   : > { %4593 = vmatpush1.bf16.msra.mxu1 %v7822_v38  ;;  %4553 = vmatprep.subr.bf16.mxu0 %v7827_v39  ;;  %v7896_v38 = vld [vmem:[%s8749_s23 + $0xd8c] ss:$16 sps:$4 sm:$0xff]   ;;  %v7891_v39 = vld [vmem:[%s8749_s23 + $0xb88] ss:$16 sps:$4 sm:$0xff]  }
 0x285   : > { %4594 = vmatprep.subr.bf16.mxu1 %v7830_v40  ;;  %4583 = vmatprep.mubr.bf16.mxu0 %v8958_v36  ;;  %v7840_v36 = vld [vmem:[%s8749_s23 + $0xc68] ss:$16 sps:$4 sm:$0xff]  }
 0x286   : > { %4624 = vmatprep.mubr.bf16.mxu1 %v9044_v33  ;;  %v7845_v33 = vld [vmem:[%s8749_s23 + $0xa8c] ss:$16 sps:$4 sm:$0xff]   ;;  %v7894_v40 = vld [vmem:[%s8749_s23 + $0xd88] ss:$16 sps:$4 sm:$0xff]  }
 0x287   : > { %4554 = vmatpush1.bf16.msra.mxu0 %v7825_v41  ;;  %v7899_v41 = vld [vmem:[%s8749_s23 + $0xbac] ss:$16 sps:$4 sm:$0xff]  }
 0x288   : > { %4595 = vmatpush1.bf16.msra.mxu1 %v7828_v43  ;;  %4555 = vmatprep.subr.bf16.mxu0 %v7833_v46  ;;  %v7902_v43 = vld [vmem:[%s8749_s23 + $0xdac] ss:$16 sps:$4 sm:$0xff]   ;;  %v7897_v46 = vld [vmem:[%s8749_s23 + $0xba8] ss:$16 sps:$4 sm:$0xff]  }
 0x289   : > { %4596 = vmatprep.subr.bf16.mxu1 %v7836_v53  ;;  %v7900_v53 = vld [vmem:[%s8749_s23 + $0xda8] ss:$16 sps:$4 sm:$0xff]  }
 0x28b   : > { %4556 = vmatpush1.bf16.msra.mxu0 %v7831_v28  ;;  %v7905_v28 = vld [vmem:[%s8749_s23 + $0xbcc] ss:$16 sps:$4 sm:$0xff]  }
 0x28c   : > { %4597 = vmatpush1.bf16.msra.mxu1 %v7834_v49  ;;  %4557 = vmatprep.subr.bf16.mxu0 %v7839_v54  ;;  %v7908_v49 = vld [vmem:[%s8749_s23 + $0xdcc] ss:$16 sps:$4 sm:$0xff]   ;;  %v7903_v54 = vld [vmem:[%s8749_s23 + $0xbc8] ss:$16 sps:$4 sm:$0xff]  }
 0x28d   : > { %4598 = vmatprep.subr.bf16.mxu1 %v7842_v8  ;;  %v7906_v8 = vld [vmem:[%s8749_s23 + $0xdc8] ss:$16 sps:$4 sm:$0xff]  }
 0x28f   : > { %4558 = vmatpush1.bf16.msra.mxu0 %v7837_v55  ;;  %v7911_v55 = vld [vmem:[%s8749_s23 + $0xbec] ss:$16 sps:$4 sm:$0xff]  }
 0x290   : > { %4599 = vmatpush1.bf16.msra.mxu1 %v7840_v36  ;;  %4559 = vmatprep.subr.bf16.mxu0 %v7845_v33  ;;  %v7914_v36 = vld [vmem:[%s8749_s23 + $0xdec] ss:$16 sps:$4 sm:$0xff]   ;;  %v7909_v33 = vld [vmem:[%s8749_s23 + $0xbe8] ss:$16 sps:$4 sm:$0xff]  }
 0x291   : > { %4600 = vmatprep.subr.bf16.mxu1 %v7848_v56  ;;  %v7912_v56 = vld [vmem:[%s8749_s23 + $0xde8] ss:$16 sps:$4 sm:$0xff]  }
 0x293   : > { %4560 = vmatpush1.bf16.msra.mxu0 %v7843_v57  ;;  %v7917_v57 = vld [vmem:[%s8749_s23 + $0xe0c] ss:$16 sps:$4 sm:$0xff]  }
 0x294   : > { %4601 = vmatpush1.bf16.msra.mxu1 %v7846_v59  ;;  %4561 = vmatprep.subr.bf16.mxu0 %v7851_v22  ;;  %v7920_v59 = vld [vmem:[%s8749_s23 + $0x100c] ss:$16 sps:$4 sm:$0xff]   ;;  %v7915_v22 = vld [vmem:[%s8749_s23 + $0xe08] ss:$16 sps:$4 sm:$0xff]  }
 0x295   : > { %4602 = vmatprep.subr.bf16.mxu1 %v7854_v25  ;;  %v4257_v0 = vpop.f32.mrb[12].mxu0  ;;  %v7918_v25 = vld [vmem:[%s8749_s23 + $0x1008] ss:$16 sps:$4 sm:$0xff]  }
 0x296   : > { %v4298_v1 = vpop.f32.mrb[12].mxu1  ;;  %v4258_v2 = vadd.f32 %v4257_v0, %v9311_v17  ;;  %v4259_v3 = vpop.f32.mrb[13].mxu0  ;;  %v7863_v17 = vld [vmem:[%s8749_s23 + $0xaec] ss:$16 sps:$4 sm:$0xff]  }
 0x297   : > { %v4300_v4 = vpop.f32.mrb[13].mxu1  ;;  %v4260_v5 = vadd.f32 %v4259_v3, %v9315_v60  ;;  %v4261_v9 = vpop.f32.mrb[14].mxu0  ;;  %4562 = vmatpush1.bf16.msra.mxu0 %v7849_v62  ;;  %v7866_v60 = vld [vmem:[%s8749_s23 + $0xcec] ss:$16 sps:$4 sm:$0xff]  }
 0x298   : > { %v4302_v10 = vpop.f32.mrb[14].mxu1  ;;  %4603 = vmatpush1.bf16.msra.mxu1 %v7852_v61  ;;  %v9385_v12 = vadd.f32 %v4298_v1, %v4258_v2  ;;  %v4262_v13 = vpop.f32.mrb[15].mxu0  ;;  %4563 = vmatprep.subr.bf16.mxu0 %v7857_v47  ;;  %v7923_v62 = vld [vmem:[%s8749_s23 + $0xe2c] ss:$16 sps:$4 sm:$0xff]   ;;  %v7921_v47 = vld [vmem:[%s8749_s23 + $0xe28] ss:$16 sps:$4 sm:$0xff]  }
 0x299   : > { %v4303_v14 = vpop.f32.mrb[15].mxu1  ;;  %4604 = vmatprep.subr.bf16.mxu1 %v7860_v63  ;;  %v9389_v15 = vadd.f32 %v4300_v4, %v4260_v5  ;;  %v7926_v61 = vld [vmem:[%s8749_s23 + $0x102c] ss:$16 sps:$4 sm:$0xff]   ;;  %v7924_v63 = vld [vmem:[%s8749_s23 + $0x1028] ss:$16 sps:$4 sm:$0xff]  }
 0x29a   : > { %v7929_v0 = vld [vmem:[%s8749_s23 + $0xe4c] ss:$16 sps:$4 sm:$0xff]   ;;  %v7933_v4 = vld [vmem:[%s8749_s23 + $0xe68] ss:$16 sps:$4 sm:$0xff]  }
 0x29b   : > { %4564 = vmatpush1.bf16.msra.mxu0 %v7855_v11  ;;  %v7932_v1 = vld [vmem:[%s8749_s23 + $0x104c] ss:$16 sps:$4 sm:$0xff]   ;;  %v7939_v9 = vld [vmem:[%s8749_s23 + $0xe88] ss:$16 sps:$4 sm:$0xff]  }
 0x29c   : > { %4605 = vmatpush1.bf16.msra.mxu1 %v7858_v52  ;;  %4565 = vmatprep.subr.bf16.mxu0 %v7863_v17  ;;  %v7935_v2 = vld [vmem:[%s8749_s23 + $0xe6c] ss:$16 sps:$4 sm:$0xff]   ;;  %v7942_v10 = vld [vmem:[%s8749_s23 + $0x1088] ss:$16 sps:$4 sm:$0xff]  }
 0x29d   : > { %4606 = vmatprep.subr.bf16.mxu1 %v7866_v60  ;;  %v7938_v3 = vld [vmem:[%s8749_s23 + $0x106c] ss:$16 sps:$4 sm:$0xff]   ;;  %v7945_v13 = vld [vmem:[%s8749_s23 + $0xea8] ss:$16 sps:$4 sm:$0xff]  }
 0x29e   : > { %v7944_v5 = vld [vmem:[%s8749_s23 + $0x108c] ss:$16 sps:$4 sm:$0xff]   ;;  %v7948_v14 = vld [vmem:[%s8749_s23 + $0x10a8] ss:$16 sps:$4 sm:$0xff]  }
 0x29f   : > { %4566 = vmatpush1.bf16.msra.mxu0 %v7861_v16  ;;  %v7947_v11 = vld [vmem:[%s8749_s23 + $0xeac] ss:$16 sps:$4 sm:$0xff]   ;;  %v445_v16 = vld [vmem:[#allocation2] sm:$0xff] }
 0x2a0   : > { %4607 = vmatpush1.bf16.msra.mxu1 %v7864_v19  ;;  %4567 = vmatprep.subr.bf16.mxu0 %v7869_v20  ;;  %v7950_v52 = vld [vmem:[%s8749_s23 + $0x10ac] ss:$16 sps:$4 sm:$0xff]  }
 0x2a1   : > { %4608 = vmatprep.subr.bf16.mxu1 %v7872_v21  ;;  %v7953_v17 = vld [vmem:[%s8749_s23 + $0xecc] ss:$16 sps:$4 sm:$0xff]  }
 0x2a2   : > { %v7956_v60 = vld [vmem:[%s8749_s23 + $0x10cc] ss:$16 sps:$4 sm:$0xff]  }
 0x2a3   : > { %4568 = vmatpush1.bf16.msra.mxu0 %v7867_v18  ;;  %v446_v18 = vld [vmem:[#allocation2 + $0x8] sm:$0xff] }
 0x2a4   : > { %4609 = vmatpush1.bf16.msra.mxu1 %v7870_v27  ;;  %4569 = vmatprep.subr.bf16.mxu0 %v7875_v58 }
 0x2a5   : > { %4610 = vmatprep.subr.bf16.mxu1 %v7878_v23 }
 0x2a7   : > { %4570 = vmatpush1.bf16.msra.mxu0 %v7873_v42 }
 0x2a8   : > { %4611 = vmatpush1.bf16.msra.mxu1 %v7876_v48  ;;  %4571 = vmatprep.subr.bf16.mxu0 %v7881_v35  ;;  %v7951_v35 = vld [vmem:[%s8749_s23 + $0xec8] ss:$16 sps:$4 sm:$0xff]  }
 0x2a9   : > { %4612 = vmatprep.subr.bf16.mxu1 %v7884_v24  ;;  %v7954_v24 = vld [vmem:[%s8749_s23 + $0x10c8] ss:$16 sps:$4 sm:$0xff]  }
 0x2ab   : > { %4572 = vmatpush1.bf16.msra.mxu0 %v7879_v45 }
 0x2ac   : > { %4613 = vmatpush1.bf16.msra.mxu1 %v7882_v26  ;;  %4573 = vmatprep.subr.bf16.mxu0 %v7887_v29  ;;  %v7959_v29 = vld [vmem:[%s8749_s23 + $0xeec] ss:$16 sps:$4 sm:$0xff]  }
 0x2ad   : > { %4614 = vmatprep.subr.bf16.mxu1 %v7890_v30  ;;  %v7962_v30 = vld [vmem:[%s8749_s23 + $0x10ec] ss:$16 sps:$4 sm:$0xff]  }
 0x2af   : > { %4574 = vmatpush1.bf16.msra.mxu0 %v7885_v31  ;;  %v7957_v31 = vld [vmem:[%s8749_s23 + $0xee8] ss:$16 sps:$4 sm:$0xff]  }
 0x2b0   : > { %4615 = vmatpush1.bf16.msra.mxu1 %v7888_v32  ;;  %4575 = vmatprep.subr.bf16.mxu0 %v7893_v37  ;;  %v7960_v32 = vld [vmem:[%s8749_s23 + $0x10e8] ss:$16 sps:$4 sm:$0xff]   ;;  %v7965_v37 = vld [vmem:[%s8749_s23 + $0xf0c] ss:$16 sps:$4 sm:$0xff]  }
 0x2b1   : > { %4616 = vmatprep.subr.bf16.mxu1 %v7896_v38  ;;  %v7968_v38 = vld [vmem:[%s8749_s23 + $0x110c] ss:$16 sps:$4 sm:$0xff]  }
 0x2b3   : > { %4576 = vmatpush1.bf16.msra.mxu0 %v7891_v39  ;;  %v7963_v39 = vld [vmem:[%s8749_s23 + $0xf08] ss:$16 sps:$4 sm:$0xff]  }
 0x2b4   : > { %4617 = vmatpush1.bf16.msra.mxu1 %v7894_v40  ;;  %4577 = vmatprep.subr.bf16.mxu0 %v7899_v41  ;;  %v7966_v40 = vld [vmem:[%s8749_s23 + $0x1108] ss:$16 sps:$4 sm:$0xff]   ;;  %v7971_v41 = vld [vmem:[%s8749_s23 + $0xf2c] ss:$16 sps:$4 sm:$0xff]  }
 0x2b5   : > { %4618 = vmatprep.subr.bf16.mxu1 %v7902_v43  ;;  %v7974_v43 = vld [vmem:[%s8749_s23 + $0x112c] ss:$16 sps:$4 sm:$0xff]  }
 0x2b7   : > { %4578 = vmatpush1.bf16.msra.mxu0 %v7897_v46  ;;  %v7969_v46 = vld [vmem:[%s8749_s23 + $0xf28] ss:$16 sps:$4 sm:$0xff]  }
 0x2b8   : > { %4619 = vmatpush1.bf16.msra.mxu1 %v7900_v53  ;;  %4579 = vmatprep.subr.bf16.mxu0 %v7905_v28  ;;  %v7972_v53 = vld [vmem:[%s8749_s23 + $0x1128] ss:$16 sps:$4 sm:$0xff]   ;;  %v7977_v28 = vld [vmem:[%s8749_s23 + $0xf4c] ss:$16 sps:$4 sm:$0xff]  }
 0x2b9   : > { %4620 = vmatprep.subr.bf16.mxu1 %v7908_v49  ;;  %v7980_v49 = vld [vmem:[%s8749_s23 + $0x114c] ss:$16 sps:$4 sm:$0xff]  }
 0x2bb   : > { %4580 = vmatpush1.bf16.msra.mxu0 %v7903_v54  ;;  %v7975_v54 = vld [vmem:[%s8749_s23 + $0xf48] ss:$16 sps:$4 sm:$0xff]  }
 0x2bc   : > { %4621 = vmatpush1.bf16.msra.mxu1 %v7906_v8  ;;  %4581 = vmatprep.subr.bf16.mxu0 %v7911_v55  ;;  %v7978_v8 = vld [vmem:[%s8749_s23 + $0x1148] ss:$16 sps:$4 sm:$0xff]   ;;  %v7983_v55 = vld [vmem:[%s8749_s23 + $0xf6c] ss:$16 sps:$4 sm:$0xff]  }
 0x2bd   : > { %4622 = vmatprep.subr.bf16.mxu1 %v7914_v36  ;;  %v7986_v36 = vld [vmem:[%s8749_s23 + $0x116c] ss:$16 sps:$4 sm:$0xff]  }
 0x2bf   : > { %4582 = vmatpush1.bf16.msra.mxu0 %v7909_v33  ;;  %v7981_v33 = vld [vmem:[%s8749_s23 + $0xf68] ss:$16 sps:$4 sm:$0xff]  }
 0x2c0   : > { %4623 = vmatpush1.bf16.msra.mxu1 %v7912_v56  ;;  %4633 = vmatprep.subr.bf16.mxu0 %v7917_v57  ;;  %v7984_v56 = vld [vmem:[%s8749_s23 + $0x1168] ss:$16 sps:$4 sm:$0xff]   ;;  %v7989_v57 = vld [vmem:[%s8749_s23 + $0xf8c] ss:$16 sps:$4 sm:$0xff]  }
 0x2c1   : > { %4674 = vmatprep.subr.bf16.mxu1 %v7920_v59  ;;  %v7992_v59 = vld [vmem:[%s8749_s23 + $0x118c] ss:$16 sps:$4 sm:$0xff]  }
 0x2c2   : > { %4584 = vmatmul.mubr.bf16.vlgmr.msra.gmra.mrb[28].mxu0 %v9032_v50  ;;  %v7927_v50 = vld [vmem:[%s8749_s23 + $0xe48] ss:$16 sps:$4 sm:$0xff]  }
 0x2c3   : > { %4625 = vmatmul.mubr.bf16.vlgmr.msra.gmra.mrb[28].mxu1 %v9117_v6  ;;  %4634 = vmatpush1.bf16.msra.mxu0 %v7915_v22  ;;  %v7930_v6 = vld [vmem:[%s8749_s23 + $0x1048] ss:$16 sps:$4 sm:$0xff]  }
 0x2c4   : > { %4675 = vmatpush1.bf16.msra.mxu1 %v7918_v25  ;;  %4635 = vmatprep.subr.bf16.mxu0 %v7923_v62  ;;  %v7987_v22 = vld [vmem:[%s8749_s23 + $0xf88] ss:$16 sps:$4 sm:$0xff]   ;;  %v7995_v62 = vld [vmem:[%s8749_s23 + $0xfac] ss:$16 sps:$4 sm:$0xff]  }
 0x2c5   : > { %4676 = vmatprep.subr.bf16.mxu1 %v7926_v61  ;;  %4665 = vmatprep.mubr.bf16.mxu0 %v9048_v34  ;;  %v7936_v34 = vld [vmem:[%s8749_s23 + $0x1068] ss:$16 sps:$4 sm:$0xff]   ;;  %v7998_v61 = vld [vmem:[%s8749_s23 + $0x11ac] ss:$16 sps:$4 sm:$0xff]  }
 0x2c6   : > { %4706 = vmatprep.mubr.bf16.mxu1 %v9131_v51  ;;  %v7941_v51 = vld [vmem:[%s8749_s23 + $0xe8c] ss:$16 sps:$4 sm:$0xff]   ;;  %v7990_v25 = vld [vmem:[%s8749_s23 + $0x1188] ss:$16 sps:$4 sm:$0xff]  }
 0x2c7   : > { %4636 = vmatpush1.bf16.msra.mxu0 %v7921_v47  ;;  %v7993_v47 = vld [vmem:[%s8749_s23 + $0xfa8] ss:$16 sps:$4 sm:$0xff]  }
 0x2c8   : > { %4677 = vmatpush1.bf16.msra.mxu1 %v7924_v63  ;;  %4637 = vmatprep.subr.bf16.mxu0 %v7929_v0  ;;  %v7996_v63 = vld [vmem:[%s8749_s23 + $0x11a8] ss:$16 sps:$4 sm:$0xff]   ;;  %v8001_v0 = vld [vmem:[%s8749_s23 + $0xfcc] ss:$16 sps:$4 sm:$0xff]  }
 0x2c9   : > { %4678 = vmatprep.subr.bf16.mxu1 %v7932_v1  ;;  %v8004_v1 = vld [vmem:[%s8749_s23 + $0x11cc] ss:$16 sps:$4 sm:$0xff]  }
 0x2cb   : > { %4638 = vmatpush1.bf16.msra.mxu0 %v7927_v50  ;;  %v7999_v50 = vld [vmem:[%s8749_s23 + $0xfc8] ss:$16 sps:$4 sm:$0xff]  }
 0x2cc   : > { %4679 = vmatpush1.bf16.msra.mxu1 %v7930_v6  ;;  %4639 = vmatprep.subr.bf16.mxu0 %v7935_v2  ;;  %v8002_v6 = vld [vmem:[%s8749_s23 + $0x11c8] ss:$16 sps:$4 sm:$0xff]   ;;  %v8007_v2 = vld [vmem:[%s8749_s23 + $0xfec] ss:$16 sps:$4 sm:$0xff]  }
 0x2cd   : > { %4680 = vmatprep.subr.bf16.mxu1 %v7938_v3  ;;  %v8010_v3 = vld [vmem:[%s8749_s23 + $0x11ec] ss:$16 sps:$4 sm:$0xff]  }
 0x2cf   : > { %4640 = vmatpush1.bf16.msra.mxu0 %v7933_v4  ;;  %v8005_v4 = vld [vmem:[%s8749_s23 + $0xfe8] ss:$16 sps:$4 sm:$0xff]  }
 0x2d0   : > { %4681 = vmatpush1.bf16.msra.mxu1 %v7936_v34  ;;  %4641 = vmatprep.subr.bf16.mxu0 %v7941_v51  ;;  %v8008_v34 = vld [vmem:[%s8749_s23 + $0x11e8] ss:$16 sps:$4 sm:$0xff]  }
 0x2d1   : > { %4682 = vmatprep.subr.bf16.mxu1 %v7944_v5 }
 0x2d3   : > { %4642 = vmatpush1.bf16.msra.mxu0 %v7939_v9 }
 0x2d4   : > { %4683 = vmatpush1.bf16.msra.mxu1 %v7942_v10  ;;  %4643 = vmatprep.subr.bf16.mxu0 %v7947_v11 }
 0x2d5   : > { %4684 = vmatprep.subr.bf16.mxu1 %v7950_v52  ;;  %v4339_v19 = vpop.f32.mrb[16].mxu0 }
 0x2d6   : > { %v9455_v20 = vpop.f32.mrb[16].mxu1  ;;  %v4340_v21 = vadd.f32 %v4339_v19, %v9385_v12  ;;  %v4341_v27 = vpop.f32.mrb[17].mxu0 }
 0x2d7   : > { %v9458_v58 = vpop.f32.mrb[17].mxu1  ;;  %v4342_v23 = vadd.f32 %v4341_v27, %v9389_v15  ;;  %v4343_v42 = vpop.f32.mrb[18].mxu0  ;;  %4644 = vmatpush1.bf16.msra.mxu0 %v7945_v13 }
 0x2d8   : > { %v4384_v48 = vpop.f32.mrb[18].mxu1  ;;  %4685 = vmatpush1.bf16.msra.mxu1 %v7948_v14  ;;  %v4715_v45 = vadd.f32 %v4340_v21, %v445_v16  ;;  %v4344_v26 = vpop.f32.mrb[19].mxu0  ;;  %4645 = vmatprep.subr.bf16.mxu0 %v7953_v17 }
 0x2d9   : > { %v4385_v12 = vpop.f32.mrb[19].mxu1  ;;  %4686 = vmatprep.subr.bf16.mxu1 %v7956_v60  ;;  %v4716_v15 = vadd.f32 %v4342_v23, %v446_v18 }
 0x2da   : > { %4719 = vst [vmem:[#allocation2] sm:$0xff] %v4715_v45 }
 0x2db   : > { %4720 = vst [vmem:[#allocation2 + $0x8] sm:$0xff] %v4716_v15  ;;  %4646 = vmatpush1.bf16.msra.mxu0 %v7951_v35 }
 0x2dc   : > { %4687 = vmatpush1.bf16.msra.mxu1 %v7954_v24  ;;  %4647 = vmatprep.subr.bf16.mxu0 %v7959_v29 }
 0x2dd   : > { %4688 = vmatprep.subr.bf16.mxu1 %v7962_v30 }
 0x2df   : > { %4648 = vmatpush1.bf16.msra.mxu0 %v7957_v31 }
 0x2e0   : > { %4689 = vmatpush1.bf16.msra.mxu1 %v7960_v32  ;;  %4649 = vmatprep.subr.bf16.mxu0 %v7965_v37 }
 0x2e1   : > { %4690 = vmatprep.subr.bf16.mxu1 %v7968_v38 }
 0x2e3   : > { %4650 = vmatpush1.bf16.msra.mxu0 %v7963_v39 }
 0x2e4   : > { %4691 = vmatpush1.bf16.msra.mxu1 %v7966_v40  ;;  %4651 = vmatprep.subr.bf16.mxu0 %v7971_v41 }
 0x2e5   : > { %4692 = vmatprep.subr.bf16.mxu1 %v7974_v43 }
 0x2e7   : > { %4652 = vmatpush1.bf16.msra.mxu0 %v7969_v46 }
 0x2e8   : > { %4693 = vmatpush1.bf16.msra.mxu1 %v7972_v53  ;;  %4653 = vmatprep.subr.bf16.mxu0 %v7977_v28 }
 0x2e9   : > { %4694 = vmatprep.subr.bf16.mxu1 %v7980_v49  ;;  %v447_v49 = vld [vmem:[#allocation2 + $0x10] sm:$0xff] }
 0x2eb   : > { %4654 = vmatpush1.bf16.msra.mxu0 %v7975_v54 }
 0x2ec   : > { %4695 = vmatpush1.bf16.msra.mxu1 %v7978_v8  ;;  %4655 = vmatprep.subr.bf16.mxu0 %v7983_v55 }
 0x2ed   : > { %4696 = vmatprep.subr.bf16.mxu1 %v7986_v36 }
 0x2ef   : > { %4656 = vmatpush1.bf16.msra.mxu0 %v7981_v33  ;;  %v448_v33 = vld [vmem:[#allocation2 + $0x18] sm:$0xff] }
 0x2f0   : > { %4697 = vmatpush1.bf16.msra.mxu1 %v7984_v56  ;;  %4657 = vmatprep.subr.bf16.mxu0 %v7989_v57 }
 0x2f1   : > { %4698 = vmatprep.subr.bf16.mxu1 %v7992_v59 }
 0x2f3   : > { %4658 = vmatpush1.bf16.msra.mxu0 %v7987_v22 }
 0x2f4   : > { %4699 = vmatpush1.bf16.msra.mxu1 %v7990_v25  ;;  %4659 = vmatprep.subr.bf16.mxu0 %v7995_v62  ;;  %v8011_v62 = vld [vmem:[#allocation7 + $0x4] ss:$16 sps:$4 sm:$0xff] (!%p6793_p9)  }
 0x2f5   : > { %4700 = vmatprep.subr.bf16.mxu1 %v7998_v61  ;;  %v8013_v61 = vld [vmem:[#allocation7 + $0xc] ss:$16 sps:$4 sm:$0xff] (!%p6793_p9)  }
 0x2f7   : > { %4660 = vmatpush1.bf16.msra.mxu0 %v7993_v47  ;;  %v8015_v47 = vld [vmem:[#allocation7] ss:$16 sps:$4 sm:$0xff] (!%p6793_p9)  }
 0x2f8   : > { %4701 = vmatpush1.bf16.msra.mxu1 %v7996_v63  ;;  %4661 = vmatprep.subr.bf16.mxu0 %v8001_v0  ;;  %v8016_v63 = vld [vmem:[#allocation7 + $0x8] ss:$16 sps:$4 sm:$0xff] (!%p6793_p9)   ;;  %v8017_v0 = vld [vmem:[#allocation7 + $0x24] ss:$16 sps:$4 sm:$0xff] (!%p6793_p9)  }
 0x2f9   : > { %4702 = vmatprep.subr.bf16.mxu1 %v8004_v1  ;;  %v8019_v1 = vld [vmem:[#allocation7 + $0x2c] ss:$16 sps:$4 sm:$0xff] (!%p6793_p9)  }
 0x2fb   : > { %4662 = vmatpush1.bf16.msra.mxu0 %v7999_v50  ;;  %v8021_v50 = vld [vmem:[#allocation7 + $0x20] ss:$16 sps:$4 sm:$0xff] (!%p6793_p9)  }
 0x2fc   : > { %4703 = vmatpush1.bf16.msra.mxu1 %v8002_v6  ;;  %4663 = vmatprep.subr.bf16.mxu0 %v8007_v2  ;;  %v8022_v6 = vld [vmem:[#allocation7 + $0x28] ss:$16 sps:$4 sm:$0xff] (!%p6793_p9)   ;;  %v8023_v2 = vld [vmem:[#allocation7 + $0x44] ss:$16 sps:$4 sm:$0xff] (!%p6793_p9)  }
 0x2fd   : > { %4704 = vmatprep.subr.bf16.mxu1 %v8010_v3  ;;  %v8025_v3 = vld [vmem:[#allocation7 + $0x4c] ss:$16 sps:$4 sm:$0xff] (!%p6793_p9)  }
 0x2ff   : > { %4664 = vmatpush1.bf16.msra.mxu0 %v8005_v4  ;;  %v8027_v4 = vld [vmem:[#allocation7 + $0x40] ss:$16 sps:$4 sm:$0xff] (!%p6793_p9)  }
 0x300   : > { %4705 = vmatpush1.bf16.msra.mxu1 %v8008_v34  ;;  %5529 = vmatprep.subr.bf16.mxu0 (!%p6793_p9), %v8011_v62  ;;  %v8028_v34 = vld [vmem:[#allocation7 + $0x48] ss:$16 sps:$4 sm:$0xff] (!%p6793_p9)   ;;  %v8101_v62 = vld [vmem:[#allocation7 + $0x1e4] ss:$16 sps:$4 sm:$0xff] (!%p6793_p9)  }
 0x301   : > { %5611 = vmatprep.subr.bf16.mxu1 (!%p6793_p9), %v8013_v61  ;;  %v8103_v61 = vld [vmem:[#allocation7 + $0x1ec] ss:$16 sps:$4 sm:$0xff] (!%p6793_p9)  }
 0x302   : > { %4666 = vmatmul.mubr.bf16.vlgmr.msra.gmra.mrb[32].mxu0 %v9121_v7 }
 0x303   : > { %4707 = vmatmul.mubr.bf16.vlgmr.msra.gmra.mrb[32].mxu1 %v9205_v44  ;;  %5530 = vmatpush1.bf16.msra.mxu0 (!%p6793_p9), %v8015_v47 }
 0x304   : > { %5612 = vmatpush1.bf16.msra.mxu1 (!%p6793_p9), %v8016_v63  ;;  %5531 = vmatprep.subr.bf16.mxu0 (!%p6793_p9), %v8017_v0  ;;  %v8105_v63 = vld [vmem:[#allocation7 + $0x1e0] ss:$16 sps:$4 sm:$0xff] (!%p6793_p9)   ;;  %v8106_v0 = vld [vmem:[#allocation7 + $0x1e8] ss:$16 sps:$4 sm:$0xff] (!%p6793_p9)  }
 0x305   : > { %5613 = vmatprep.subr.bf16.mxu1 (!%p6793_p9), %v8019_v1  ;;  %v8109_v1 = vld [vmem:[#allocation7 + $0x204] ss:$16 sps:$4 sm:$0xff] (!%p6793_p9)  }
 0x307   : > { %5532 = vmatpush1.bf16.msra.mxu0 (!%p6793_p9), %v8021_v50  ;;  %v8112_v50 = vld [vmem:[#allocation7 + $0x20c] ss:$16 sps:$4 sm:$0xff] (!%p6793_p9)  }
 0x308   : > { %5614 = vmatpush1.bf16.msra.mxu1 (!%p6793_p9), %v8022_v6  ;;  %5533 = vmatprep.subr.bf16.mxu0 (!%p6793_p9), %v8023_v2  ;;  %v8107_v2 = vld [vmem:[#allocation7 + $0x200] ss:$16 sps:$4 sm:$0xff] (!%p6793_p9)  }
 0x309   : > { %5615 = vmatprep.subr.bf16.mxu1 (!%p6793_p9), %v8025_v3  ;;  %v8110_v3 = vld [vmem:[#allocation7 + $0x208] ss:$16 sps:$4 sm:$0xff] (!%p6793_p9)  }
 0x30b   : > { %5534 = vmatpush1.bf16.msra.mxu0 (!%p6793_p9), %v8027_v4  ;;  %v8115_v4 = vld [vmem:[#allocation7 + $0x224] ss:$16 sps:$4 sm:$0xff] (!%p6793_p9)  }
 0x30c   : > { %5616 = vmatpush1.bf16.msra.mxu1 (!%p6793_p9), %v8028_v34  ;;  %v8118_v34 = vld [vmem:[#allocation7 + $0x22c] ss:$16 sps:$4 sm:$0xff] (!%p6793_p9)  }
 0x315   : > { %v4421_v51 = vpop.f32.mrb[20].mxu0 }
 0x316   : > { %v4462_v5 = vpop.f32.mrb[20].mxu1  ;;  %v4422_v9 = vadd.f32 %v4421_v51, %v9455_v20  ;;  %v4423_v10 = vpop.f32.mrb[21].mxu0  ;;  %v8029_v51 = vld [vmem:[#allocation7 + $0x64] ss:$16 sps:$4 sm:$0xff] (!%p6793_p9)  }
 0x317   : > { %v4464_v11 = vpop.f32.mrb[21].mxu1  ;;  %v4424_v52 = vadd.f32 %v4423_v10, %v9458_v58  ;;  %v4425_v13 = vpop.f32.mrb[22].mxu0  ;;  %v8034_v10 = vld [vmem:[#allocation7 + $0x68] ss:$16 sps:$4 sm:$0xff] (!%p6793_p9)   ;;  %5535 = vmatprep.subr.bf16.mxu0 (!%p6793_p9), %v8029_v51  ;;  %v8113_v51 = vld [vmem:[#allocation7 + $0x220] ss:$16 sps:$4 sm:$0xff] (!%p6793_p9)  }
 0x318   : > { %v4466_v14 = vpop.f32.mrb[22].mxu1  ;;  %v4463_v17 = vadd.f32 %v4462_v5, %v4422_v9  ;;  %v4426_v60 = vpop.f32.mrb[23].mxu0  ;;  %v8031_v5 = vld [vmem:[#allocation7 + $0x6c] ss:$16 sps:$4 sm:$0xff] (!%p6793_p9)   ;;  %v8033_v9 = vld [vmem:[#allocation7 + $0x60] ss:$16 sps:$4 sm:$0xff] (!%p6793_p9)  }
 0x319   : > { %v4467_v16 = vpop.f32.mrb[23].mxu1  ;;  %v4465_v19 = vadd.f32 %v4464_v11, %v4424_v52  ;;  %v8035_v11 = vld [vmem:[#allocation7 + $0x84] ss:$16 sps:$4 sm:$0xff] (!%p6793_p9)   ;;  %5617 = vmatprep.subr.bf16.mxu1 (!%p6793_p9), %v8031_v5  ;;  %v8037_v52 = vld [vmem:[#allocation7 + $0x8c] ss:$16 sps:$4 sm:$0xff] (!%p6793_p9)   ;;  %5536 = vmatpush1.bf16.msra.mxu0 (!%p6793_p9), %v8033_v9 }
 0x31a   : > { %v8039_v13 = vld [vmem:[#allocation7 + $0x80] ss:$16 sps:$4 sm:$0xff] (!%p6793_p9)   ;;  %v8040_v14 = vld [vmem:[#allocation7 + $0x88] ss:$16 sps:$4 sm:$0xff] (!%p6793_p9)   ;;  %5618 = vmatpush1.bf16.msra.mxu1 (!%p6793_p9), %v8034_v10  ;;  %5537 = vmatprep.subr.bf16.mxu0 (!%p6793_p9), %v8035_v11  ;;  %v8043_v60 = vld [vmem:[#allocation7 + $0xac] ss:$16 sps:$4 sm:$0xff] (!%p6793_p9)  }
 0x31b   : > { %5619 = vmatprep.subr.bf16.mxu1 (!%p6793_p9), %v8037_v52  ;;  %v8045_v16 = vld [vmem:[#allocation7 + $0xa0] ss:$16 sps:$4 sm:$0xff] (!%p6793_p9)   ;;  %v8116_v5 = vld [vmem:[#allocation7 + $0x228] ss:$16 sps:$4 sm:$0xff] (!%p6793_p9)   ;;  %v8121_v9 = vld [vmem:[#allocation7 + $0x244] ss:$16 sps:$4 sm:$0xff] (!%p6793_p9)  }
 0x31c   : > { %v8124_v10 = vld [vmem:[#allocation7 + $0x24c] ss:$16 sps:$4 sm:$0xff] (!%p6793_p9)   ;;  %v8119_v11 = vld [vmem:[#allocation7 + $0x240] ss:$16 sps:$4 sm:$0xff] (!%p6793_p9)   ;;  %v8122_v52 = vld [vmem:[#allocation7 + $0x248] ss:$16 sps:$4 sm:$0xff] (!%p6793_p9)  }
 0x31d   : > { %5538 = vmatpush1.bf16.msra.mxu0 (!%p6793_p9), %v8039_v13  ;;  %v8127_v13 = vld [vmem:[#allocation7 + $0x264] ss:$16 sps:$4 sm:$0xff] (!%p6793_p9)  }
 0x31e   : > { %5620 = vmatpush1.bf16.msra.mxu1 (!%p6793_p9), %v8040_v14  ;;  %v8130_v14 = vld [vmem:[#allocation7 + $0x26c] ss:$16 sps:$4 sm:$0xff] (!%p6793_p9)  }
 0x31f   : > { %5621 = vmatprep.subr.bf16.mxu1 (!%p6793_p9), %v8043_v60  ;;  %v8128_v60 = vld [vmem:[#allocation7 + $0x268] ss:$16 sps:$4 sm:$0xff] (!%p6793_p9)  }
 0x355   : > { %v4503_v21 = vpop.f32.mrb[24].mxu0 }
 0x356   : > { %v4544_v18 = vpop.f32.mrb[24].mxu1  ;;  %v4504_v27 = vadd.f32 %v4503_v21, %v4463_v17  ;;  %v4505_v7 = vpop.f32.mrb[25].mxu0  ;;  %v8041_v17 = vld [vmem:[#allocation7 + $0xa4] ss:$16 sps:$4 sm:$0xff] (!%p6793_p9)  }
 0x357   : > { %v4546_v23 = vpop.f32.mrb[25].mxu1  ;;  %v4506_v44 = vadd.f32 %v4505_v7, %v4465_v19  ;;  %v4507_v42 = vpop.f32.mrb[26].mxu0  ;;  %v8046_v19 = vld [vmem:[#allocation7 + $0xa8] ss:$16 sps:$4 sm:$0xff] (!%p6793_p9)   ;;  %v8047_v21 = vld [vmem:[#allocation7 + $0xc4] ss:$16 sps:$4 sm:$0xff] (!%p6793_p9)   ;;  %5539 = vmatprep.subr.bf16.mxu0 (!%p6793_p9), %v8041_v17 }
 0x358   : > { %v4548_v48 = vpop.f32.mrb[26].mxu1  ;;  %v4545_v35 = vadd.f32 %v4544_v18, %v4504_v27  ;;  %v4508_v20 = vpop.f32.mrb[27].mxu0  ;;  %v8049_v18 = vld [vmem:[#allocation7 + $0xcc] ss:$16 sps:$4 sm:$0xff] (!%p6793_p9)   ;;  %v8051_v27 = vld [vmem:[#allocation7 + $0xc0] ss:$16 sps:$4 sm:$0xff] (!%p6793_p9)   ;;  %5540 = vmatpush1.bf16.msra.mxu0 (!%p6793_p9), %v8045_v16  ;;  %5622 = vmatpush1.bf16.msra.mxu1 (!%p6793_p9), %v8046_v19 }
 0x359   : > { %v4549_v24 = vpop.f32.mrb[27].mxu1  ;;  %v4547_v45 = vadd.f32 %v4546_v23, %v4506_v44  ;;  %v8052_v7 = vld [vmem:[#allocation7 + $0xc8] ss:$16 sps:$4 sm:$0xff] (!%p6793_p9)   ;;  %v8053_v23 = vld [vmem:[#allocation7 + $0xe4] ss:$16 sps:$4 sm:$0xff] (!%p6793_p9)   ;;  %5541 = vmatprep.subr.bf16.mxu0 (!%p6793_p9), %v8047_v21  ;;  %5623 = vmatprep.subr.bf16.mxu1 (!%p6793_p9), %v8049_v18 }
 0x35a   : > { %v8055_v44 = vld [vmem:[#allocation7 + $0xec] ss:$16 sps:$4 sm:$0xff] (!%p6793_p9)   ;;  %v8057_v42 = vld [vmem:[#allocation7 + $0xe0] ss:$16 sps:$4 sm:$0xff] (!%p6793_p9)   ;;  %v8058_v48 = vld [vmem:[#allocation7 + $0xe8] ss:$16 sps:$4 sm:$0xff] (!%p6793_p9)  }
 0x35b   : > { %v8061_v20 = vld [vmem:[#allocation7 + $0x10c] ss:$16 sps:$4 sm:$0xff] (!%p6793_p9)   ;;  %v8063_v24 = vld [vmem:[#allocation7 + $0x100] ss:$16 sps:$4 sm:$0xff] (!%p6793_p9)   ;;  %v8133_v16 = vld [vmem:[#allocation7 + $0x284] ss:$16 sps:$4 sm:$0xff] (!%p6793_p9)  }
 0x35c   : > { %5542 = vmatpush1.bf16.msra.mxu0 (!%p6793_p9), %v8051_v27  ;;  %5624 = vmatpush1.bf16.msra.mxu1 (!%p6793_p9), %v8052_v7  ;;  %v8125_v17 = vld [vmem:[#allocation7 + $0x260] ss:$16 sps:$4 sm:$0xff] (!%p6793_p9)   ;;  %v8136_v19 = vld [vmem:[#allocation7 + $0x28c] ss:$16 sps:$4 sm:$0xff] (!%p6793_p9)   ;;  %v8134_v18 = vld [vmem:[#allocation7 + $0x288] ss:$16 sps:$4 sm:$0xff] (!%p6793_p9)  }
 0x35d   : > { %5543 = vmatprep.subr.bf16.mxu0 (!%p6793_p9), %v8053_v23  ;;  %5625 = vmatprep.subr.bf16.mxu1 (!%p6793_p9), %v8055_v44  ;;  %v8131_v21 = vld [vmem:[#allocation7 + $0x280] ss:$16 sps:$4 sm:$0xff] (!%p6793_p9)   ;;  %v8139_v27 = vld [vmem:[#allocation7 + $0x2a4] ss:$16 sps:$4 sm:$0xff] (!%p6793_p9)   ;;  %v8142_v7 = vld [vmem:[#allocation7 + $0x2ac] ss:$16 sps:$4 sm:$0xff] (!%p6793_p9)  }
 0x35e   : > { %v8137_v23 = vld [vmem:[#allocation7 + $0x2a0] ss:$16 sps:$4 sm:$0xff] (!%p6793_p9)   ;;  %v8140_v44 = vld [vmem:[#allocation7 + $0x2a8] ss:$16 sps:$4 sm:$0xff] (!%p6793_p9)  }
 0x360   : > { %5544 = vmatpush1.bf16.msra.mxu0 (!%p6793_p9), %v8057_v42  ;;  %5626 = vmatpush1.bf16.msra.mxu1 (!%p6793_p9), %v8058_v48  ;;  %v8145_v42 = vld [vmem:[#allocation7 + $0x2c4] ss:$16 sps:$4 sm:$0xff] (!%p6793_p9)   ;;  %v8148_v48 = vld [vmem:[#allocation7 + $0x2cc] ss:$16 sps:$4 sm:$0xff] (!%p6793_p9)  }
 0x361   : > { %5627 = vmatprep.subr.bf16.mxu1 (!%p6793_p9), %v8061_v20  ;;  %v8146_v20 = vld [vmem:[#allocation7 + $0x2c8] ss:$16 sps:$4 sm:$0xff] (!%p6793_p9)  }
 0x395   : > { %v4585_v26 = vpop.f32.mrb[28].mxu0 }
 0x396   : > { %v4626_v58 = vpop.f32.mrb[28].mxu1  ;;  %v4586_v12 = vadd.f32 %v4585_v26, %v4545_v35  ;;  %v4587_v29 = vpop.f32.mrb[29].mxu0  ;;  %v8059_v35 = vld [vmem:[#allocation7 + $0x104] ss:$16 sps:$4 sm:$0xff] (!%p6793_p9)  }
 0x397   : > { %v4628_v30 = vpop.f32.mrb[29].mxu1  ;;  %v4588_v15 = vadd.f32 %v4587_v29, %v4547_v45  ;;  %v4589_v31 = vpop.f32.mrb[30].mxu0  ;;  %v8064_v45 = vld [vmem:[#allocation7 + $0x108] ss:$16 sps:$4 sm:$0xff] (!%p6793_p9)   ;;  %v8065_v26 = vld [vmem:[#allocation7 + $0x124] ss:$16 sps:$4 sm:$0xff] (!%p6793_p9)   ;;  %5545 = vmatprep.subr.bf16.mxu0 (!%p6793_p9), %v8059_v35 }
 0x398   : > { %v4630_v32 = vpop.f32.mrb[30].mxu1  ;;  %v4627_v37 = vadd.f32 %v4626_v58, %v4586_v12  ;;  %v4590_v38 = vpop.f32.mrb[31].mxu0  ;;  %v8067_v58 = vld [vmem:[#allocation7 + $0x12c] ss:$16 sps:$4 sm:$0xff] (!%p6793_p9)   ;;  %v8069_v12 = vld [vmem:[#allocation7 + $0x120] ss:$16 sps:$4 sm:$0xff] (!%p6793_p9)   ;;  %5546 = vmatpush1.bf16.msra.mxu0 (!%p6793_p9), %v8063_v24  ;;  %5628 = vmatpush1.bf16.msra.mxu1 (!%p6793_p9), %v8064_v45 }
 0x399   : > { %v4631_v39 = vpop.f32.mrb[31].mxu1  ;;  %v4629_v40 = vadd.f32 %v4628_v30, %v4588_v15  ;;  %v8070_v29 = vld [vmem:[#allocation7 + $0x128] ss:$16 sps:$4 sm:$0xff] (!%p6793_p9)   ;;  %v8071_v30 = vld [vmem:[#allocation7 + $0x144] ss:$16 sps:$4 sm:$0xff] (!%p6793_p9)   ;;  %5547 = vmatprep.subr.bf16.mxu0 (!%p6793_p9), %v8065_v26  ;;  %5629 = vmatprep.subr.bf16.mxu1 (!%p6793_p9), %v8067_v58 }
 0x39a   : > { %v8073_v15 = vld [vmem:[#allocation7 + $0x14c] ss:$16 sps:$4 sm:$0xff] (!%p6793_p9)   ;;  %v8075_v31 = vld [vmem:[#allocation7 + $0x140] ss:$16 sps:$4 sm:$0xff] (!%p6793_p9)   ;;  %v8076_v32 = vld [vmem:[#allocation7 + $0x148] ss:$16 sps:$4 sm:$0xff] (!%p6793_p9)  }
 0x39b   : > { %v8079_v38 = vld [vmem:[#allocation7 + $0x16c] ss:$16 sps:$4 sm:$0xff] (!%p6793_p9)   ;;  %v4728_v39 = vld [vmem:[#allocation2 + $0x8] sm:$0xff] (!%p6793_p9)  ;;  %v8143_v35 = vld [vmem:[#allocation7 + $0x2c0] ss:$16 sps:$4 sm:$0xff] (!%p6793_p9)  }
 0x39c   : > { %5548 = vmatpush1.bf16.msra.mxu0 (!%p6793_p9), %v8069_v12  ;;  %5630 = vmatpush1.bf16.msra.mxu1 (!%p6793_p9), %v8070_v29  ;;  %v8151_v45 = vld [vmem:[#allocation7 + $0x2e4] ss:$16 sps:$4 sm:$0xff] (!%p6793_p9)   ;;  %v8154_v58 = vld [vmem:[#allocation7 + $0x2ec] ss:$16 sps:$4 sm:$0xff] (!%p6793_p9)   ;;  %v8149_v29 = vld [vmem:[#allocation7 + $0x2e0] ss:$16 sps:$4 sm:$0xff] (!%p6793_p9)  }
 0x39d   : > { %5549 = vmatprep.subr.bf16.mxu0 (!%p6793_p9), %v8071_v30  ;;  %5631 = vmatprep.subr.bf16.mxu1 (!%p6793_p9), %v8073_v15  ;;  %v8152_v30 = vld [vmem:[#allocation7 + $0x2e8] ss:$16 sps:$4 sm:$0xff] (!%p6793_p9)   ;;  %v8157_v15 = vld [vmem:[#allocation7 + $0x304] ss:$16 sps:$4 sm:$0xff] (!%p6793_p9)  }
 0x3a0   : > { %5550 = vmatpush1.bf16.msra.mxu0 (!%p6793_p9), %v8075_v31  ;;  %5632 = vmatpush1.bf16.msra.mxu1 (!%p6793_p9), %v8076_v32  ;;  %v8160_v31 = vld [vmem:[#allocation7 + $0x30c] ss:$16 sps:$4 sm:$0xff] (!%p6793_p9)   ;;  %v8155_v32 = vld [vmem:[#allocation7 + $0x300] ss:$16 sps:$4 sm:$0xff] (!%p6793_p9)  }
 0x3a1   : > { %5633 = vmatprep.subr.bf16.mxu1 (!%p6793_p9), %v8079_v38  ;;  %v8163_v38 = vld [vmem:[#allocation7 + $0x324] ss:$16 sps:$4 sm:$0xff] (!%p6793_p9)  }
 0x3d5   : > { %v4667_v41 = vpop.f32.mrb[32].mxu0 }
 0x3d6   : > { %v4708_v43 = vpop.f32.mrb[32].mxu1  ;;  %v4668_v46 = vadd.f32 %v4667_v41, %v4627_v37  ;;  %v4669_v53 = vpop.f32.mrb[33].mxu0  ;;  %v8077_v37 = vld [vmem:[#allocation7 + $0x164] ss:$16 sps:$4 sm:$0xff] (!%p6793_p9)   ;;  %v4732_v41 = vmax.f32 (!%p6793_p9), %v4728_v39, 0.0 }
 0x3d7   : > { %v4710_v28 = vpop.f32.mrb[33].mxu1  ;;  %v4670_v54 = vadd.f32 %v4669_v53, %v4629_v40  ;;  %v4671_v8 = vpop.f32.mrb[34].mxu0  ;;  %4726 = sbr.rel (%p6793_p9) target bundleno = 1507 (0x5e3), region = 80  ;;  %v8081_v40 = vld [vmem:[#allocation7 + $0x160] ss:$16 sps:$4 sm:$0xff] (!%p6793_p9)   ;;  %5551 = vmatprep.subr.bf16.mxu0 (!%p6793_p9), %v8077_v37 }
 0x3d8   : > { %v4712_v55 = vpop.f32.mrb[34].mxu1  ;;  %v4709_v36 = vadd.f32 %v4708_v43, %v4668_v46  ;;  %v4672_v56 = vpop.f32.mrb[35].mxu0  ;;  %v8082_v43 = vld [vmem:[#allocation7 + $0x168] ss:$16 sps:$4 sm:$0xff] (!%p6793_p9)   ;;  %v8083_v46 = vld [vmem:[#allocation7 + $0x184] ss:$16 sps:$4 sm:$0xff] (!%p6793_p9)   ;;  %5552 = vmatpush1.bf16.msra.mxu0 (!%p6793_p9), %v8081_v40 }
 0x3d9   : > { %v4713_v57 = vpop.f32.mrb[35].mxu1  ;;  %v4711_v59 = vadd.f32 %v4710_v28, %v4670_v54  ;;  %v8085_v53 = vld [vmem:[#allocation7 + $0x18c] ss:$16 sps:$4 sm:$0xff] (!%p6793_p9)   ;;  %v4736_v28 = vpack.c.bf16 (!%p6793_p9), %v4732_v41, %v4732_v41  ;;  %5634 = vmatpush1.bf16.msra.mxu1 (!%p6793_p9), %v8082_v43  ;;  %v8088_v54 = vld [vmem:[#allocation7 + $0x188] ss:$16 sps:$4 sm:$0xff] (!%p6793_p9)   ;;  %5553 = vmatprep.subr.bf16.mxu0 (!%p6793_p9), %v8083_v46 }
 0x3da   : > { %v4717_v22 = vadd.f32 %v4709_v36, %v447_v49  ;;  %v8087_v49 = vld [vmem:[#allocation7 + $0x180] ss:$16 sps:$4 sm:$0xff] (!%p6793_p9)   ;;  %5635 = vmatprep.subr.bf16.mxu1 (!%p6793_p9), %v8085_v53  ;;  %v8089_v8 = vld [vmem:[#allocation7 + $0x1a4] ss:$16 sps:$4 sm:$0xff] (!%p6793_p9)   ;;  %v8091_v55 = vld [vmem:[#allocation7 + $0x1ac] ss:$16 sps:$4 sm:$0xff] (!%p6793_p9)  }
 0x3db   : > { %v4718_v25 = vadd.f32 %v4711_v59, %v448_v33  ;;  %5561 = vmatprep.mubr.bf16.mxu0 (!%p6793_p9), %v4736_v28  ;;  %5643 = vmatprep.mubr.bf16.mxu1 (!%p6793_p9), %v4736_v28  ;;  %v8093_v36 = vld [vmem:[#allocation7 + $0x1a0] ss:$16 sps:$4 sm:$0xff] (!%p6793_p9)   ;;  %v8094_v33 = vld [vmem:[#allocation7 + $0x1a8] ss:$16 sps:$4 sm:$0xff] (!%p6793_p9)   ;;  %v8095_v56 = vld [vmem:[#allocation7 + $0x1c4] ss:$16 sps:$4 sm:$0xff] (!%p6793_p9)  }
 0x3dc   : > { %4721 = vst [vmem:[#allocation2 + $0x10] sm:$0xff] %v4717_v22  ;;  %5554 = vmatpush1.bf16.msra.mxu0 (!%p6793_p9), %v8087_v49  ;;  %v8097_v57 = vld [vmem:[#allocation7 + $0x1cc] ss:$16 sps:$4 sm:$0xff] (!%p6793_p9)   ;;  %v8099_v59 = vld [vmem:[#allocation7 + $0x1c0] ss:$16 sps:$4 sm:$0xff] (!%p6793_p9)  }
 0x3dd   : > { %4722 = vst [vmem:[#allocation2 + $0x18] sm:$0xff] %v4718_v25  ;;  %5636 = vmatpush1.bf16.msra.mxu1 (!%p6793_p9), %v8088_v54  ;;  %5555 = vmatprep.subr.bf16.mxu0 (!%p6793_p9), %v8089_v8  ;;  %v8100_v22 = vld [vmem:[#allocation7 + $0x1c8] ss:$16 sps:$4 sm:$0xff] (!%p6793_p9)   ;;  %v4727_v25 = vld [vmem:[#allocation2] sm:$0xff] (!%p6793_p9)  ;;  %v8169_v43 = vld [vmem:[#allocation7 + $0x344] ss:$16 sps:$4 sm:$0xff] (!%p6793_p9)  }
 0x3de   : > { %5637 = vmatprep.subr.bf16.mxu1 %v8091_v55  ;;  %v4731_v47 = vmax.f32 %v4727_v25, 0.0  ;;  %v8158_v37 = vld [vmem:[#allocation7 + $0x308] ss:$16 sps:$4 sm:$0xff]   ;;  %v8166_v39 = vld [vmem:[#allocation7 + $0x32c] ss:$16 sps:$4 sm:$0xff]  }
 0x3df   : > { %v8161_v40 = vld [vmem:[#allocation7 + $0x320] ss:$16 sps:$4 sm:$0xff]   ;;  %v8164_v41 = vld [vmem:[#allocation7 + $0x328] ss:$16 sps:$4 sm:$0xff]   ;;  %v8172_v46 = vld [vmem:[#allocation7 + $0x34c] ss:$16 sps:$4 sm:$0xff]  }
 0x3e0   : > { %5556 = vmatpush1.bf16.msra.mxu0 %v8093_v36  ;;  %v4735_v6 = vpack.c.bf16 %v4731_v47, %v4731_v47  ;;  %v8167_v53 = vld [vmem:[#allocation7 + $0x340] ss:$16 sps:$4 sm:$0xff]   ;;  %v8170_v28 = vld [vmem:[#allocation7 + $0x348] ss:$16 sps:$4 sm:$0xff]   ;;  %v8175_v49 = vld [vmem:[#allocation7 + $0x364] ss:$16 sps:$4 sm:$0xff]  }
 0x3e1   : > { %5638 = vmatpush1.bf16.msra.mxu1 %v8094_v33  ;;  %5557 = vmatprep.subr.bf16.mxu0 %v8095_v56  ;;  %v8178_v54 = vld [vmem:[#allocation7 + $0x36c] ss:$16 sps:$4 sm:$0xff]   ;;  %v8173_v8 = vld [vmem:[#allocation7 + $0x360] ss:$16 sps:$4 sm:$0xff]   ;;  %v8176_v55 = vld [vmem:[#allocation7 + $0x368] ss:$16 sps:$4 sm:$0xff]  }
 0x3e2   : > { %5639 = vmatprep.subr.bf16.mxu1 %v8097_v57  ;;  %v8181_v36 = vld [vmem:[#allocation7 + $0x384] ss:$16 sps:$4 sm:$0xff]   ;;  %v8184_v33 = vld [vmem:[#allocation7 + $0x38c] ss:$16 sps:$4 sm:$0xff]   ;;  %v8179_v56 = vld [vmem:[#allocation7 + $0x380] ss:$16 sps:$4 sm:$0xff]  }
 0x3e3   : > { %v8182_v57 = vld [vmem:[#allocation7 + $0x388] ss:$16 sps:$4 sm:$0xff]   ;;  %v8185_v25 = vld [vmem:[#allocation7 + $0x3a0] ss:$16 sps:$4 sm:$0xff]   ;;  %v8196_v47 = vld [vmem:[#allocation7 + $0x3cc] ss:$16 sps:$4 sm:$0xff]  }
 0x3e4   : > { %5558 = vmatpush1.bf16.msra.mxu0 %v8099_v59  ;;  %v4730_v24 = vld [vmem:[#allocation2 + $0x18] sm:$0xff] }
 0x3e5   : > { %5640 = vmatpush1.bf16.msra.mxu1 %v8100_v22  ;;  %5559 = vmatprep.subr.bf16.mxu0 %v8101_v62  ;;  %v4734_v26 = vmax.f32 %v4730_v24, 0.0  ;;  %v8187_v59 = vld [vmem:[#allocation7 + $0x3a4] ss:$16 sps:$4 sm:$0xff]   ;;  %v8190_v22 = vld [vmem:[#allocation7 + $0x3ac] ss:$16 sps:$4 sm:$0xff]  }
 0x3e6   : > { %5641 = vmatprep.subr.bf16.mxu1 %v8103_v61  ;;  %v8188_v62 = vld [vmem:[#allocation7 + $0x3a8] ss:$16 sps:$4 sm:$0xff]   ;;  %v8193_v61 = vld [vmem:[#allocation7 + $0x3c4] ss:$16 sps:$4 sm:$0xff]   ;;  %v8225_v24 = vld [vmem:[#allocation10 + $0x28] sm:$0xff]  }
 0x3e7   : > { %v4738_v12 = vpack.c.bf16 %v4734_v26, %v4734_v26  ;;  %v8227_v26 = vld [vmem:[#allocation10 + $0x70] sm:$0xff]  }
 0x3e8   : > { %5560 = vmatpush1.bf16.msra.mxu0 %v8105_v63  ;;  %v8191_v63 = vld [vmem:[#allocation7 + $0x3c0] ss:$16 sps:$4 sm:$0xff]  }
 0x3e9   : > { %5642 = vmatpush1.bf16.msra.mxu1 %v8106_v0  ;;  %5570 = vmatprep.subr.bf16.mxu0 %v8109_v1  ;;  %v8194_v0 = vld [vmem:[#allocation7 + $0x3c8] ss:$16 sps:$4 sm:$0xff]   ;;  %v4729_v1 = vld [vmem:[#allocation2 + $0x10] sm:$0xff] }
 0x3ea   : > { %5652 = vmatprep.subr.bf16.mxu1 %v8112_v50  ;;  %v8199_v50 = vld [vmem:[#allocation7 + $0x3e4] ss:$16 sps:$4 sm:$0xff]  }
 0x3eb   : > { %5562 = vmatmul.mubr.bf16.vlgmr.msra.gmra.mrb[0].mxu0 %v4735_v6 }
 0x3ec   : > { %5644 = vmatmul.mubr.bf16.vlgmr.msra.gmra.mrb[0].mxu1 %v4735_v6  ;;  %5571 = vmatpush1.bf16.msra.mxu0 %v8107_v2  ;;  %v8202_v6 = vld [vmem:[#allocation7 + $0x3ec] ss:$16 sps:$4 sm:$0xff]   ;;  %v4733_v2 = vmax.f32 %v4729_v1, 0.0 }
 0x3ed   : > { %5653 = vmatpush1.bf16.msra.mxu1 %v8110_v3  ;;  %5572 = vmatprep.subr.bf16.mxu0 %v8115_v4  ;;  %v8197_v3 = vld [vmem:[#allocation7 + $0x3e0] ss:$16 sps:$4 sm:$0xff]   ;;  %v8200_v4 = vld [vmem:[#allocation7 + $0x3e8] ss:$16 sps:$4 sm:$0xff]  }
 0x3ee   : > { %5654 = vmatprep.subr.bf16.mxu1 %v8118_v34  ;;  %5602 = vmatprep.mubr.bf16.mxu0 %v4738_v12  ;;  %v8203_v34 = vld [vmem:[#allocation10 + $0x40] sm:$0xff]  }
 0x3ef   : > { %5684 = vmatprep.mubr.bf16.mxu1 %v4738_v12  ;;  %v8229_v12 = vld [vmem:[#allocation10 + $0x30] sm:$0xff]  }
 0x3f0   : > { %5573 = vmatpush1.bf16.msra.mxu0 %v8113_v51  ;;  %v8204_v51 = vld [vmem:[#allocation10 + $0xc0] sm:$0xff]  }
 0x3f1   : > { %5655 = vmatpush1.bf16.msra.mxu1 %v8116_v5  ;;  %5574 = vmatprep.subr.bf16.mxu0 %v8121_v9  ;;  %v4737_v5 = vpack.c.bf16 %v4733_v2, %v4733_v2  ;;  %v8205_v9 = vld [vmem:[#allocation10] sm:$0xff]  }
 0x3f2   : > { %5656 = vmatprep.subr.bf16.mxu1 %v8124_v10  ;;  %v8206_v10 = vld [vmem:[#allocation10 + $0x80] sm:$0xff]  }
 0x3f4   : > { %5575 = vmatpush1.bf16.msra.mxu0 %v8119_v11  ;;  %v8207_v11 = vld [vmem:[#allocation10 + $0x48] sm:$0xff]  }
 0x3f5   : > { %5657 = vmatpush1.bf16.msra.mxu1 %v8122_v52  ;;  %5576 = vmatprep.subr.bf16.mxu0 %v8127_v13  ;;  %v8208_v52 = vld [vmem:[#allocation10 + $0xc8] sm:$0xff]  }
 0x3f6   : > { %5658 = vmatprep.subr.bf16.mxu1 %v8130_v14  ;;  %v8209_v13 = vld [vmem:[#allocation10 + $0x8] sm:$0xff]  }
 0x3f7   : > { %v8210_v14 = vld [vmem:[#allocation10 + $0x88] sm:$0xff]  }
 0x3f8   : > { %5577 = vmatpush1.bf16.msra.mxu0 %v8125_v17  ;;  %v8211_v17 = vld [vmem:[#allocation10 + $0x50] sm:$0xff]  }
 0x3f9   : > { %5659 = vmatpush1.bf16.msra.mxu1 %v8128_v60  ;;  %5578 = vmatprep.subr.bf16.mxu0 %v8133_v16  ;;  %v8212_v60 = vld [vmem:[#allocation10 + $0xd0] sm:$0xff]  }
 0x3fa   : > { %5660 = vmatprep.subr.bf16.mxu1 %v8136_v19  ;;  %v8213_v16 = vld [vmem:[#allocation10 + $0x10] sm:$0xff]  }
 0x3fb   : > { %v8214_v19 = vld [vmem:[#allocation10 + $0x90] sm:$0xff]  }
 0x3fc   : > { %5579 = vmatpush1.bf16.msra.mxu0 %v8131_v21  ;;  %v8215_v21 = vld [vmem:[#allocation10 + $0x58] sm:$0xff]  }
 0x3fd   : > { %5661 = vmatpush1.bf16.msra.mxu1 %v8134_v18  ;;  %5580 = vmatprep.subr.bf16.mxu0 %v8139_v27  ;;  %v8216_v18 = vld [vmem:[#allocation10 + $0xd8] sm:$0xff]  }
 0x3fe   : > { %5662 = vmatprep.subr.bf16.mxu1 %v8142_v7  ;;  %v8217_v27 = vld [vmem:[#allocation10 + $0x18] sm:$0xff]  }
 0x3ff   : > { %v8218_v7 = vld [vmem:[#allocation10 + $0x98] sm:$0xff]  }
 0x400   : > { %5581 = vmatpush1.bf16.msra.mxu0 %v8137_v23  ;;  %v8219_v23 = vld [vmem:[#allocation10 + $0x60] sm:$0xff]  }
 0x401   : > { %5663 = vmatpush1.bf16.msra.mxu1 %v8140_v44  ;;  %5582 = vmatprep.subr.bf16.mxu0 %v8145_v42  ;;  %v8220_v44 = vld [vmem:[#allocation10 + $0xe0] sm:$0xff]  }
 0x402   : > { %5664 = vmatprep.subr.bf16.mxu1 %v8148_v48  ;;  %v8221_v42 = vld [vmem:[#allocation10 + $0x20] sm:$0xff]  }
 0x403   : > { %v8222_v48 = vld [vmem:[#allocation10 + $0xa0] sm:$0xff]  }
 0x404   : > { %5583 = vmatpush1.bf16.msra.mxu0 %v8143_v35  ;;  %v8223_v35 = vld [vmem:[#allocation10 + $0x68] sm:$0xff]  }
 0x405   : > { %5665 = vmatpush1.bf16.msra.mxu1 %v8146_v20  ;;  %5584 = vmatprep.subr.bf16.mxu0 %v8151_v45  ;;  %v8224_v20 = vld [vmem:[#allocation10 + $0xe8] sm:$0xff]  }
 0x406   : > { %5666 = vmatprep.subr.bf16.mxu1 %v8154_v58  ;;  %v8226_v45 = vld [vmem:[#allocation10 + $0xa8] sm:$0xff]   ;;  %v8228_v58 = vld [vmem:[#allocation10 + $0xf0] sm:$0xff]  }
 0x408   : > { %5585 = vmatpush1.bf16.msra.mxu0 %v8149_v29  ;;  %v8230_v29 = vld [vmem:[#allocation10 + $0xb0] sm:$0xff]  }
 0x409   : > { %5667 = vmatpush1.bf16.msra.mxu1 %v8152_v30  ;;  %5586 = vmatprep.subr.bf16.mxu0 %v8157_v15  ;;  %v8231_v30 = vld [vmem:[#allocation10 + $0x78] sm:$0xff]  }
 0x40a   : > { %5668 = vmatprep.subr.bf16.mxu1 %v8160_v31  ;;  %v8232_v15 = vld [vmem:[#allocation10 + $0xf8] sm:$0xff]  }
 0x40b   : > { %v8233_v31 = vld [vmem:[#allocation10 + $0x38] sm:$0xff]  }
 0x40c   : > { %5587 = vmatpush1.bf16.msra.mxu0 %v8155_v32  ;;  %v8234_v32 = vld [vmem:[#allocation10 + $0xb8] sm:$0xff]  }
 0x40d   : > { %5669 = vmatpush1.bf16.msra.mxu1 %v8158_v37  ;;  %5588 = vmatprep.subr.bf16.mxu0 %v8163_v38  ;;  %v4869_v37 = vlaneseq }
 0x40e   : > { %5670 = vmatprep.subr.bf16.mxu1 %v8166_v39 }
 0x40f   : > { %v4870_v38 = vshrl.u32 %v4869_v37, 7 }
 0x410   : > { %5589 = vmatpush1.bf16.msra.mxu0 %v8161_v40 }
 0x411   : > { %5671 = vmatpush1.bf16.msra.mxu1 %v8164_v41  ;;  %5590 = vmatprep.subr.bf16.mxu0 %v8169_v43  ;;  %v4871_v39 = vsub.s32 0, %v4870_v38  ;;  %v4879_v40 = vsub.s32 2, %v4870_v38  ;;  %v4867_v41 = vld [vmem:[#allocation8] sm:$0xf]  ;;  %v4875_v43 = vsub.s32 1, %v4870_v38 }
 0x412   : > { %5672 = vmatprep.subr.bf16.mxu1 %v8172_v46  ;;  %v4883_v46 = vsub.s32 3, %v4870_v38 }
 0x414   : > { %5591 = vmatpush1.bf16.msra.mxu0 %v8167_v53  ;;  %v4872_v53 = vrot.slane %v4867_v41, %v4871_v39 }
 0x415   : > { %5673 = vmatpush1.bf16.msra.mxu1 %v8170_v28  ;;  %5592 = vmatprep.subr.bf16.mxu0 %v8175_v49  ;;  %v4880_v28 = vrot.slane %v4867_v41, %v4879_v40  ;;  %v4876_v49 = vrot.slane %v4867_v41, %v4875_v43 }
 0x416   : > { %5674 = vmatprep.subr.bf16.mxu1 %v8178_v54  ;;  %v4884_v54 = vrot.slane %v4867_v41, %v4883_v46 }
 0x418   : > { %5593 = vmatpush1.bf16.msra.mxu0 %v8173_v8 }
 0x419   : > { %5675 = vmatpush1.bf16.msra.mxu1 %v8176_v55  ;;  %5594 = vmatprep.subr.bf16.mxu0 %v8181_v36 }
 0x41a   : > { %5676 = vmatprep.subr.bf16.mxu1 %v8184_v33 }
 0x41c   : > { %5595 = vmatpush1.bf16.msra.mxu0 %v8179_v56 }
 0x41d   : > { %5677 = vmatpush1.bf16.msra.mxu1 %v8182_v57  ;;  %5596 = vmatprep.subr.bf16.mxu0 %v8187_v59 }
 0x41e   : > { %5678 = vmatprep.subr.bf16.mxu1 %v8190_v22 }
 0x420   : > { %5597 = vmatpush1.bf16.msra.mxu0 %v8185_v25 }
 0x421   : > { %5679 = vmatpush1.bf16.msra.mxu1 %v8188_v62  ;;  %5598 = vmatprep.subr.bf16.mxu0 %v8193_v61 }
 0x422   : > { %5680 = vmatprep.subr.bf16.mxu1 %v8196_v47 }
 0x424   : > { %5599 = vmatpush1.bf16.msra.mxu0 %v8191_v63 }
 0x425   : > { %5681 = vmatpush1.bf16.msra.mxu1 %v8194_v0  ;;  %5600 = vmatprep.subr.bf16.mxu0 %v8199_v50 }
 0x426   : > { %5682 = vmatprep.subr.bf16.mxu1 %v8202_v6 }
 0x428   : > { %5601 = vmatpush1.bf16.msra.mxu0 %v8197_v3 }
 0x429   : > { %5683 = vmatpush1.bf16.msra.mxu1 %v8200_v4  ;;  %6961 = vmatprep.subr.bf16.mxu0 %v8203_v34 }
 0x42a   : > { %6983 = vmatprep.subr.bf16.mxu1 %v8204_v51 }
 0x42b   : > { %5603 = vmatmul.mubr.bf16.vlgmr.msra.gmra.mrb[0].mxu0 %v4737_v5 }
 0x42c   : > { %5685 = vmatmul.mubr.bf16.vlgmr.msra.gmra.mrb[0].mxu1 %v4737_v5  ;;  %6962 = vmatpush3.bf16.msra.mxu0 %v8205_v9  ;;  %v6922_v5 = vld [vmem:[#allocation11] ss:$0 sm:$0xff] }
 0x42d   : > { %6984 = vmatpush3.bf16.msra.mxu1 %v8206_v10  ;;  %6963 = vmatprep.subr.bf16.mxu0 %v8207_v11 }
 0x42e   : > { %6985 = vmatprep.subr.bf16.mxu1 %v8208_v52 }
 0x430   : > { %6964 = vmatpush3.bf16.msra.mxu0 %v8209_v13 }
 0x431   : > { %6986 = vmatpush3.bf16.msra.mxu1 %v8210_v14  ;;  %6965 = vmatprep.subr.bf16.mxu0 %v8211_v17 }
 0x432   : > { %6987 = vmatprep.subr.bf16.mxu1 %v8212_v60 }
 0x434   : > { %6966 = vmatpush3.bf16.msra.mxu0 %v8213_v16 }
 0x435   : > { %6988 = vmatpush3.bf16.msra.mxu1 %v8214_v19  ;;  %6967 = vmatprep.subr.bf16.mxu0 %v8215_v21 }
 0x436   : > { %6989 = vmatprep.subr.bf16.mxu1 %v8216_v18 }
 0x438   : > { %6968 = vmatpush3.bf16.msra.mxu0 %v8217_v27 }
 0x439   : > { %6990 = vmatpush3.bf16.msra.mxu1 %v8218_v7  ;;  %6969 = vmatprep.subr.bf16.mxu0 %v8219_v23 }
 0x43a   : > { %6991 = vmatprep.subr.bf16.mxu1 %v8220_v44 }
 0x43c   : > { %6970 = vmatpush3.bf16.msra.mxu0 %v8221_v42 }
 0x43d   : > { %6992 = vmatpush3.bf16.msra.mxu1 %v8222_v48  ;;  %6971 = vmatprep.subr.bf16.mxu0 %v8223_v35 }
 0x43e   : > { %6993 = vmatprep.subr.bf16.mxu1 %v8224_v20 }
 0x440   : > { %6972 = vmatpush3.bf16.msra.mxu0 %v8225_v24 }
 0x441   : > { %6994 = vmatpush3.bf16.msra.mxu1 %v8226_v45  ;;  %6973 = vmatprep.subr.bf16.mxu0 %v8227_v26 }
 0x442   : > { %6995 = vmatprep.subr.bf16.mxu1 %v8228_v58 }
 0x444   : > { %6974 = vmatpush3.bf16.msra.mxu0 %v8229_v12 }
 0x445   : > { %6996 = vmatpush3.bf16.msra.mxu1 %v8230_v29  ;;  %6975 = vmatprep.subr.bf16.mxu0 %v8231_v30 }
 0x446   : > { %6997 = vmatprep.subr.bf16.mxu1 %v8232_v15 }
 0x448   : > { %6976 = vmatpush3.bf16.msra.mxu0 %v8233_v31 }
 0x449   : > { %6998 = vmatpush3.bf16.msra.mxu1 %v8234_v32 }
 0x4fe   : > { %v5604_v8 = vpop.f32.mrb[0].mxu0 }
 0x4ff   : > { %v5686_v55 = vpop.f32.mrb[0].mxu1  ;;  %v7005_v36 = vadd.f32 %v5604_v8, %v4872_v53  ;;  %v5606_v56 = vpop.f32.mrb[1].mxu0 }
 0x500   : > { %v7007_v33 = vadd.f32 %v5686_v55, %v4880_v28  ;;  %v5688_v57 = vpop.f32.mrb[1].mxu1  ;;  %v7006_v59 = vadd.f32 %v5606_v56, %v4876_v49  ;;  %v5608_v25 = vpop.f32.mrb[2].mxu0 }
 0x501   : > { %v7008_v22 = vadd.f32 %v5688_v57, %v4884_v54  ;;  %v5690_v62 = vpop.f32.mrb[2].mxu1  ;;  %v5693_v61 = vmax.f32 %v7005_v36, 0.0  ;;  %v5609_v63 = vpop.f32.mrb[3].mxu0 }
 0x502   : > { %v5695_v47 = vmax.f32 %v7007_v33, 0.0  ;;  %v5691_v0 = vpop.f32.mrb[3].mxu1  ;;  %v5694_v1 = vmax.f32 %v7006_v59, 0.0 }
 0x503   : > { %v5696_v50 = vmax.f32 %v7008_v22, 0.0  ;;  %v5697_v3 = vpack.c.bf16 %v5693_v61, %v5693_v61 }
 0x504   : > { %v5698_v6 = vpack.c.bf16 %v5694_v1, %v5694_v1  ;;  %v5699_v4 = vpack.c.bf16 %v5695_v47, %v5695_v47 }
 0x505   : > { %v5700_v2 = vpack.c.bf16 %v5696_v50, %v5696_v50 }
 0x506   : > { %5996 = vmatprep.mubr.bf16.mxu0 %v5698_v6 }
 0x507   : > { %6036 = vmatprep.mubr.bf16.mxu1 %v5700_v2  ;;  %5997 = vmatmul.mubr.bf16.vlgmr.msra.gmra.mrb[4].mxu0 %v5697_v3 }
 0x508   : > { %6037 = vmatmul.mubr.bf16.vlgmr.msra.gmra.mrb[4].mxu1 %v5699_v4 }
 0x5da   : > { %v6977_v34 = vpop.f32.mrb[4].mxu0 }
 0x5db   : > { %v6999_v51 = vpop.f32.mrb[4].mxu1  ;;  %v6978_v9 = vpop.f32.mrb[5].mxu0 }
 0x5dc   : > { %v7000_v10 = vpop.f32.mrb[5].mxu1  ;;  %v6979_v11 = vadd.f32 %v6978_v9, %v6977_v34  ;;  %v6980_v13 = vpop.f32.mrb[6].mxu0 }
 0x5dd   : > { %v7001_v52 = vadd.f32 %v7000_v10, %v6999_v51  ;;  %v7002_v14 = vpop.f32.mrb[6].mxu1  ;;  %v6981_v17 = vpop.f32.mrb[7].mxu0 }
 0x5de   : > { %v7003_v60 = vpop.f32.mrb[7].mxu1  ;;  %v5999_v16 = vadd.f32 %v6979_v11, %v6922_v5 }
 0x5e0   : > { %v6039_v19 = vadd.f32 %v7001_v52, %v5999_v16 }
 0x5e2   : > { %6044 = vst [vmem:[%s9532_s7] sm:$0xff] %v6039_v19 }
 0x5e3 PF: > { %s23_s29 = sadd.s32 1, %s8467_s29   ;;  %s9551_s24 = smov %s8451_s25 }
 0x5e4   : > { %p20_p1 = scmp.ge.s32.totalorder %s23_s29, 6   ;;  %s9552_s25 = smov %s8455_s26 }
 0x5e5   : > { %s9553_s26 = smov %s8702_s19  ;;  %s9554_s27 = smov %s8463_s28 }
 0x5e6   : > { %s9555_s28 = smov %s9557_s22  ;;  %22 = sbr.rel (!%p20_p1) target bundleno = 9 (0x9), region = 119 }
 0x5ed   :  { %6064 = vsyncpa [#allocation4], 1 }
 0x5ee   :  { %6066 = vsyncpa [#allocation4 + $0x1], 1 }
 0x5ef   :  { %6067 = vsyncpa [#allocation6], 1 }
 0x5f0   :  { %6068 = vsyncpa [#allocation9], 1 }
 0x5f1   :  { %6069 = vsyncpa [#allocation12], 1 }

</bundles_post_ra>
